<compile_context>
chip_gen: v7x
topology: tpu7x:2x2x1
jax: 0.10.0
libtpu: 0.0.40
codegen_flags: <defaults>
</compile_context>

<pallas_src>
import jax
import jax.numpy as jnp
from jax.experimental import pallas as pl
from jax.experimental.pallas import tpu as pltpu


_TAPS = [(dy, dx) for dy in range(3) for dx in range(3)]


def _zero_halo(ref, H, W, C):
    """Zero only the 1-pixel border of a (H+2, W+2, C) padded scratch."""
    dt = ref.dtype
    ref[0:1, :, :] = jnp.zeros((1, W + 2, C), dt)
    ref[H + 1:H + 2, :, :] = jnp.zeros((1, W + 2, C), dt)
    ref[1:H + 1, 0:1, :] = jnp.zeros((H, 1, C), dt)
    ref[1:H + 1, W + 1:W + 2, :] = jnp.zeros((H, 1, C), dt)


# ----------------------------- fused Pallas kernel ------------------------- #
def _basic_block_kernel(x_ref, w1_ref, b1_ref, w2_ref, b2_ref, out_ref,
                        xp_scr, mid_scr, col1_scr, col2_scr):
    """Fused BasicBlock forward for one batch element.

    x_ref   : [1, Cin, H*W]      flattened-NCHW input block (lane-dense load)
    w1_ref  : [9*Cin, Cmid]      conv1 weight, BN1 scale folded, im2col layout
    b1_ref  : [1, Cmid]          folded BN1 bias (f32)
    w2_ref  : [9*Cmid, Cout]     conv2 weight, BN2 scale folded, im2col layout
    b2_ref  : [1, Cout]          folded BN2 bias (f32)
    out_ref : [1, Cout, H*W]     flattened-NCHW output block (lane-dense store)
    xp_scr  : [H+2, W+2, Cin]    VMEM: zero-halo padded input (NHWC)
    mid_scr : [H+2, W+2, Cmid]   VMEM: zero-halo padded relu1(bn1(conv1))
    col1_scr: [H*W, 9*Cin]       VMEM: im2col patches, stage 1
    col2_scr: [H*W, 9*Cmid]      VMEM: im2col patches, stage 2
    """
    Cin = x_ref.shape[1]
    HW = x_ref.shape[2]
    H = xp_scr.shape[0] - 2
    W = xp_scr.shape[1] - 2
    Cmid = w1_ref.shape[1]
    Cout = w2_ref.shape[1]
    cdt = xp_scr.dtype

    # NCHW -> NHWC layout change folded into the kernel (f32 XLU transpose).
    x_hwc = x_ref[0].astype(jnp.float32).T                    # (H*W, Cin), f32

    # ---- stage 1: pad -> im2col -> single matmul (K = 9*Cin) -> bias+ReLU ---
    _zero_halo(xp_scr, H, W, Cin)                              # halo only
    xp_scr[1:H + 1, 1:W + 1, :] = x_hwc.reshape(H, W, Cin).astype(cdt)

    for t, (dy, dx) in enumerate(_TAPS):
        col1_scr[:, t * Cin:(t + 1) * Cin] = (
            xp_scr[dy:dy + H, dx:dx + W, :].reshape(HW, Cin))
    h1 = jnp.dot(col1_scr[...], w1_ref[...],
                 preferred_element_type=jnp.float32)           # (H*W, Cmid)
    mid = jnp.maximum(h1 + b1_ref[...], 0.0)

    # Stage-1 activation stays resident in VMEM (padded for the stage-2 halo).
    _zero_halo(mid_scr, H, W, Cmid)
    mid_scr[1:H + 1, 1:W + 1, :] = mid.reshape(H, W, Cmid).astype(cdt)

    # ---- stage 2: im2col -> single matmul -> bias + identity residual + ReLU
    for t, (dy, dx) in enumerate(_TAPS):
        col2_scr[:, t * Cmid:(t + 1) * Cmid] = (
            mid_scr[dy:dy + H, dx:dx + W, :].reshape(HW, Cmid))
    h2 = jnp.dot(col2_scr[...], w2_ref[...],
                 preferred_element_type=jnp.float32)           # (H*W, Cout)

    y = jnp.maximum(h2 + b2_ref[...] + x_hwc, 0.0)             # residual + ReLU
    # NHWC -> NCHW folded into the store (f32 XLU transpose, lane-dense vst).
    out_ref[0] = y.T.astype(out_ref.dtype)                     # (Cout, H*W)


# --------------------------- parameters (synthetic) ------------------------ #
def init_basic_block_params(key, inplanes, planes):
    """Deterministic parameter init; shapes match the PyTorch module."""
    k1, k2 = jax.random.split(key)
    # PyTorch conv weights are OIHW; store HWIO for the NHWC-compute kernel.
    w1_oihw = jax.random.normal(k1, (planes, inplanes, 3, 3), jnp.float32) * 0.1
    w2_oihw = jax.random.normal(k2, (planes, planes, 3, 3), jnp.float32) * 0.1
    c1 = jnp.arange(planes, dtype=jnp.float32)
    return dict(
        w1=jnp.transpose(w1_oihw, (2, 3, 1, 0)),   # HWIO
        w2=jnp.transpose(w2_oihw, (2, 3, 1, 0)),   # HWIO
        # BatchNorm2d params (eval-mode semantics), deterministic, non-trivial.
        bn1_gamma=1.0 + 0.1 * c1,
        bn1_beta=0.05 * c1,
        bn1_mean=0.01 * c1,
        bn1_var=1.0 + 0.2 * c1,
        bn2_gamma=1.0 - 0.05 * c1,
        bn2_beta=-0.03 * c1,
        bn2_mean=-0.02 * c1,
        bn2_var=1.0 + 0.1 * c1,
    )


# --------------------------- BasicBlock wrapper ---------------------------- #
def basic_block_forward(x_nchw, params, eps=1e-5, compute_dtype=jnp.float32):
    """BasicBlock forward, stride=1, downsample=None (identity residual).

    Set `compute_dtype=jnp.bfloat16` at real channel widths to halve HBM/VMEM
    traffic and double MXU throughput (accumulation, bias, residual and the
    epilogue stay f32). Kept f32 here for a tight match at the tiny test size.
    """
    N, Cin, H, W = x_nchw.shape
    w1, w2 = params["w1"], params["w2"]                  # HWIO
    Cmid, Cout = w1.shape[-1], w2.shape[-1]
    if Cin != Cout:
        # TODO(synk): stride>1 / downsample path not implemented (module is
        # used here with stride=1, downsample=None -> identity residual).
        raise ValueError("identity residual requires inplanes == planes")

    # Fold eval-mode BatchNorm into the convs (exact):
    #   bn(conv(x, w)) = conv(x, w*s) + (beta - mean*s),  s = gamma/sqrt(var+eps)
    s1 = params["bn1_gamma"] / jnp.sqrt(params["bn1_var"] + eps)
    b1 = params["bn1_beta"] - params["bn1_mean"] * s1
    s2 = params["bn2_gamma"] / jnp.sqrt(params["bn2_var"] + eps)
    b2 = params["bn2_beta"] - params["bn2_mean"] * s2

    # im2col weight layout: (3,3,Cin,Cout) -> (9*Cin, Cout), tap-major rows
    # matching the in-kernel col buffer layout.
    w1f = (w1 * s1[None, None, None, :]).reshape(9 * Cin, Cmid).astype(compute_dtype)
    w2f = (w2 * s2[None, None, None, :]).reshape(9 * Cmid, Cout).astype(compute_dtype)
    b1f = b1.reshape(1, Cmid).astype(jnp.float32)
    b2f = b2.reshape(1, Cout).astype(jnp.float32)

    # Flattened NCHW views (free reshapes, no wrapper transpose passes).
    HW = H * W
    x_cf = x_nchw.reshape(N, Cin, HW).astype(compute_dtype)
    out_dtype = x_nchw.dtype

    # Cost estimate: 2 conv stages as single im2col matmuls.
    itemsize = jnp.dtype(compute_dtype).itemsize
    flops = 2 * N * HW * 9 * (Cin * Cmid + Cmid * Cout)
    bytes_accessed = (x_cf.size * itemsize
                      + (w1f.size + w2f.size) * itemsize
                      + (b1f.size + b2f.size) * 4
                      + N * Cout * HW * jnp.dtype(out_dtype).itemsize)

    # Rough per-step VMEM need (double-buffered I/O + weights + scratch),
    # clamped to 48 MiB so it never exceeds v7x's 64 MiB per-core VMEM.
    blk_bytes = (Cin * HW * itemsize
                 + Cout * HW * jnp.dtype(out_dtype).itemsize)
    w_bytes = (w1f.size + w2f.size) * itemsize + (b1f.size + b2f.size) * 4
    scr_bytes = ((H + 2) * (W + 2) * (Cin + Cmid)
                 + HW * 9 * (Cin + Cmid)) * itemsize
    vmem_need = 2 * blk_bytes + 2 * w_bytes + scr_bytes
    vmem_limit = int(min(max(2 * vmem_need, 16 << 20), 48 << 20))

    out_cf = pl.pallas_call(
        _basic_block_kernel,
        out_shape=jax.ShapeDtypeStruct((N, Cout, HW), out_dtype),
        grid_spec=pltpu.PrefetchScalarGridSpec(
            num_scalar_prefetch=0,
            grid=(N,),                                    # one batch image per step
            in_specs=[
                pl.BlockSpec((1, Cin, HW), lambda n: (n, 0, 0)),
                pl.BlockSpec((9 * Cin, Cmid), lambda n: (0, 0)),
                pl.BlockSpec((1, Cmid), lambda n: (0, 0)),
                pl.BlockSpec((9 * Cmid, Cout), lambda n: (0, 0)),
                pl.BlockSpec((1, Cout), lambda n: (0, 0)),
            ],
            out_specs=pl.BlockSpec((1, Cout, HW), lambda n: (n, 0, 0)),
            scratch_shapes=[
                pltpu.VMEM((H + 2, W + 2, Cin), compute_dtype),   # padded input
                pltpu.VMEM((H + 2, W + 2, Cmid), compute_dtype),  # padded stage-1 out
                pltpu.VMEM((HW, 9 * Cin), compute_dtype),         # im2col stage 1
                pltpu.VMEM((HW, 9 * Cmid), compute_dtype),        # im2col stage 2
            ],
        ),
        compiler_params=pltpu.CompilerParams(
            dimension_semantics=("parallel",),            # batch shards across TCs (v7x)
            vmem_limit_bytes=vmem_limit,
        ),
        cost_estimate=pl.CostEstimate(
            flops=flops, transcendentals=0, bytes_accessed=int(bytes_accessed)),
    )(x_cf, w1f, b1f, w2f, b2f)

    return out_cf.reshape(N, Cout, H, W)                  # free reshape (NCHW)


# Pure-JAX reference (same NCHW semantics as the PyTorch module, eval-mode BN).
def basic_block_reference(x_nchw, params, eps=1e-5):
    def conv(x, w_hwio):
        return jax.lax.conv_general_dilated(
            x, w_hwio, window_strides=(1, 1), padding=((1, 1), (1, 1)),
            dimension_numbers=("NCHW", "HWIO", "NCHW"))

    def bn(x, g, b, m, v):
        g = g[None, :, None, None]; b = b[None, :, None, None]
        m = m[None, :, None, None]; v = v[None, :, None, None]
        return (x - m) / jnp.sqrt(v + eps) * g + b

    out = conv(x_nchw, params["w1"])
    out = jnp.maximum(bn(out, params["bn1_gamma"], params["bn1_beta"],
                         params["bn1_mean"], params["bn1_var"]), 0.0)
    out = conv(out, params["w2"])
    out = bn(out, params["bn2_gamma"], params["bn2_beta"],
             params["bn2_mean"], params["bn2_var"])
    return jnp.maximum(out + x_nchw, 0.0)


if __name__ == "__main__":
    key = jax.random.PRNGKey(0)
    kx, kp = jax.random.split(key)

    N, C, Hh, Ww = 2, 4, 16, 16        # inplanes = planes = 4, stride = 1
    x = jax.random.normal(kx, (N, C, Hh, Ww), jnp.float32)
    params = init_basic_block_params(kp, inplanes=C, planes=C)

    out = jax.jit(basic_block_forward)(x, params)
    out = jax.block_until_ready(out)

    ref = basic_block_reference(x, params)
    assert out.shape == ref.shape == (N, C, Hh, Ww)
    assert jnp.allclose(out, ref, atol=1e-3, rtol=1e-3), "mismatch vs reference"

    print("KERNEL_OK")
</pallas_src>

<mosaic_0001>
module attributes {stable_mosaic.version = 11 : i64} {
  func.func @_basic_block_kernel(%arg0: i32, %arg1: memref<1x4x256xf32, #tpu.memory_space<vmem>>, %arg2: memref<36x4xf32, #tpu.memory_space<vmem>>, %arg3: memref<1x4xf32, #tpu.memory_space<vmem>>, %arg4: memref<36x4xf32, #tpu.memory_space<vmem>>, %arg5: memref<1x4xf32, #tpu.memory_space<vmem>>, %arg6: memref<1x4x256xf32, #tpu.memory_space<vmem>>, %arg7: memref<18x18x4xf32, #tpu.memory_space<vmem>>, %arg8: memref<18x18x4xf32, #tpu.memory_space<vmem>>, %arg9: memref<256x36xf32, #tpu.memory_space<vmem>>, %arg10: memref<256x36xf32, #tpu.memory_space<vmem>>) attributes {dimension_semantics = [#tpu.dimension_semantics<parallel>], iteration_bounds = array<i64: 2>, scalar_prefetch = 0 : i64, scratch_operands = 4 : i64, tpu.core_type = #tpu.core_type<tc>, window_params = [{transform_indices = @transform_0, window_bounds = array<i64: 1, 4, 256>}, {pipeline_mode = #tpu.pipeline_mode<synchronous>, transform_indices = @transform_1, window_bounds = array<i64: 36, 4>}, {pipeline_mode = #tpu.pipeline_mode<synchronous>, transform_indices = @transform_2, window_bounds = array<i64: 1, 4>}, {pipeline_mode = #tpu.pipeline_mode<synchronous>, transform_indices = @transform_3, window_bounds = array<i64: 36, 4>}, {pipeline_mode = #tpu.pipeline_mode<synchronous>, transform_indices = @transform_4, window_bounds = array<i64: 1, 4>}, {transform_indices = @transform_5, window_bounds = array<i64: 1, 4, 256>}]} {
    %c0 = arith.constant 0 : index
    %c0_0 = arith.constant 0 : index
    %c0_1 = arith.constant 0 : index
    %0 = vector.load %arg1[%c0, %c0_0, %c0_1] : memref<1x4x256xf32, #tpu.memory_space<vmem>>, vector<1x4x256xf32>
    %1 = vector.shape_cast %0 : vector<1x4x256xf32> to vector<4x256xf32>
    %2 = tpu.transpose %1, [1, 0] : vector<4x256xf32> -> vector<256x4xf32>
    %cst = arith.constant 0.000000e+00 : f32
    %3 = vector.broadcast %cst : f32 to vector<1x18x4xf32>
    %c0_2 = arith.constant 0 : index
    %c0_3 = arith.constant 0 : index
    %c0_4 = arith.constant 0 : index
    %4 = vector.load %arg7[%c0_2, %c0_3, %c0_4] : memref<18x18x4xf32, #tpu.memory_space<vmem>>, vector<1x18x4xf32>
    tpu.vector_store %arg7[%c0_2, %c0_3, %c0_4], %3 {strides = array<i32>} : memref<18x18x4xf32, #tpu.memory_space<vmem>>, vector<1x18x4xf32>,
    %cst_5 = arith.constant 0.000000e+00 : f32
    %5 = vector.broadcast %cst_5 : f32 to vector<1x18x4xf32>
    %c17 = arith.constant 17 : index
    %c0_6 = arith.constant 0 : index
    %c0_7 = arith.constant 0 : index
    %6 = vector.load %arg7[%c17, %c0_6, %c0_7] : memref<18x18x4xf32, #tpu.memory_space<vmem>>, vector<1x18x4xf32>
    tpu.vector_store %arg7[%c17, %c0_6, %c0_7], %5 {strides = array<i32>} : memref<18x18x4xf32, #tpu.memory_space<vmem>>, vector<1x18x4xf32>,
    %cst_8 = arith.constant 0.000000e+00 : f32
    %7 = vector.broadcast %cst_8 : f32 to vector<16x1x4xf32>
    %c1 = arith.constant 1 : index
    %c0_9 = arith.constant 0 : index
    %c0_10 = arith.constant 0 : index
    %8 = vector.load %arg7[%c1, %c0_9, %c0_10] : memref<18x18x4xf32, #tpu.memory_space<vmem>>, vector<16x1x4xf32>
    tpu.vector_store %arg7[%c1, %c0_9, %c0_10], %7 {strides = array<i32>} : memref<18x18x4xf32, #tpu.memory_space<vmem>>, vector<16x1x4xf32>,
    %cst_11 = arith.constant 0.000000e+00 : f32
    %9 = vector.broadcast %cst_11 : f32 to vector<16x1x4xf32>
    %c1_12 = arith.constant 1 : index
    %c17_13 = arith.constant 17 : index
    %c0_14 = arith.constant 0 : index
    %10 = vector.load %arg7[%c1_12, %c17_13, %c0_14] : memref<18x18x4xf32, #tpu.memory_space<vmem>>, vector<16x1x4xf32>
    tpu.vector_store %arg7[%c1_12, %c17_13, %c0_14], %9 {strides = array<i32>} : memref<18x18x4xf32, #tpu.memory_space<vmem>>, vector<16x1x4xf32>,
    %11 = vector.shape_cast %2 : vector<256x4xf32> to vector<16x16x4xf32>
    %c1_15 = arith.constant 1 : index
    %c1_16 = arith.constant 1 : index
    %c0_17 = arith.constant 0 : index
    %12 = vector.load %arg7[%c1_15, %c1_16, %c0_17] : memref<18x18x4xf32, #tpu.memory_space<vmem>>, vector<16x16x4xf32>
    tpu.vector_store %arg7[%c1_15, %c1_16, %c0_17], %11 {strides = array<i32>} : memref<18x18x4xf32, #tpu.memory_space<vmem>>, vector<16x16x4xf32>,
    %c0_18 = arith.constant 0 : index
    %c0_19 = arith.constant 0 : index
    %c0_20 = arith.constant 0 : index
    %13 = vector.load %arg7[%c0_18, %c0_19, %c0_20] : memref<18x18x4xf32, #tpu.memory_space<vmem>>, vector<16x16x4xf32>
    %14 = vector.shape_cast %13 : vector<16x16x4xf32> to vector<256x4xf32>
    %c0_21 = arith.constant 0 : index
    %c0_22 = arith.constant 0 : index
    %15 = vector.load %arg9[%c0_21, %c0_22] : memref<256x36xf32, #tpu.memory_space<vmem>>, vector<256x4xf32>
    tpu.vector_store %arg9[%c0_21, %c0_22], %14 {strides = array<i32>} : memref<256x36xf32, #tpu.memory_space<vmem>>, vector<256x4xf32>,
    %c0_23 = arith.constant 0 : index
    %c1_24 = arith.constant 1 : index
    %c0_25 = arith.constant 0 : index
    %16 = vector.load %arg7[%c0_23, %c1_24, %c0_25] : memref<18x18x4xf32, #tpu.memory_space<vmem>>, vector<16x16x4xf32>
    %17 = vector.shape_cast %16 : vector<16x16x4xf32> to vector<256x4xf32>
    %c0_26 = arith.constant 0 : index
    %c4 = arith.constant 4 : index
    %18 = vector.load %arg9[%c0_26, %c4] : memref<256x36xf32, #tpu.memory_space<vmem>>, vector<256x4xf32>
    tpu.vector_store %arg9[%c0_26, %c4], %17 {strides = array<i32>} : memref<256x36xf32, #tpu.memory_space<vmem>>, vector<256x4xf32>,
    %c0_27 = arith.constant 0 : index
    %c2 = arith.constant 2 : index
    %c0_28 = arith.constant 0 : index
    %19 = vector.load %arg7[%c0_27, %c2, %c0_28] : memref<18x18x4xf32, #tpu.memory_space<vmem>>, vector<16x16x4xf32>
    %20 = vector.shape_cast %19 : vector<16x16x4xf32> to vector<256x4xf32>
    %c0_29 = arith.constant 0 : index
    %c8 = arith.constant 8 : index
    %21 = vector.load %arg9[%c0_29, %c8] : memref<256x36xf32, #tpu.memory_space<vmem>>, vector<256x4xf32>
    tpu.vector_store %arg9[%c0_29, %c8], %20 {strides = array<i32>} : memref<256x36xf32, #tpu.memory_space<vmem>>, vector<256x4xf32>,
    %c1_30 = arith.constant 1 : index
    %c0_31 = arith.constant 0 : index
    %c0_32 = arith.constant 0 : index
    %22 = vector.load %arg7[%c1_30, %c0_31, %c0_32] : memref<18x18x4xf32, #tpu.memory_space<vmem>>, vector<16x16x4xf32>
    %23 = vector.shape_cast %22 : vector<16x16x4xf32> to vector<256x4xf32>
    %c0_33 = arith.constant 0 : index
    %c12 = arith.constant 12 : index
    %24 = vector.load %arg9[%c0_33, %c12] : memref<256x36xf32, #tpu.memory_space<vmem>>, vector<256x4xf32>
    tpu.vector_store %arg9[%c0_33, %c12], %23 {strides = array<i32>} : memref<256x36xf32, #tpu.memory_space<vmem>>, vector<256x4xf32>,
    %c1_34 = arith.constant 1 : index
    %c1_35 = arith.constant 1 : index
    %c0_36 = arith.constant 0 : index
    %25 = vector.load %arg7[%c1_34, %c1_35, %c0_36] : memref<18x18x4xf32, #tpu.memory_space<vmem>>, vector<16x16x4xf32>
    %26 = vector.shape_cast %25 : vector<16x16x4xf32> to vector<256x4xf32>
    %c0_37 = arith.constant 0 : index
    %c16 = arith.constant 16 : index
    %27 = vector.load %arg9[%c0_37, %c16] : memref<256x36xf32, #tpu.memory_space<vmem>>, vector<256x4xf32>
    tpu.vector_store %arg9[%c0_37, %c16], %26 {strides = array<i32>} : memref<256x36xf32, #tpu.memory_space<vmem>>, vector<256x4xf32>,
    %c1_38 = arith.constant 1 : index
    %c2_39 = arith.constant 2 : index
    %c0_40 = arith.constant 0 : index
    %28 = vector.load %arg7[%c1_38, %c2_39, %c0_40] : memref<18x18x4xf32, #tpu.memory_space<vmem>>, vector<16x16x4xf32>
    %29 = vector.shape_cast %28 : vector<16x16x4xf32> to vector<256x4xf32>
    %c0_41 = arith.constant 0 : index
    %c20 = arith.constant 20 : index
    %30 = vector.load %arg9[%c0_41, %c20] : memref<256x36xf32, #tpu.memory_space<vmem>>, vector<256x4xf32>
    tpu.vector_store %arg9[%c0_41, %c20], %29 {strides = array<i32>} : memref<256x36xf32, #tpu.memory_space<vmem>>, vector<256x4xf32>,
    %c2_42 = arith.constant 2 : index
    %c0_43 = arith.constant 0 : index
    %c0_44 = arith.constant 0 : index
    %31 = vector.load %arg7[%c2_42, %c0_43, %c0_44] : memref<18x18x4xf32, #tpu.memory_space<vmem>>, vector<16x16x4xf32>
    %32 = vector.shape_cast %31 : vector<16x16x4xf32> to vector<256x4xf32>
    %c0_45 = arith.constant 0 : index
    %c24 = arith.constant 24 : index
    %33 = vector.load %arg9[%c0_45, %c24] : memref<256x36xf32, #tpu.memory_space<vmem>>, vector<256x4xf32>
    tpu.vector_store %arg9[%c0_45, %c24], %32 {strides = array<i32>} : memref<256x36xf32, #tpu.memory_space<vmem>>, vector<256x4xf32>,
    %c2_46 = arith.constant 2 : index
    %c1_47 = arith.constant 1 : index
    %c0_48 = arith.constant 0 : index
    %34 = vector.load %arg7[%c2_46, %c1_47, %c0_48] : memref<18x18x4xf32, #tpu.memory_space<vmem>>, vector<16x16x4xf32>
    %35 = vector.shape_cast %34 : vector<16x16x4xf32> to vector<256x4xf32>
    %c0_49 = arith.constant 0 : index
    %c28 = arith.constant 28 : index
    %36 = vector.load %arg9[%c0_49, %c28] : memref<256x36xf32, #tpu.memory_space<vmem>>, vector<256x4xf32>
    tpu.vector_store %arg9[%c0_49, %c28], %35 {strides = array<i32>} : memref<256x36xf32, #tpu.memory_space<vmem>>, vector<256x4xf32>,
    %c2_50 = arith.constant 2 : index
    %c2_51 = arith.constant 2 : index
    %c0_52 = arith.constant 0 : index
    %37 = vector.load %arg7[%c2_50, %c2_51, %c0_52] : memref<18x18x4xf32, #tpu.memory_space<vmem>>, vector<16x16x4xf32>
    %38 = vector.shape_cast %37 : vector<16x16x4xf32> to vector<256x4xf32>
    %c0_53 = arith.constant 0 : index
    %c32 = arith.constant 32 : index
    %39 = vector.load %arg9[%c0_53, %c32] : memref<256x36xf32, #tpu.memory_space<vmem>>, vector<256x4xf32>
    tpu.vector_store %arg9[%c0_53, %c32], %38 {strides = array<i32>} : memref<256x36xf32, #tpu.memory_space<vmem>>, vector<256x4xf32>,
    %c0_54 = arith.constant 0 : index
    %c0_55 = arith.constant 0 : index
    %40 = vector.load %arg9[%c0_54, %c0_55] : memref<256x36xf32, #tpu.memory_space<vmem>>, vector<256x36xf32>
    %c0_56 = arith.constant 0 : index
    %c0_57 = arith.constant 0 : index
    %41 = vector.load %arg2[%c0_56, %c0_57] : memref<36x4xf32, #tpu.memory_space<vmem>>, vector<36x4xf32>
    %cst_58 = arith.constant dense<0.000000e+00> : vector<256x4xf32>
    %42 = tpu.matmul %40, %41, %cst_58 {dimension_numbers = #tpu.dot_dimension_numbers<[1], [0], [0], [1], [0, 0, 1, 1], [], []>} : vector<256x36xf32>, vector<36x4xf32>, vector<256x4xf32> -> vector<256x4xf32>
    %c0_59 = arith.constant 0 : index
    %c0_60 = arith.constant 0 : index
    %43 = vector.load %arg3[%c0_59, %c0_60] : memref<1x4xf32, #tpu.memory_space<vmem>>, vector<1x4xf32>
    %44 = vector.broadcast %43 : vector<1x4xf32> to vector<256x4xf32>
    %45 = arith.addf %42, %44 : vector<256x4xf32>
    %cst_61 = arith.constant 0.000000e+00 : f32
    %46 = vector.broadcast %cst_61 : f32 to vector<256x4xf32>
    %47 = arith.maximumf %45, %46 : vector<256x4xf32>
    %cst_62 = arith.constant 0.000000e+00 : f32
    %48 = vector.broadcast %cst_62 : f32 to vector<1x18x4xf32>
    %c0_63 = arith.constant 0 : index
    %c0_64 = arith.constant 0 : index
    %c0_65 = arith.constant 0 : index
    %49 = vector.load %arg8[%c0_63, %c0_64, %c0_65] : memref<18x18x4xf32, #tpu.memory_space<vmem>>, vector<1x18x4xf32>
    tpu.vector_store %arg8[%c0_63, %c0_64, %c0_65], %48 {strides = array<i32>} : memref<18x18x4xf32, #tpu.memory_space<vmem>>, vector<1x18x4xf32>,
    %cst_66 = arith.constant 0.000000e+00 : f32
    %50 = vector.broadcast %cst_66 : f32 to vector<1x18x4xf32>
    %c17_67 = arith.constant 17 : index
    %c0_68 = arith.constant 0 : index
    %c0_69 = arith.constant 0 : index
    %51 = vector.load %arg8[%c17_67, %c0_68, %c0_69] : memref<18x18x4xf32, #tpu.memory_space<vmem>>, vector<1x18x4xf32>
    tpu.vector_store %arg8[%c17_67, %c0_68, %c0_69], %50 {strides = array<i32>} : memref<18x18x4xf32, #tpu.memory_space<vmem>>, vector<1x18x4xf32>,
    %cst_70 = arith.constant 0.000000e+00 : f32
    %52 = vector.broadcast %cst_70 : f32 to vector<16x1x4xf32>
    %c1_71 = arith.constant 1 : index
    %c0_72 = arith.constant 0 : index
    %c0_73 = arith.constant 0 : index
    %53 = vector.load %arg8[%c1_71, %c0_72, %c0_73] : memref<18x18x4xf32, #tpu.memory_space<vmem>>, vector<16x1x4xf32>
    tpu.vector_store %arg8[%c1_71, %c0_72, %c0_73], %52 {strides = array<i32>} : memref<18x18x4xf32, #tpu.memory_space<vmem>>, vector<16x1x4xf32>,
    %cst_74 = arith.constant 0.000000e+00 : f32
    %54 = vector.broadcast %cst_74 : f32 to vector<16x1x4xf32>
    %c1_75 = arith.constant 1 : index
    %c17_76 = arith.constant 17 : index
    %c0_77 = arith.constant 0 : index
    %55 = vector.load %arg8[%c1_75, %c17_76, %c0_77] : memref<18x18x4xf32, #tpu.memory_space<vmem>>, vector<16x1x4xf32>
    tpu.vector_store %arg8[%c1_75, %c17_76, %c0_77], %54 {strides = array<i32>} : memref<18x18x4xf32, #tpu.memory_space<vmem>>, vector<16x1x4xf32>,
    %56 = vector.shape_cast %47 : vector<256x4xf32> to vector<16x16x4xf32>
    %c1_78 = arith.constant 1 : index
    %c1_79 = arith.constant 1 : index
    %c0_80 = arith.constant 0 : index
    %57 = vector.load %arg8[%c1_78, %c1_79, %c0_80] : memref<18x18x4xf32, #tpu.memory_space<vmem>>, vector<16x16x4xf32>
    tpu.vector_store %arg8[%c1_78, %c1_79, %c0_80], %56 {strides = array<i32>} : memref<18x18x4xf32, #tpu.memory_space<vmem>>, vector<16x16x4xf32>,
    %c0_81 = arith.constant 0 : index
    %c0_82 = arith.constant 0 : index
    %c0_83 = arith.constant 0 : index
    %58 = vector.load %arg8[%c0_81, %c0_82, %c0_83] : memref<18x18x4xf32, #tpu.memory_space<vmem>>, vector<16x16x4xf32>
    %59 = vector.shape_cast %58 : vector<16x16x4xf32> to vector<256x4xf32>
    %c0_84 = arith.constant 0 : index
    %c0_85 = arith.constant 0 : index
    %60 = vector.load %arg10[%c0_84, %c0_85] : memref<256x36xf32, #tpu.memory_space<vmem>>, vector<256x4xf32>
    tpu.vector_store %arg10[%c0_84, %c0_85], %59 {strides = array<i32>} : memref<256x36xf32, #tpu.memory_space<vmem>>, vector<256x4xf32>,
    %c0_86 = arith.constant 0 : index
    %c1_87 = arith.constant 1 : index
    %c0_88 = arith.constant 0 : index
    %61 = vector.load %arg8[%c0_86, %c1_87, %c0_88] : memref<18x18x4xf32, #tpu.memory_space<vmem>>, vector<16x16x4xf32>
    %62 = vector.shape_cast %61 : vector<16x16x4xf32> to vector<256x4xf32>
    %c0_89 = arith.constant 0 : index
    %c4_90 = arith.constant 4 : index
    %63 = vector.load %arg10[%c0_89, %c4_90] : memref<256x36xf32, #tpu.memory_space<vmem>>, vector<256x4xf32>
    tpu.vector_store %arg10[%c0_89, %c4_90], %62 {strides = array<i32>} : memref<256x36xf32, #tpu.memory_space<vmem>>, vector<256x4xf32>,
    %c0_91 = arith.constant 0 : index
    %c2_92 = arith.constant 2 : index
    %c0_93 = arith.constant 0 : index
    %64 = vector.load %arg8[%c0_91, %c2_92, %c0_93] : memref<18x18x4xf32, #tpu.memory_space<vmem>>, vector<16x16x4xf32>
    %65 = vector.shape_cast %64 : vector<16x16x4xf32> to vector<256x4xf32>
    %c0_94 = arith.constant 0 : index
    %c8_95 = arith.constant 8 : index
    %66 = vector.load %arg10[%c0_94, %c8_95] : memref<256x36xf32, #tpu.memory_space<vmem>>, vector<256x4xf32>
    tpu.vector_store %arg10[%c0_94, %c8_95], %65 {strides = array<i32>} : memref<256x36xf32, #tpu.memory_space<vmem>>, vector<256x4xf32>,
    %c1_96 = arith.constant 1 : index
    %c0_97 = arith.constant 0 : index
    %c0_98 = arith.constant 0 : index
    %67 = vector.load %arg8[%c1_96, %c0_97, %c0_98] : memref<18x18x4xf32, #tpu.memory_space<vmem>>, vector<16x16x4xf32>
    %68 = vector.shape_cast %67 : vector<16x16x4xf32> to vector<256x4xf32>
    %c0_99 = arith.constant 0 : index
    %c12_100 = arith.constant 12 : index
    %69 = vector.load %arg10[%c0_99, %c12_100] : memref<256x36xf32, #tpu.memory_space<vmem>>, vector<256x4xf32>
    tpu.vector_store %arg10[%c0_99, %c12_100], %68 {strides = array<i32>} : memref<256x36xf32, #tpu.memory_space<vmem>>, vector<256x4xf32>,
    %c1_101 = arith.constant 1 : index
    %c1_102 = arith.constant 1 : index
    %c0_103 = arith.constant 0 : index
    %70 = vector.load %arg8[%c1_101, %c1_102, %c0_103] : memref<18x18x4xf32, #tpu.memory_space<vmem>>, vector<16x16x4xf32>
    %71 = vector.shape_cast %70 : vector<16x16x4xf32> to vector<256x4xf32>
    %c0_104 = arith.constant 0 : index
    %c16_105 = arith.constant 16 : index
    %72 = vector.load %arg10[%c0_104, %c16_105] : memref<256x36xf32, #tpu.memory_space<vmem>>, vector<256x4xf32>
    tpu.vector_store %arg10[%c0_104, %c16_105], %71 {strides = array<i32>} : memref<256x36xf32, #tpu.memory_space<vmem>>, vector<256x4xf32>,
    %c1_106 = arith.constant 1 : index
    %c2_107 = arith.constant 2 : index
    %c0_108 = arith.constant 0 : index
    %73 = vector.load %arg8[%c1_106, %c2_107, %c0_108] : memref<18x18x4xf32, #tpu.memory_space<vmem>>, vector<16x16x4xf32>
    %74 = vector.shape_cast %73 : vector<16x16x4xf32> to vector<256x4xf32>
    %c0_109 = arith.constant 0 : index
    %c20_110 = arith.constant 20 : index
    %75 = vector.load %arg10[%c0_109, %c20_110] : memref<256x36xf32, #tpu.memory_space<vmem>>, vector<256x4xf32>
    tpu.vector_store %arg10[%c0_109, %c20_110], %74 {strides = array<i32>} : memref<256x36xf32, #tpu.memory_space<vmem>>, vector<256x4xf32>,
    %c2_111 = arith.constant 2 : index
    %c0_112 = arith.constant 0 : index
    %c0_113 = arith.constant 0 : index
    %76 = vector.load %arg8[%c2_111, %c0_112, %c0_113] : memref<18x18x4xf32, #tpu.memory_space<vmem>>, vector<16x16x4xf32>
    %77 = vector.shape_cast %76 : vector<16x16x4xf32> to vector<256x4xf32>
    %c0_114 = arith.constant 0 : index
    %c24_115 = arith.constant 24 : index
    %78 = vector.load %arg10[%c0_114, %c24_115] : memref<256x36xf32, #tpu.memory_space<vmem>>, vector<256x4xf32>
    tpu.vector_store %arg10[%c0_114, %c24_115], %77 {strides = array<i32>} : memref<256x36xf32, #tpu.memory_space<vmem>>, vector<256x4xf32>,
    %c2_116 = arith.constant 2 : index
    %c1_117 = arith.constant 1 : index
    %c0_118 = arith.constant 0 : index
    %79 = vector.load %arg8[%c2_116, %c1_117, %c0_118] : memref<18x18x4xf32, #tpu.memory_space<vmem>>, vector<16x16x4xf32>
    %80 = vector.shape_cast %79 : vector<16x16x4xf32> to vector<256x4xf32>
    %c0_119 = arith.constant 0 : index
    %c28_120 = arith.constant 28 : index
    %81 = vector.load %arg10[%c0_119, %c28_120] : memref<256x36xf32, #tpu.memory_space<vmem>>, vector<256x4xf32>
    tpu.vector_store %arg10[%c0_119, %c28_120], %80 {strides = array<i32>} : memref<256x36xf32, #tpu.memory_space<vmem>>, vector<256x4xf32>,
    %c2_121 = arith.constant 2 : index
    %c2_122 = arith.constant 2 : index
    %c0_123 = arith.constant 0 : index
    %82 = vector.load %arg8[%c2_121, %c2_122, %c0_123] : memref<18x18x4xf32, #tpu.memory_space<vmem>>, vector<16x16x4xf32>
    %83 = vector.shape_cast %82 : vector<16x16x4xf32> to vector<256x4xf32>
    %c0_124 = arith.constant 0 : index
    %c32_125 = arith.constant 32 : index
    %84 = vector.load %arg10[%c0_124, %c32_125] : memref<256x36xf32, #tpu.memory_space<vmem>>, vector<256x4xf32>
    tpu.vector_store %arg10[%c0_124, %c32_125], %83 {strides = array<i32>} : memref<256x36xf32, #tpu.memory_space<vmem>>, vector<256x4xf32>,
    %c0_126 = arith.constant 0 : index
    %c0_127 = arith.constant 0 : index
    %85 = vector.load %arg10[%c0_126, %c0_127] : memref<256x36xf32, #tpu.memory_space<vmem>>, vector<256x36xf32>
    %c0_128 = arith.constant 0 : index
    %c0_129 = arith.constant 0 : index
    %86 = vector.load %arg4[%c0_128, %c0_129] : memref<36x4xf32, #tpu.memory_space<vmem>>, vector<36x4xf32>
    %cst_130 = arith.constant dense<0.000000e+00> : vector<256x4xf32>
    %87 = tpu.matmul %85, %86, %cst_130 {dimension_numbers = #tpu.dot_dimension_numbers<[1], [0], [0], [1], [0, 0, 1, 1], [], []>} : vector<256x36xf32>, vector<36x4xf32>, vector<256x4xf32> -> vector<256x4xf32>
    %c0_131 = arith.constant 0 : index
    %c0_132 = arith.constant 0 : index
    %88 = vector.load %arg5[%c0_131, %c0_132] : memref<1x4xf32, #tpu.memory_space<vmem>>, vector<1x4xf32>
    %89 = vector.broadcast %88 : vector<1x4xf32> to vector<256x4xf32>
    %90 = arith.addf %87, %89 : vector<256x4xf32>
    %91 = arith.addf %90, %2 : vector<256x4xf32>
    %cst_133 = arith.constant 0.000000e+00 : f32
    %92 = vector.broadcast %cst_133 : f32 to vector<256x4xf32>
    %93 = arith.maximumf %91, %92 : vector<256x4xf32>
    %94 = tpu.transpose %93, [1, 0] : vector<256x4xf32> -> vector<4x256xf32>
    %c0_134 = arith.constant 0 : index
    %c0_135 = arith.constant 0 : index
    %c0_136 = arith.constant 0 : index
    %95 = vector.load %arg6[%c0_134, %c0_135, %c0_136] : memref<1x4x256xf32, #tpu.memory_space<vmem>>, vector<1x4x256xf32>
    %96 = vector.shape_cast %95 : vector<1x4x256xf32> to vector<4x256xf32>
    %97 = vector.shape_cast %94 : vector<4x256xf32> to vector<1x4x256xf32>
    tpu.vector_store %arg6[%c0_134, %c0_135, %c0_136], %97 {strides = array<i32>} : memref<1x4x256xf32, #tpu.memory_space<vmem>>, vector<1x4x256xf32>,
    return
  }
  func.func @transform_0(%arg0: i32) -> (i32, i32, i32) {
    %c0_i32 = arith.constant 0 : i32
    %c0_i32_0 = arith.constant 0 : i32
    %c0_i32_1 = arith.constant 0 : i32
    return %arg0, %c0_i32, %c0_i32_0 : i32, i32, i32
  }
  func.func @transform_1(%arg0: i32) -> (i32, i32) {
    %c0_i32 = arith.constant 0 : i32
    %c0_i32_0 = arith.constant 0 : i32
    %c0_i32_1 = arith.constant 0 : i32
    return %c0_i32, %c0_i32_0 : i32, i32
  }
  func.func @transform_2(%arg0: i32) -> (i32, i32) {
    %c0_i32 = arith.constant 0 : i32
    %c0_i32_0 = arith.constant 0 : i32
    %c0_i32_1 = arith.constant 0 : i32
    return %c0_i32, %c0_i32_0 : i32, i32
  }
  func.func @transform_3(%arg0: i32) -> (i32, i32) {
    %c0_i32 = arith.constant 0 : i32
    %c0_i32_0 = arith.constant 0 : i32
    %c0_i32_1 = arith.constant 0 : i32
    return %c0_i32, %c0_i32_0 : i32, i32
  }
  func.func @transform_4(%arg0: i32) -> (i32, i32) {
    %c0_i32 = arith.constant 0 : i32
    %c0_i32_0 = arith.constant 0 : i32
    %c0_i32_1 = arith.constant 0 : i32
    return %c0_i32, %c0_i32_0 : i32, i32
  }
  func.func @transform_5(%arg0: i32) -> (i32, i32, i32) {
    %c0_i32 = arith.constant 0 : i32
    %c0_i32_0 = arith.constant 0 : i32
    %c0_i32_1 = arith.constant 0 : i32
    return %arg0, %c0_i32, %c0_i32_0 : i32, i32, i32
  }
}

</mosaic_0001>

<bundles_post_ra>
// kernel: basic_block_forward.1
= control target key start
LH: loop header
LB: loop body
LE: loop exit
PB: predicated region body
PF: predicated region fallthrough
CT: control target
= control target key end

     0   :  { %s4960_s18 = smov 0   ;;  %s7265_s0 = inlined_call_operand.vmem [shape: f32[2,4,256], index: 0, kind: input, shape index: {}]   ;;  %s7266_s1 = inlined_call_operand.vmem [shape: f32[36,4], index: 1, kind: input, shape index: {}]   ;;  %s7267_s2 = inlined_call_operand.vmem [shape: f32[1,4], index: 2, kind: input, shape index: {}]   ;;  %s7268_s3 = inlined_call_operand.vmem [shape: f32[36,4], index: 3, kind: input, shape index: {}]   ;;  %s7269_s4 = inlined_call_operand.vmem [shape: f32[1,4], index: 4, kind: input, shape index: {}]   ;;  %s7270_s5 = inlined_call_operand.vmem [shape: f32[2,4,256], index: 5, kind: output, shape index: {}]  }
   0x1 LB: > { %s4608_s19 = sadd.s32 4294967295, %s4919_s18   ;;  %p4612_p0 = scmp.ge.s32.totalorder %s4919_s18, 1  ;;  %s4919_s18 = sphi %s4960_s18, %s15_s18  }
   0x2   : > { %p187_p1 = scmp.lt.s32.totalorder %s4919_s18, 3 }
   0x4   : > { %p188_p2 = pnand %p4612_p0, %p187_p1 }
   0x6   : > { %191 = sbr.rel (%p188_p2) target bundleno = 1949 (0x79d), region = 40 }
   0xd   : > { %p215_p3 = scmp.lt.s32.totalorder %s4608_s19, 1  ;;  %vm293_vm0 = vcmask 31744   ;;  %v4921_v0 = vmov 0.0   ;;  %vm296_vm1 = vcmask 25600   ;;  %vm303_vm2 = vcmask 24576   ;;  %s4922_s24 = smov 4  }
   0xe   : > { %294 = vst.msk [vmem:[#allocation2] sm:$0xff] %vm293_vm0, %v4921_v0  ;;  %295 = vst.msk [vmem:[#allocation2 + $0x8] sm:$0xff] %vm293_vm0, %v4921_v0  ;;  %vm592_vm3 = vcmask 64544   ;;  %s4923_s25 = smov 8   ;;  %s4924_s26 = smov 12   ;;  %vm785_vm4 = vcmask 97344  }
   0xf   : > { %299 = vst.msk [vmem:[#allocation2 + $0x198] sm:$0xff] %vm293_vm0, %v4921_v0  ;;  %300 = vst.msk [vmem:[#allocation2 + $0x1a0] sm:$0xff] %vm293_vm0, %v4921_v0  ;;  %s7425_s19 = smov (!%p215_p3, %s4608_s19), 1  ;;  %s4925_s27 = smov 16   ;;  %vm978_vm5 = vcmask 130144   ;;  %vm1171_vm6 = vcmask 162944  }
  0x10   : > { %2379 = vst.msk [vmem:[#allocation3] sm:$0xff] %vm293_vm0, %v4921_v0  ;;  %2380 = vst.msk [vmem:[#allocation3 + $0x8] sm:$0xff] %vm293_vm0, %v4921_v0  ;;  %s4687_s20 = sshll.u32 %s7425_s19, 3  ;;  %s4926_s28 = smov 20   ;;  %vm1364_vm7 = vcmask 195744   ;;  %vm1558_vm8 = vcmask 228544  }
  0x11   : > { %2383 = vst.msk [vmem:[#allocation3 + $0x198] sm:$0xff] %vm293_vm0, %v4921_v0  ;;  %2384 = vst.msk [vmem:[#allocation3 + $0x1a0] sm:$0xff] %vm293_vm0, %v4921_v0  ;;  %s219_s23 = scalar_lea.vmem %s7265_s0, %s4687_s20  ;;  %s4927_s29 = smov 24   ;;  %vm2118_vm9 = vcmask 1043456   ;;  %vm1751_vm10 = vcmask 261344   ;;  %vm1944_vm11 = vcmask 294144  }
  0x12   : > { %297 = vst.msk [vmem:[#allocation2 + $0x10] sm:$0x3] %vm296_vm1, %v4921_v0  ;;  %301 = vst.msk [vmem:[#allocation2 + $0x1a8] sm:$0x3] %vm296_vm1, %v4921_v0  ;;  %v4996_v1 = vld [vmem:[%s219_s23] sm:$0xff]  ;;  %s4928_s30 = smov 28  }
  0x13   : > { %2381 = vst.msk [vmem:[#allocation3 + $0x10] sm:$0x3] %vm296_vm1, %v4921_v0  ;;  %2385 = vst.msk [vmem:[#allocation3 + $0x1a8] sm:$0x3] %vm296_vm1, %v4921_v0  ;;  %229 = vxpose.xlu0.b32.start.end [1/1] (short) %v4996_v1, 128  ;;  %v227_v4 = vcombine.high %v4996_v1, %v4996_v1  ;;  %s4929_s6 = smov 32   ;;  %vm2021_vm12 = vcmask 293888  }
  0x14   : > { %324 = vst.msk [vmem:[#allocation2 + $0x89] sm:$0x1] %vm303_vm2, %v4921_v0  ;;  %304 = vst.msk [vmem:[#allocation2 + $0x18] sm:$0x1] %vm303_vm2, %v4921_v0 }
  0x15   : > { %v4999_v2 = vld [vmem:[#allocation2 + $0x1] sm:$0xff]  ;;  %305 = vst.msk [vmem:[#allocation2 + $0x30] sm:$0x1] %vm303_vm2, %v4921_v0  ;;  %306 = vst.msk [vmem:[#allocation2 + $0x48] sm:$0x1] %vm303_vm2, %v4921_v0 }
  0x16   : > { %307 = vst.msk [vmem:[#allocation2 + $0x60] sm:$0x1] %vm303_vm2, %v4921_v0  ;;  %308 = vst.msk [vmem:[#allocation2 + $0x78] sm:$0x1] %vm303_vm2, %v4921_v0  ;;  %496 = vrot.lane.b32.xlu1 %v4999_v2, %s4922_s24  ;;  %v368_v5 = vld [vmem:[#allocation2] sm:$0xff]  ;;  %v369_v7 = vld [vmem:[#allocation2 + $0x8] sm:$0xff] }
  0x17   : > { %309 = vst.msk [vmem:[#allocation2 + $0x90] sm:$0x1] %vm303_vm2, %v4921_v0  ;;  %310 = vst.msk [vmem:[#allocation2 + $0xa8] sm:$0x1] %vm303_vm2, %v4921_v0 }
  0x18   : > { %311 = vst.msk [vmem:[#allocation2 + $0xc0] sm:$0x1] %vm303_vm2, %v4921_v0  ;;  %312 = vst.msk [vmem:[#allocation2 + $0xd8] sm:$0x1] %vm303_vm2, %v4921_v0 }
  0x19   : > { %313 = vst.msk [vmem:[#allocation2 + $0xf0] sm:$0x1] %vm303_vm2, %v4921_v0  ;;  %314 = vst.msk [vmem:[#allocation2 + $0x108] sm:$0x1] %vm303_vm2, %v4921_v0  ;;  %v433_v3 = vld [vmem:[#allocation2 + $0x9] sm:$0xff] }
  0x1a   : > { %315 = vst.msk [vmem:[#allocation2 + $0x120] sm:$0x1] %vm303_vm2, %v4921_v0  ;;  %316 = vst.msk [vmem:[#allocation2 + $0x138] sm:$0x1] %vm303_vm2, %v4921_v0  ;;  %498 = vrot.lane.b32.xlu1 %v433_v3, %s4922_s24 }
  0x1b   : > { %317 = vst.msk [vmem:[#allocation2 + $0x150] sm:$0x1] %vm303_vm2, %v4921_v0  ;;  %318 = vst.msk [vmem:[#allocation2 + $0x168] sm:$0x1] %vm303_vm2, %v4921_v0 }
  0x1c   : > { %319 = vst.msk [vmem:[#allocation2 + $0x180] sm:$0x1] %vm303_vm2, %v4921_v0  ;;  %320 = vst.msk [vmem:[#allocation2 + $0x29] sm:$0x1] %vm303_vm2, %v4921_v0 }
  0x1d   : > { %321 = vst.msk [vmem:[#allocation2 + $0x41] sm:$0x1] %vm303_vm2, %v4921_v0  ;;  %322 = vst.msk [vmem:[#allocation2 + $0x59] sm:$0x1] %vm303_vm2, %v4921_v0 }
  0x1e   : > { %323 = vst.msk [vmem:[#allocation2 + $0x71] sm:$0x1] %vm303_vm2, %v4921_v0  ;;  %325 = vst.msk [vmem:[#allocation2 + $0xa1] sm:$0x1] %vm303_vm2, %v4921_v0 }
  0x1f   : > { %326 = vst.msk [vmem:[#allocation2 + $0xb9] sm:$0x1] %vm303_vm2, %v4921_v0  ;;  %327 = vst.msk [vmem:[#allocation2 + $0xd1] sm:$0x1] %vm303_vm2, %v4921_v0 }
  0x20   : > { %328 = vst.msk [vmem:[#allocation2 + $0xe9] sm:$0x1] %vm303_vm2, %v4921_v0  ;;  %329 = vst.msk [vmem:[#allocation2 + $0x101] sm:$0x1] %vm303_vm2, %v4921_v0 }
  0x21   : > { %330 = vst.msk [vmem:[#allocation2 + $0x119] sm:$0x1] %vm303_vm2, %v4921_v0  ;;  %331 = vst.msk [vmem:[#allocation2 + $0x131] sm:$0x1] %vm303_vm2, %v4921_v0 }
  0x22   : > { %332 = vst.msk [vmem:[#allocation2 + $0x149] sm:$0x1] %vm303_vm2, %v4921_v0  ;;  %333 = vst.msk [vmem:[#allocation2 + $0x161] sm:$0x1] %vm303_vm2, %v4921_v0 }
  0x23   : > { %334 = vst.msk [vmem:[#allocation2 + $0x179] sm:$0x1] %vm303_vm2, %v4921_v0  ;;  %335 = vst.msk [vmem:[#allocation2 + $0x191] sm:$0x1] %vm303_vm2, %v4921_v0 }
  0x24   : > { %2387 = vst.msk [vmem:[#allocation3 + $0x18] sm:$0x1] %vm303_vm2, %v4921_v0  ;;  %2388 = vst.msk [vmem:[#allocation3 + $0x30] sm:$0x1] %vm303_vm2, %v4921_v0 }
  0x25   : > { %2389 = vst.msk [vmem:[#allocation3 + $0x48] sm:$0x1] %vm303_vm2, %v4921_v0  ;;  %2390 = vst.msk [vmem:[#allocation3 + $0x60] sm:$0x1] %vm303_vm2, %v4921_v0 }
  0x26   : > { %2391 = vst.msk [vmem:[#allocation3 + $0x78] sm:$0x1] %vm303_vm2, %v4921_v0  ;;  %2392 = vst.msk [vmem:[#allocation3 + $0x90] sm:$0x1] %vm303_vm2, %v4921_v0 }
  0x27   : > { %2393 = vst.msk [vmem:[#allocation3 + $0xa8] sm:$0x1] %vm303_vm2, %v4921_v0  ;;  %2394 = vst.msk [vmem:[#allocation3 + $0xc0] sm:$0x1] %vm303_vm2, %v4921_v0 }
  0x28   : > { %2395 = vst.msk [vmem:[#allocation3 + $0xd8] sm:$0x1] %vm303_vm2, %v4921_v0  ;;  %2396 = vst.msk [vmem:[#allocation3 + $0xf0] sm:$0x1] %vm303_vm2, %v4921_v0 }
  0x29   : > { %2397 = vst.msk [vmem:[#allocation3 + $0x108] sm:$0x1] %vm303_vm2, %v4921_v0  ;;  %2398 = vst.msk [vmem:[#allocation3 + $0x120] sm:$0x1] %vm303_vm2, %v4921_v0 }
  0x2a   : > { %2399 = vst.msk [vmem:[#allocation3 + $0x138] sm:$0x1] %vm303_vm2, %v4921_v0  ;;  %2400 = vst.msk [vmem:[#allocation3 + $0x150] sm:$0x1] %vm303_vm2, %v4921_v0 }
  0x2b   : > { %2401 = vst.msk [vmem:[#allocation3 + $0x168] sm:$0x1] %vm303_vm2, %v4921_v0  ;;  %2402 = vst.msk [vmem:[#allocation3 + $0x180] sm:$0x1] %vm303_vm2, %v4921_v0 }
  0x2c   : > { %2403 = vst.msk [vmem:[#allocation3 + $0x29] sm:$0x1] %vm303_vm2, %v4921_v0  ;;  %2404 = vst.msk [vmem:[#allocation3 + $0x41] sm:$0x1] %vm303_vm2, %v4921_v0 }
  0x2d   : > { %2405 = vst.msk [vmem:[#allocation3 + $0x59] sm:$0x1] %vm303_vm2, %v4921_v0  ;;  %2406 = vst.msk [vmem:[#allocation3 + $0x71] sm:$0x1] %vm303_vm2, %v4921_v0 }
  0x2e   : > { %2407 = vst.msk [vmem:[#allocation3 + $0x89] sm:$0x1] %vm303_vm2, %v4921_v0  ;;  %2408 = vst.msk [vmem:[#allocation3 + $0xa1] sm:$0x1] %vm303_vm2, %v4921_v0 }
  0x2f   : > { %2409 = vst.msk [vmem:[#allocation3 + $0xb9] sm:$0x1] %vm303_vm2, %v4921_v0  ;;  %2410 = vst.msk [vmem:[#allocation3 + $0xd1] sm:$0x1] %vm303_vm2, %v4921_v0 }
  0x30   : > { %2411 = vst.msk [vmem:[#allocation3 + $0xe9] sm:$0x1] %vm303_vm2, %v4921_v0  ;;  %2412 = vst.msk [vmem:[#allocation3 + $0x101] sm:$0x1] %vm303_vm2, %v4921_v0 }
  0x31   : > { %2413 = vst.msk [vmem:[#allocation3 + $0x119] sm:$0x1] %vm303_vm2, %v4921_v0  ;;  %2414 = vst.msk [vmem:[#allocation3 + $0x131] sm:$0x1] %vm303_vm2, %v4921_v0 }
  0x32   : > { %2415 = vst.msk [vmem:[#allocation3 + $0x149] sm:$0x1] %vm303_vm2, %v4921_v0  ;;  %2416 = vst.msk [vmem:[#allocation3 + $0x161] sm:$0x1] %vm303_vm2, %v4921_v0 }
  0x33   : > { %2417 = vst.msk [vmem:[#allocation3 + $0x179] sm:$0x1] %vm303_vm2, %v4921_v0  ;;  %2418 = vst.msk [vmem:[#allocation3 + $0x191] sm:$0x1] %vm303_vm2, %v4921_v0 }
  0x34   : > { %400 = vst.msk [vmem:[#allocation4] sm:$0xff] %vm293_vm0, %v368_v5  ;;  %401 = vst.msk [vmem:[#allocation4 + $0x8] sm:$0xff] %vm293_vm0, %v369_v7 }
  0x50   : > { %261 = vxpose.xlu0.b32.start.end [1/1] (short) %v227_v4, 128 }
  0x88   : > { %v497_v6 = vpop.permute.xlu1 %496 }
  0x89   : > { %593 = vst.msk [vmem:[#allocation4] sm:$0xff] %vm592_vm3, %v497_v6 }
  0x8c   : > { %v499_v8 = vpop.permute.xlu1 %498 }
  0x8d   : > { %594 = vst.msk [vmem:[#allocation4 + $0x8] sm:$0xff] %vm592_vm3, %v499_v8 }
  0x93   : > { %v5138_v9 = vpop.trf.xlu0 }
  0x94   : > { %7322 = vst [vmem:[#allocation6_spill] sm:$0xff] %v5138_v9  ;;  %336 = vst.msk [vmem:[#allocation2 + $0x19] sm:$0xff] %vm293_vm0, %v5138_v9 }
  0x97   : > { %v5142_v10 = vpop.trf.xlu0 }
  0x98   : > { %7323 = vst [vmem:[#allocation7_spill] sm:$0xff] %v5142_v10  ;;  %337 = vst.msk [vmem:[#allocation2 + $0x21] sm:$0xff] %vm293_vm0, %v5142_v10 }
  0x9b   : > { %v5146_v11 = vpop.trf.xlu0  ;;  %v434_v12 = vld [vmem:[#allocation2 + $0x19] sm:$0xff] }
  0x9c   : > { %7324 = vst [vmem:[#allocation8_spill] sm:$0xff] %v5146_v11  ;;  %v5148_v13 = vld [vmem:[#allocation2 + $0x18] sm:$0xff]  ;;  %338 = vst.msk [vmem:[#allocation2 + $0x31] sm:$0xff] %vm293_vm0, %v5146_v11  ;;  %500 = vrot.lane.b32.xlu1 %v434_v12, %s4922_s24 }
  0x9d   : > { %402 = vst.msk [vmem:[#allocation4 + $0x10] sm:$0xff] %vm293_vm0, %v5148_v13 }
  0x9f   : > { %v5155_v14 = vpop.trf.xlu0  ;;  %v5157_v15 = vld [vmem:[#allocation2 + $0x21] sm:$0xff] }
  0xa0   : > { %7325 = vst [vmem:[#allocation9_spill] sm:$0xff] %v5155_v14  ;;  %v5159_v16 = vld [vmem:[#allocation2 + $0x20] sm:$0xff]  ;;  %339 = vst.msk [vmem:[#allocation2 + $0x39] sm:$0xff] %vm293_vm0, %v5155_v14  ;;  %502 = vrot.lane.b32.xlu1 %v5157_v15, %s4922_s24 }
  0xa1   : > { %403 = vst.msk [vmem:[#allocation4 + $0x18] sm:$0xff] %vm293_vm0, %v5159_v16 }
  0xa3   : > { %v5167_v17 = vpop.trf.xlu0  ;;  %v436_v18 = vld [vmem:[#allocation2 + $0x31] sm:$0xff] }
  0xa4   : > { %7326 = vst [vmem:[#allocation10_spill] sm:$0xff] %v5167_v17  ;;  %v5169_v19 = vld [vmem:[#allocation2 + $0x30] sm:$0xff]  ;;  %340 = vst.msk [vmem:[#allocation2 + $0x49] sm:$0xff] %vm293_vm0, %v5167_v17  ;;  %504 = vrot.lane.b32.xlu1 %v436_v18, %s4922_s24 }
  0xa5   : > { %404 = vst.msk [vmem:[#allocation4 + $0x20] sm:$0xff] %vm293_vm0, %v5169_v19 }
  0xa7   : > { %v5176_v20 = vpop.trf.xlu0  ;;  %v5178_v21 = vld [vmem:[#allocation2 + $0x39] sm:$0xff] }
  0xa8   : > { %7327 = vst [vmem:[#allocation11_spill] sm:$0xff] %v5176_v20  ;;  %v5180_v22 = vld [vmem:[#allocation2 + $0x38] sm:$0xff]  ;;  %341 = vst.msk [vmem:[#allocation2 + $0x51] sm:$0xff] %vm293_vm0, %v5176_v20  ;;  %506 = vrot.lane.b32.xlu1 %v5178_v21, %s4922_s24 }
  0xa9   : > { %405 = vst.msk [vmem:[#allocation4 + $0x28] sm:$0xff] %vm293_vm0, %v5180_v22 }
  0xab   : > { %v5188_v23 = vpop.trf.xlu0  ;;  %v438_v24 = vld [vmem:[#allocation2 + $0x49] sm:$0xff] }
  0xac   : > { %7328 = vst [vmem:[#allocation12_spill] sm:$0xff] %v5188_v23  ;;  %v5190_v25 = vld [vmem:[#allocation2 + $0x48] sm:$0xff]  ;;  %342 = vst.msk [vmem:[#allocation2 + $0x61] sm:$0xff] %vm293_vm0, %v5188_v23  ;;  %508 = vrot.lane.b32.xlu1 %v438_v24, %s4922_s24 }
  0xad   : > { %406 = vst.msk [vmem:[#allocation4 + $0x30] sm:$0xff] %vm293_vm0, %v5190_v25 }
  0xaf   : > { %v5197_v26 = vpop.trf.xlu0  ;;  %v5199_v27 = vld [vmem:[#allocation2 + $0x51] sm:$0xff] }
  0xb0   : > { %7329 = vst [vmem:[#allocation13_spill] sm:$0xff] %v5197_v26  ;;  %v5201_v28 = vld [vmem:[#allocation2 + $0x50] sm:$0xff]  ;;  %343 = vst.msk [vmem:[#allocation2 + $0x69] sm:$0xff] %vm293_vm0, %v5197_v26  ;;  %510 = vrot.lane.b32.xlu1 %v5199_v27, %s4922_s24 }
  0xb1   : > { %407 = vst.msk [vmem:[#allocation4 + $0x38] sm:$0xff] %vm293_vm0, %v5201_v28 }
  0xb3   : > { %v5209_v29 = vpop.trf.xlu0  ;;  %v440_v30 = vld [vmem:[#allocation2 + $0x61] sm:$0xff] }
  0xb4   : > { %7330 = vst [vmem:[#allocation14_spill] sm:$0xff] %v5209_v29  ;;  %v5211_v31 = vld [vmem:[#allocation2 + $0x60] sm:$0xff]  ;;  %344 = vst.msk [vmem:[#allocation2 + $0x79] sm:$0xff] %vm293_vm0, %v5209_v29  ;;  %512 = vrot.lane.b32.xlu1 %v440_v30, %s4922_s24 }
  0xb5   : > { %408 = vst.msk [vmem:[#allocation4 + $0x40] sm:$0xff] %vm293_vm0, %v5211_v31 }
  0xb7   : > { %v5218_v32 = vpop.trf.xlu0  ;;  %v5220_v33 = vld [vmem:[#allocation2 + $0x69] sm:$0xff] }
  0xb8   : > { %7331 = vst [vmem:[#allocation15_spill] sm:$0xff] %v5218_v32  ;;  %v5222_v34 = vld [vmem:[#allocation2 + $0x68] sm:$0xff]  ;;  %345 = vst.msk [vmem:[#allocation2 + $0x81] sm:$0xff] %vm293_vm0, %v5218_v32  ;;  %514 = vrot.lane.b32.xlu1 %v5220_v33, %s4922_s24 }
  0xb9   : > { %409 = vst.msk [vmem:[#allocation4 + $0x48] sm:$0xff] %vm293_vm0, %v5222_v34 }
  0xbb   : > { %v5230_v35 = vpop.trf.xlu0  ;;  %v442_v36 = vld [vmem:[#allocation2 + $0x79] sm:$0xff] }
  0xbc   : > { %7332 = vst [vmem:[#allocation16_spill] sm:$0xff] %v5230_v35  ;;  %v5232_v37 = vld [vmem:[#allocation2 + $0x78] sm:$0xff]  ;;  %346 = vst.msk [vmem:[#allocation2 + $0x91] sm:$0xff] %vm293_vm0, %v5230_v35  ;;  %516 = vrot.lane.b32.xlu1 %v442_v36, %s4922_s24 }
  0xbd   : > { %410 = vst.msk [vmem:[#allocation4 + $0x50] sm:$0xff] %vm293_vm0, %v5232_v37 }
  0xbf   : > { %v5239_v38 = vpop.trf.xlu0  ;;  %v5241_v39 = vld [vmem:[#allocation2 + $0x81] sm:$0xff] }
  0xc0   : > { %7333 = vst [vmem:[#allocation17_spill] sm:$0xff] %v5239_v38  ;;  %v5243_v40 = vld [vmem:[#allocation2 + $0x80] sm:$0xff]  ;;  %347 = vst.msk [vmem:[#allocation2 + $0x99] sm:$0xff] %vm293_vm0, %v5239_v38  ;;  %518 = vrot.lane.b32.xlu1 %v5241_v39, %s4922_s24 }
  0xc1   : > { %411 = vst.msk [vmem:[#allocation4 + $0x58] sm:$0xff] %vm293_vm0, %v5243_v40  ;;  %v5316_v60 = vld [vmem:[#allocation2 + $0x82] sm:$0xff] }
  0xc3   : > { %v5251_v41 = vpop.trf.xlu0  ;;  %v444_v42 = vld [vmem:[#allocation2 + $0x91] sm:$0xff] }
  0xc4   : > { %7334 = vst [vmem:[#allocation18_spill] sm:$0xff] %v5251_v41  ;;  %v5253_v43 = vld [vmem:[#allocation2 + $0x90] sm:$0xff]  ;;  %348 = vst.msk [vmem:[#allocation2 + $0xa9] sm:$0xff] %vm293_vm0, %v5251_v41  ;;  %520 = vrot.lane.b32.xlu1 %v444_v42, %s4922_s24 }
  0xc5   : > { %412 = vst.msk [vmem:[#allocation4 + $0x60] sm:$0xff] %vm293_vm0, %v5253_v43 }
  0xc7   : > { %v5260_v44 = vpop.trf.xlu0  ;;  %v5262_v45 = vld [vmem:[#allocation2 + $0x99] sm:$0xff] }
  0xc8   : > { %7335 = vst [vmem:[#allocation19_spill] sm:$0xff] %v5260_v44  ;;  %v5264_v46 = vld [vmem:[#allocation2 + $0x98] sm:$0xff]  ;;  %349 = vst.msk [vmem:[#allocation2 + $0xb1] sm:$0xff] %vm293_vm0, %v5260_v44  ;;  %522 = vrot.lane.b32.xlu1 %v5262_v45, %s4922_s24 }
  0xc9   : > { %413 = vst.msk [vmem:[#allocation4 + $0x68] sm:$0xff] %vm293_vm0, %v5264_v46  ;;  %v5332_v0 = vld [vmem:[#allocation2 + $0x9a] sm:$0xff] }
  0xcb   : > { %v5272_v47 = vpop.trf.xlu0  ;;  %v446_v48 = vld [vmem:[#allocation2 + $0xa9] sm:$0xff] }
  0xcc   : > { %7336 = vst [vmem:[#allocation20_spill] sm:$0xff] %v5272_v47  ;;  %v5274_v49 = vld [vmem:[#allocation2 + $0xa8] sm:$0xff]  ;;  %350 = vst.msk [vmem:[#allocation2 + $0xc1] sm:$0xff] %vm293_vm0, %v5272_v47  ;;  %524 = vrot.lane.b32.xlu1 %v446_v48, %s4922_s24 }
  0xcd   : > { %414 = vst.msk [vmem:[#allocation4 + $0x70] sm:$0xff] %vm293_vm0, %v5274_v49 }
  0xcf   : > { %v5281_v50 = vpop.trf.xlu0  ;;  %v5283_v51 = vld [vmem:[#allocation2 + $0xb1] sm:$0xff] }
  0xd0   : > { %7337 = vst [vmem:[#allocation21_spill] sm:$0xff] %v5281_v50  ;;  %v5285_v52 = vld [vmem:[#allocation2 + $0xb0] sm:$0xff]  ;;  %351 = vst.msk [vmem:[#allocation2 + $0xc9] sm:$0xff] %vm293_vm0, %v5281_v50  ;;  %526 = vrot.lane.b32.xlu1 %v5283_v51, %s4922_s24 }
  0xd1   : > { %415 = vst.msk [vmem:[#allocation4 + $0x78] sm:$0xff] %vm293_vm0, %v5285_v52  ;;  %v5348_v4 = vld [vmem:[#allocation2 + $0xb2] sm:$0xff] }
  0xd3   : > { %v5293_v53 = vpop.trf.xlu0  ;;  %v448_v54 = vld [vmem:[#allocation2 + $0xc1] sm:$0xff] }
  0xd4   : > { %7338 = vst [vmem:[#allocation22_spill] sm:$0xff] %v5293_v53  ;;  %v5295_v55 = vld [vmem:[#allocation2 + $0xc0] sm:$0xff]  ;;  %352 = vst.msk [vmem:[#allocation2 + $0xd9] sm:$0xff] %vm293_vm0, %v5293_v53  ;;  %528 = vrot.lane.b32.xlu1 %v448_v54, %s4922_s24 }
  0xd5   : > { %416 = vst.msk [vmem:[#allocation4 + $0x80] sm:$0xff] %vm293_vm0, %v5295_v55 }
  0xd7   : > { %v5302_v56 = vpop.trf.xlu0  ;;  %v5304_v57 = vld [vmem:[#allocation2 + $0xc9] sm:$0xff] }
  0xd8   : > { %7339 = vst [vmem:[#allocation23_spill] sm:$0xff] %v5302_v56  ;;  %v5306_v58 = vld [vmem:[#allocation2 + $0xc8] sm:$0xff]  ;;  %353 = vst.msk [vmem:[#allocation2 + $0xe1] sm:$0xff] %vm293_vm0, %v5302_v56  ;;  %530 = vrot.lane.b32.xlu0 %v5304_v57, %s4922_s24 }
  0xd9   : > { %7340 = vst [vmem:[#allocation24_spill] sm:$0xff] %v5306_v58  ;;  %417 = vst.msk [vmem:[#allocation4 + $0x88] sm:$0xff] %vm293_vm0, %v5306_v58  ;;  %v5364_v8 = vld [vmem:[#allocation2 + $0xca] sm:$0xff] }
  0xdb   : > { %v5314_v59 = vpop.trf.xlu0  ;;  %v5318_v61 = vld [vmem:[#allocation2 + $0xd9] sm:$0xff] }
  0xdc   : > { %7341 = vst [vmem:[#allocation25_spill] sm:$0xff] %v5314_v59  ;;  %v5320_v62 = vld [vmem:[#allocation2 + $0xd8] sm:$0xff]  ;;  %354 = vst.msk [vmem:[#allocation2 + $0xf1] sm:$0xff] %vm293_vm0, %v5314_v59  ;;  %711 = vrot.lane.b32.xlu0 %v5316_v60, %s4923_s25  ;;  %532 = vrot.lane.b32.xlu1 %v5318_v61, %s4922_s24 }
  0xdd   : > { %418 = vst.msk [vmem:[#allocation4 + $0x90] sm:$0xff] %vm293_vm0, %v5320_v62 }
  0xdf   : > { %v5330_v63 = vpop.trf.xlu0  ;;  %v5334_v1 = vld [vmem:[#allocation2 + $0xe1] sm:$0xff] }
  0xe0   : > { %7342 = vst [vmem:[#allocation26_spill] sm:$0xff] %v5330_v63  ;;  %v5336_v2 = vld [vmem:[#allocation2 + $0xe0] sm:$0xff]  ;;  %355 = vst.msk [vmem:[#allocation2 + $0xf9] sm:$0xff] %vm293_vm0, %v5330_v63  ;;  %715 = vrot.lane.b32.xlu0 %v5332_v0, %s4923_s25  ;;  %534 = vrot.lane.b32.xlu1 %v5334_v1, %s4922_s24 }
  0xe1   : > { %419 = vst.msk [vmem:[#allocation4 + $0x98] sm:$0xff] %vm293_vm0, %v5336_v2  ;;  %v5380_v30 = vld [vmem:[#allocation2 + $0xe2] sm:$0xff] }
  0xe3   : > { %v5346_v3 = vpop.trf.xlu0  ;;  %v5350_v5 = vld [vmem:[#allocation2 + $0xf1] sm:$0xff] }
  0xe4   : > { %7343 = vst [vmem:[#allocation27_spill] sm:$0xff] %v5346_v3  ;;  %v5352_v6 = vld [vmem:[#allocation2 + $0xf0] sm:$0xff]  ;;  %356 = vst.msk [vmem:[#allocation2 + $0x109] sm:$0xff] %vm293_vm0, %v5346_v3  ;;  %719 = vrot.lane.b32.xlu0 %v5348_v4, %s4923_s25  ;;  %536 = vrot.lane.b32.xlu1 %v5350_v5, %s4922_s24 }
  0xe5   : > { %420 = vst.msk [vmem:[#allocation4 + $0xa0] sm:$0xff] %vm293_vm0, %v5352_v6 }
  0xe7   : > { %v5362_v7 = vpop.trf.xlu0  ;;  %v5366_v12 = vld [vmem:[#allocation2 + $0xf9] sm:$0xff] }
  0xe8   : > { %7344 = vst [vmem:[#allocation28_spill] sm:$0xff] %v5362_v7  ;;  %v5368_v18 = vld [vmem:[#allocation2 + $0xf8] sm:$0xff]  ;;  %357 = vst.msk [vmem:[#allocation2 + $0x111] sm:$0xff] %vm293_vm0, %v5362_v7  ;;  %723 = vrot.lane.b32.xlu0 %v5364_v8, %s4923_s25  ;;  %538 = vrot.lane.b32.xlu1 %v5366_v12, %s4922_s24 }
  0xe9   : > { %7345 = vst [vmem:[#allocation29_spill] sm:$0xff] %v5368_v18  ;;  %421 = vst.msk [vmem:[#allocation4 + $0xa8] sm:$0xff] %vm293_vm0, %v5368_v18  ;;  %v5396_v54 = vld [vmem:[#allocation2 + $0xfa] sm:$0xff] }
  0xeb   : > { %v5378_v24 = vpop.trf.xlu0  ;;  %v5382_v36 = vld [vmem:[#allocation2 + $0x109] sm:$0xff] }
  0xec   : > { %7346 = vst [vmem:[#allocation30_spill] sm:$0xff] %v5378_v24  ;;  %7347 = vst [vmem:[#allocation31_spill] sm:$0xff] %v5382_v36  ;;  %v5384_v42 = vld [vmem:[#allocation2 + $0x108] sm:$0xff]  ;;  %727 = vrot.lane.b32.xlu0 %v5380_v30, %s4923_s25  ;;  %540 = vrot.lane.b32.xlu1 %v5382_v36, %s4922_s24  ;;  %v5536_v36 = vld [vmem:[#allocation2 + $0x1a] sm:$0xff] }
  0xed   : > { %358 = vst.msk [vmem:[#allocation2 + $0x121] sm:$0xff] %vm293_vm0, %v5378_v24  ;;  %422 = vst.msk [vmem:[#allocation4 + $0xb0] sm:$0xff] %vm293_vm0, %v5384_v42 }
  0xee   : > { %7366 = vst [vmem:[#allocation50_spill] sm:$0xff] %v5536_v36 }
  0xef   : > { %v5394_v48 = vpop.trf.xlu0  ;;  %v5398_v7 = vld [vmem:[#allocation2 + $0x111] sm:$0xff] }
  0xf0   : > { %7348 = vst [vmem:[#allocation32_spill] sm:$0xff] %v5394_v48  ;;  %v5400_v3 = vld [vmem:[#allocation2 + $0x110] sm:$0xff]  ;;  %359 = vst.msk [vmem:[#allocation2 + $0x129] sm:$0xff] %vm293_vm0, %v5394_v48  ;;  %731 = vrot.lane.b32.xlu0 %v5396_v54, %s4923_s25  ;;  %542 = vrot.lane.b32.xlu1 %v5398_v7, %s4922_s24 }
  0xf1   : > { %7349 = vst [vmem:[#allocation33_spill] sm:$0xff] %v5400_v3  ;;  %423 = vst.msk [vmem:[#allocation4 + $0xb8] sm:$0xff] %vm293_vm0, %v5400_v3  ;;  %v5412_v63 = vld [vmem:[#allocation2 + $0x112] sm:$0xff] }
  0xf3   : > { %v5410_v24 = vpop.trf.xlu0 }
  0xf4   : > { %7350 = vst [vmem:[#allocation34_spill] sm:$0xff] %v5410_v24  ;;  %v5414_v59 = vld [vmem:[#allocation2 + $0x121] sm:$0xff]  ;;  %360 = vst.msk [vmem:[#allocation2 + $0x139] sm:$0xff] %vm293_vm0, %v5410_v24  ;;  %735 = vrot.lane.b32.xlu0 %v5412_v63, %s4923_s25 }
  0xf5   : > { %7351 = vst [vmem:[#allocation35_spill] sm:$0xff] %v5414_v59  ;;  %v5416_v56 = vld [vmem:[#allocation2 + $0x120] sm:$0xff]  ;;  %544 = vrot.lane.b32.xlu1 %v5414_v59, %s4922_s24 }
  0xf6   : > { %424 = vst.msk [vmem:[#allocation4 + $0xc0] sm:$0xff] %vm293_vm0, %v5416_v56 }
  0xf7   : > { %v5426_v48 = vpop.trf.xlu0  ;;  %v5428_v53 = vld [vmem:[#allocation2 + $0x12a] sm:$0xff] }
  0xf8   : > { %7352 = vst [vmem:[#allocation36_spill] sm:$0xff] %v5426_v48  ;;  %v5430_v50 = vld [vmem:[#allocation2 + $0x129] sm:$0xff]  ;;  %361 = vst.msk [vmem:[#allocation2 + $0x141] sm:$0xff] %vm293_vm0, %v5426_v48  ;;  %739 = vrot.lane.b32.xlu0 %v5428_v53, %s4923_s25 }
  0xf9   : > { %v5432_v47 = vld [vmem:[#allocation2 + $0x128] sm:$0xff]  ;;  %546 = vrot.lane.b32.xlu1 %v5430_v50, %s4922_s24 }
  0xfa   : > { %7353 = vst [vmem:[#allocation37_spill] sm:$0xff] %v5432_v47  ;;  %425 = vst.msk [vmem:[#allocation4 + $0xc8] sm:$0xff] %vm293_vm0, %v5432_v47 }
  0xfb   : > { %v5442_v24 = vpop.trf.xlu0  ;;  %v5444_v44 = vld [vmem:[#allocation2 + $0x139] sm:$0xff] }
  0xfc   : > { %7354 = vst [vmem:[#allocation38_spill] sm:$0xff] %v5442_v24  ;;  %7355 = vst [vmem:[#allocation39_spill] sm:$0xff] %v5444_v44  ;;  %v5446_v41 = vld [vmem:[#allocation2 + $0x138] sm:$0xff] }
  0xfd   : > { %362 = vst.msk [vmem:[#allocation2 + $0x151] sm:$0xff] %vm293_vm0, %v5442_v24  ;;  %548 = vrot.lane.b32.xlu1 %v5444_v44, %s4922_s24  ;;  %426 = vst.msk [vmem:[#allocation4 + $0xd0] sm:$0xff] %vm293_vm0, %v5446_v41 }
  0xff   : > { %v5454_v48 = vpop.trf.xlu0  ;;  %v5456_v38 = vld [vmem:[#allocation2 + $0x142] sm:$0xff] }
 0x100   : > { %7356 = vst [vmem:[#allocation40_spill] sm:$0xff] %v5454_v48  ;;  %v5458_v35 = vld [vmem:[#allocation2 + $0x141] sm:$0xff]  ;;  %363 = vst.msk [vmem:[#allocation2 + $0x159] sm:$0xff] %vm293_vm0, %v5454_v48  ;;  %743 = vrot.lane.b32.xlu0 %v5456_v38, %s4923_s25 }
 0x101   : > { %v5460_v32 = vld [vmem:[#allocation2 + $0x140] sm:$0xff]  ;;  %550 = vrot.lane.b32.xlu1 %v5458_v35, %s4922_s24 }
 0x102   : > { %7357 = vst [vmem:[#allocation41_spill] sm:$0xff] %v5460_v32  ;;  %427 = vst.msk [vmem:[#allocation4 + $0xd8] sm:$0xff] %vm293_vm0, %v5460_v32 }
 0x103   : > { %v5470_v24 = vpop.trf.xlu0 }
 0x104   : > { %7358 = vst [vmem:[#allocation42_spill] sm:$0xff] %v5470_v24  ;;  %v5472_v29 = vld [vmem:[#allocation2 + $0x151] sm:$0xff]  ;;  %364 = vst.msk [vmem:[#allocation2 + $0x169] sm:$0xff] %vm293_vm0, %v5470_v24 }
 0x105   : > { %7359 = vst [vmem:[#allocation43_spill] sm:$0xff] %v5472_v29  ;;  %v5474_v26 = vld [vmem:[#allocation2 + $0x150] sm:$0xff]  ;;  %552 = vrot.lane.b32.xlu1 %v5472_v29, %s4922_s24 }
 0x106   : > { %428 = vst.msk [vmem:[#allocation4 + $0xe0] sm:$0xff] %vm293_vm0, %v5474_v26 }
 0x107   : > { %v5482_v48 = vpop.trf.xlu0  ;;  %v5484_v23 = vld [vmem:[#allocation2 + $0x15a] sm:$0xff] }
 0x108   : > { %7360 = vst [vmem:[#allocation44_spill] sm:$0xff] %v5482_v48  ;;  %v5486_v20 = vld [vmem:[#allocation2 + $0x159] sm:$0xff]  ;;  %365 = vst.msk [vmem:[#allocation2 + $0x171] sm:$0xff] %vm293_vm0, %v5482_v48  ;;  %747 = vrot.lane.b32.xlu0 %v5484_v23, %s4923_s25 }
 0x109   : > { %v5488_v17 = vld [vmem:[#allocation2 + $0x158] sm:$0xff]  ;;  %554 = vrot.lane.b32.xlu1 %v5486_v20, %s4922_s24 }
 0x10a   : > { %7361 = vst [vmem:[#allocation45_spill] sm:$0xff] %v5488_v17  ;;  %429 = vst.msk [vmem:[#allocation4 + $0xe8] sm:$0xff] %vm293_vm0, %v5488_v17 }
 0x10b   : > { %v5498_v24 = vld [vmem:[#allocation2 + $0x169] sm:$0xff]  ;;  %v5500_v14 = vpop.trf.xlu0 }
 0x10c   : > { %7362 = vst [vmem:[#allocation46_spill] sm:$0xff] %v5498_v24  ;;  %7363 = vst [vmem:[#allocation47_spill] sm:$0xff] %v5500_v14  ;;  %v5502_v11 = vld [vmem:[#allocation2 + $0x168] sm:$0xff] }
 0x10d   : > { %556 = vrot.lane.b32.xlu1 %v5498_v24, %s4922_s24  ;;  %366 = vst.msk [vmem:[#allocation2 + $0x181] sm:$0xff] %vm293_vm0, %v5500_v14  ;;  %430 = vst.msk [vmem:[#allocation4 + $0xf0] sm:$0xff] %vm293_vm0, %v5502_v11  ;;  %v626_v24 = vld [vmem:[#allocation2 + $0xa] sm:$0xff] }
 0x10e   : > { %v501_v48 = vpop.permute.xlu1 %500 }
 0x10f   : > { %595 = vst.msk [vmem:[#allocation4 + $0x10] sm:$0xff] %vm592_vm3, %v501_v48  ;;  %v5511_v10 = vld [vmem:[#allocation2 + $0x172] sm:$0xff]  ;;  %v5515_v29 = vpop.trf.xlu0  ;;  %v625_v48 = vld [vmem:[#allocation2 + $0x2] sm:$0xff] }
 0x110   : > { %v5513_v9 = vld [vmem:[#allocation2 + $0x171] sm:$0xff]  ;;  %7364 = vst [vmem:[#allocation48_spill] sm:$0xff] %v5515_v29  ;;  %751 = vrot.lane.b32.xlu0 %v5511_v10, %s4923_s25  ;;  %367 = vst.msk [vmem:[#allocation2 + $0x189] sm:$0xff] %vm293_vm0, %v5515_v29 }
 0x111   : > { %v5517_v44 = vld [vmem:[#allocation2 + $0x170] sm:$0xff]  ;;  %558 = vrot.lane.b32.xlu1 %v5513_v9, %s4922_s24 }
 0x112   : > { %7365 = vst [vmem:[#allocation49_spill] sm:$0xff] %v5517_v44  ;;  %431 = vst.msk [vmem:[#allocation4 + $0xf8] sm:$0xff] %vm293_vm0, %v5517_v44  ;;  %v503_v14 = vpop.permute.xlu1 %502 }
 0x113   : > { %596 = vst.msk [vmem:[#allocation4 + $0x18] sm:$0xff] %vm592_vm3, %v503_v14 }
 0x114   : > { %884 = vrot.lane.b32.xlu0 %v5159_v16, %s4924_s26  ;;  %v5543_v16 = vld [vmem:[#allocation2 + $0x22] sm:$0xff] }
 0x115   : > { %689 = vrot.lane.b32.xlu1 %v625_v48, %s4923_s25  ;;  %v5557_v48 = vld [vmem:[#allocation2 + $0x3a] sm:$0xff] }
 0x116   : > { %v505_v59 = vpop.permute.xlu1 %504 }
 0x117   : > { %597 = vst.msk [vmem:[#allocation4 + $0x20] sm:$0xff] %vm592_vm3, %v505_v59  ;;  %v5550_v59 = vld [vmem:[#allocation2 + $0x32] sm:$0xff] }
 0x118   : > { %888 = vrot.lane.b32.xlu0 %v5180_v22, %s4924_s26  ;;  %7367 = vst [vmem:[#allocation51_spill] sm:$0xff] %v5550_v59 }
 0x119   : > { %691 = vrot.lane.b32.xlu1 %v626_v24, %s4923_s25 }
 0x11a   : > { %v507_v29 = vpop.permute.xlu1 %506 }
 0x11b   : > { %598 = vst.msk [vmem:[#allocation4 + $0x28] sm:$0xff] %vm592_vm3, %v507_v29 }
 0x11c   : > { %892 = vrot.lane.b32.xlu0 %v5201_v28, %s4924_s26 }
 0x11d   : > { %693 = vrot.lane.b32.xlu1 %v5536_v36, %s4923_s25  ;;  %v5578_v36 = vld [vmem:[#allocation2 + $0x62] sm:$0xff] }
 0x11e   : > { %v509_v14 = vpop.permute.xlu1 %508  ;;  %7369 = vst [vmem:[#allocation53_spill] sm:$0xff] %v5578_v36 }
 0x11f   : > { %599 = vst.msk [vmem:[#allocation4 + $0x30] sm:$0xff] %vm592_vm3, %v509_v14 }
 0x120   : > { %896 = vrot.lane.b32.xlu0 %v5222_v34, %s4924_s26 }
 0x121   : > { %695 = vrot.lane.b32.xlu1 %v5543_v16, %s4923_s25 }
 0x122   : > { %v511_v29 = vpop.permute.xlu1 %510 }
 0x123   : > { %600 = vst.msk [vmem:[#allocation4 + $0x38] sm:$0xff] %vm592_vm3, %v511_v29  ;;  %v5564_v29 = vld [vmem:[#allocation2 + $0x4a] sm:$0xff] }
 0x124   : > { %900 = vrot.lane.b32.xlu0 %v5243_v40, %s4924_s26  ;;  %7368 = vst [vmem:[#allocation52_spill] sm:$0xff] %v5564_v29 }
 0x125   : > { %697 = vrot.lane.b32.xlu1 %v5550_v59, %s4923_s25  ;;  %v5571_v59 = vld [vmem:[#allocation2 + $0x52] sm:$0xff] }
 0x126   : > { %v513_v24 = vpop.permute.xlu1 %512 }
 0x127   : > { %601 = vst.msk [vmem:[#allocation4 + $0x40] sm:$0xff] %vm592_vm3, %v513_v24 }
 0x128   : > { %904 = vrot.lane.b32.xlu0 %v5264_v46, %s4924_s26 }
 0x129   : > { %699 = vrot.lane.b32.xlu1 %v5557_v48, %s4923_s25 }
 0x12a   : > { %v515_v14 = vpop.permute.xlu1 %514 }
 0x12b   : > { %602 = vst.msk [vmem:[#allocation4 + $0x48] sm:$0xff] %vm592_vm3, %v515_v14 }
 0x12c   : > { %908 = vrot.lane.b32.xlu0 %v5285_v52, %s4924_s26 }
 0x12d   : > { %701 = vrot.lane.b32.xlu1 %v5564_v29, %s4923_s25  ;;  %v5585_v29 = vld [vmem:[#allocation2 + $0x6a] sm:$0xff] }
 0x12e   : > { %v517_v24 = vpop.permute.xlu1 %516 }
 0x12f   : > { %603 = vst.msk [vmem:[#allocation4 + $0x50] sm:$0xff] %vm592_vm3, %v517_v24 }
 0x130   : > { %912 = vrot.lane.b32.xlu0 %v5306_v58, %s4924_s26  ;;  %v5592_v58 = vld [vmem:[#allocation2 + $0x7a] sm:$0xff] }
 0x131   : > { %703 = vrot.lane.b32.xlu1 %v5571_v59, %s4923_s25 }
 0x132   : > { %v519_v14 = vpop.permute.xlu1 %518 }
 0x133   : > { %604 = vst.msk [vmem:[#allocation4 + $0x58] sm:$0xff] %vm592_vm3, %v519_v14 }
 0x134   : > { %916 = vrot.lane.b32.xlu0 %v5336_v2, %s4924_s26 }
 0x135   : > { %705 = vrot.lane.b32.xlu1 %v5578_v36, %s4923_s25  ;;  %v5599_v36 = vld [vmem:[#allocation2 + $0x92] sm:$0xff] }
 0x136   : > { %v521_v24 = vpop.permute.xlu1 %520 }
 0x137   : > { %605 = vst.msk [vmem:[#allocation4 + $0x60] sm:$0xff] %vm592_vm3, %v521_v24 }
 0x138   : > { %920 = vrot.lane.b32.xlu0 %v5368_v18, %s4924_s26  ;;  %v5606_v18 = vld [vmem:[#allocation2 + $0xaa] sm:$0xff] }
 0x139   : > { %707 = vrot.lane.b32.xlu1 %v5585_v29, %s4923_s25  ;;  %7370 = vst [vmem:[#allocation54_spill] sm:$0xff] %v5606_v18 }
 0x13a   : > { %v523_v14 = vpop.permute.xlu1 %522 }
 0x13b   : > { %606 = vst.msk [vmem:[#allocation4 + $0x68] sm:$0xff] %vm592_vm3, %v523_v14 }
 0x13c   : > { %924 = vrot.lane.b32.xlu0 %v5400_v3, %s4924_s26  ;;  %v5613_v3 = vld [vmem:[#allocation2 + $0xc2] sm:$0xff] }
 0x13d   : > { %709 = vrot.lane.b32.xlu1 %v5592_v58, %s4923_s25 }
 0x13e   : > { %v525_v24 = vpop.permute.xlu1 %524 }
 0x13f   : > { %607 = vst.msk [vmem:[#allocation4 + $0x70] sm:$0xff] %vm592_vm3, %v525_v24 }
 0x140   : > { %928 = vrot.lane.b32.xlu0 %v5432_v47, %s4924_s26  ;;  %v5620_v47 = vld [vmem:[#allocation2 + $0xda] sm:$0xff] }
 0x141   : > { %713 = vrot.lane.b32.xlu1 %v5599_v36, %s4923_s25  ;;  %7371 = vst [vmem:[#allocation55_spill] sm:$0xff] %v5620_v47 }
 0x142   : > { %v527_v14 = vpop.permute.xlu1 %526 }
 0x143   : > { %608 = vst.msk [vmem:[#allocation4 + $0x78] sm:$0xff] %vm592_vm3, %v527_v14 }
 0x144   : > { %932 = vrot.lane.b32.xlu0 %v5460_v32, %s4924_s26 }
 0x145   : > { %717 = vrot.lane.b32.xlu1 %v5606_v18, %s4923_s25 }
 0x146   : > { %v529_v24 = vpop.permute.xlu1 %528 }
 0x147   : > { %609 = vst.msk [vmem:[#allocation4 + $0x80] sm:$0xff] %vm592_vm3, %v529_v24  ;;  %v5626_v24 = vld [vmem:[#allocation2 + $0x188] sm:$0xff] }
 0x148   : > { %936 = vrot.lane.b32.xlu0 %v5488_v17, %s4924_s26  ;;  %7372 = vst [vmem:[#allocation56_spill] sm:$0xff] %v5626_v24  ;;  %v5630_v17 = vld [vmem:[#allocation2 + $0xf2] sm:$0xff] }
 0x149   : > { %721 = vrot.lane.b32.xlu1 %v5613_v3, %s4923_s25 }
 0x14a   : > { %v531_v14 = vpop.permute.xlu0 %530 }
 0x14b   : > { %610 = vst.msk [vmem:[#allocation4 + $0x88] sm:$0xff] %vm592_vm3, %v531_v14 }
 0x14c   : > { %940 = vrot.lane.b32.xlu0 %v5517_v44, %s4924_s26 }
 0x14d   : > { %725 = vrot.lane.b32.xlu1 %v5620_v47, %s4923_s25  ;;  %v5638_v47 = vld [vmem:[#allocation2 + $0x10a] sm:$0xff] }
 0x14e   : > { %v533_v32 = vpop.permute.xlu1 %532  ;;  %v712_v18 = vpop.permute.xlu0 %711 }
 0x14f   : > { %611 = vst.msk [vmem:[#allocation4 + $0x90] sm:$0xff] %vm592_vm3, %v533_v32 }
 0x150   : > { %797 = vst.msk [vmem:[#allocation4 + $0x58] sm:$0xff] %vm785_vm4, %v712_v18  ;;  %944 = vrot.lane.b32.xlu0 %v5626_v24, %s4924_s26  ;;  %v5646_v24 = vld [vmem:[#allocation2 + $0x122] sm:$0xff] }
 0x151   : > { %729 = vrot.lane.b32.xlu1 %v5630_v17, %s4923_s25 }
 0x152   : > { %v535_v14 = vpop.permute.xlu1 %534  ;;  %v716_v44 = vpop.permute.xlu0 %715 }
 0x153   : > { %612 = vst.msk [vmem:[#allocation4 + $0x98] sm:$0xff] %vm592_vm3, %v535_v14 }
 0x154   : > { %799 = vst.msk [vmem:[#allocation4 + $0x68] sm:$0xff] %vm785_vm4, %v716_v44  ;;  %1077 = vrot.lane.b32.xlu0 %v5157_v15, %s4925_s27  ;;  %v5654_v15 = vld [vmem:[#allocation2 + $0x13a] sm:$0xff] }
 0x155   : > { %733 = vrot.lane.b32.xlu1 %v5638_v47, %s4923_s25 }
 0x156   : > { %v537_v32 = vpop.permute.xlu1 %536  ;;  %v720_v18 = vpop.permute.xlu0 %719 }
 0x157   : > { %613 = vst.msk [vmem:[#allocation4 + $0xa0] sm:$0xff] %vm592_vm3, %v537_v32 }
 0x158   : > { %801 = vst.msk [vmem:[#allocation4 + $0x78] sm:$0xff] %vm785_vm4, %v720_v18  ;;  %1081 = vrot.lane.b32.xlu0 %v5178_v21, %s4925_s27  ;;  %v5662_v21 = vld [vmem:[#allocation2 + $0x152] sm:$0xff] }
 0x159   : > { %737 = vrot.lane.b32.xlu1 %v5646_v24, %s4923_s25 }
 0x15a   : > { %v539_v44 = vpop.permute.xlu1 %538  ;;  %v724_v14 = vpop.permute.xlu0 %723 }
 0x15b   : > { %614 = vst.msk [vmem:[#allocation4 + $0xa8] sm:$0xff] %vm592_vm3, %v539_v44 }
 0x15c   : > { %803 = vst.msk [vmem:[#allocation4 + $0x88] sm:$0xff] %vm785_vm4, %v724_v14  ;;  %1085 = vrot.lane.b32.xlu0 %v5199_v27, %s4925_s27  ;;  %v5670_v27 = vld [vmem:[#allocation2 + $0x16a] sm:$0xff] }
 0x15d   : > { %741 = vrot.lane.b32.xlu1 %v5654_v15, %s4923_s25 }
 0x15e   : > { %v541_v32 = vpop.permute.xlu1 %540  ;;  %v728_v18 = vpop.permute.xlu0 %727 }
 0x15f   : > { %615 = vst.msk [vmem:[#allocation4 + $0xb0] sm:$0xff] %vm592_vm3, %v541_v32 }
 0x160   : > { %805 = vst.msk [vmem:[#allocation4 + $0x98] sm:$0xff] %vm785_vm4, %v728_v18  ;;  %1089 = vrot.lane.b32.xlu0 %v5220_v33, %s4925_s27 }
 0x161   : > { %745 = vrot.lane.b32.xlu1 %v5662_v21, %s4923_s25 }
 0x162   : > { %v543_v44 = vpop.permute.xlu1 %542  ;;  %v732_v14 = vpop.permute.xlu0 %731 }
 0x163   : > { %616 = vst.msk [vmem:[#allocation4 + $0xb8] sm:$0xff] %vm592_vm3, %v543_v44 }
 0x164   : > { %807 = vst.msk [vmem:[#allocation4 + $0xa8] sm:$0xff] %vm785_vm4, %v732_v14  ;;  %1093 = vrot.lane.b32.xlu0 %v5241_v39, %s4925_s27 }
 0x165   : > { %749 = vrot.lane.b32.xlu1 %v5670_v27, %s4923_s25 }
 0x166   : > { %v736_v18 = vpop.permute.xlu0 %735 }
 0x167   : > { %v545_v32 = vpop.permute.xlu1 %544  ;;  %809 = vst.msk [vmem:[#allocation4 + $0xb8] sm:$0xff] %vm785_vm4, %v736_v18 }
 0x168   : > { %617 = vst.msk [vmem:[#allocation4 + $0xc0] sm:$0xff] %vm592_vm3, %v545_v32  ;;  %1097 = vrot.lane.b32.xlu0 %v5262_v45, %s4925_s27 }
 0x169   : > { %882 = vrot.lane.b32.xlu1 %v5148_v13, %s4924_s26 }
 0x16a   : > { %v740_v44 = vpop.permute.xlu0 %739 }
 0x16b   : > { %v547_v33 = vpop.permute.xlu1 %546 }
 0x16c   : > { %618 = vst.msk [vmem:[#allocation4 + $0xc8] sm:$0xff] %vm592_vm3, %v547_v33  ;;  %1101 = vrot.lane.b32.xlu0 %v5283_v51, %s4925_s27 }
 0x16d   : > { %811 = vst.msk [vmem:[#allocation4 + $0xc8] sm:$0xff] %vm785_vm4, %v740_v44  ;;  %886 = vrot.lane.b32.xlu1 %v5169_v19, %s4924_s26  ;;  %v5765_v44 = vld [vmem:[#allocation2 + $0x180] sm:$0xff] }
 0x16f   : > { %v549_v39 = vpop.permute.xlu1 %548 }
 0x170   : > { %619 = vst.msk [vmem:[#allocation4 + $0xd0] sm:$0xff] %vm592_vm3, %v549_v39  ;;  %1105 = vrot.lane.b32.xlu0 %v5304_v57, %s4925_s27 }
 0x171   : > { %890 = vrot.lane.b32.xlu1 %v5190_v25, %s4924_s26 }
 0x172   : > { %v744_v45 = vpop.permute.xlu0 %743 }
 0x173   : > { %v551_v13 = vpop.permute.xlu1 %550 }
 0x174   : > { %620 = vst.msk [vmem:[#allocation4 + $0xd8] sm:$0xff] %vm592_vm3, %v551_v13  ;;  %1109 = vrot.lane.b32.xlu0 %v5334_v1, %s4925_s27 }
 0x175   : > { %813 = vst.msk [vmem:[#allocation4 + $0xd8] sm:$0xff] %vm785_vm4, %v744_v45  ;;  %894 = vrot.lane.b32.xlu1 %v5211_v31, %s4924_s26 }
 0x177   : > { %v553_v19 = vpop.permute.xlu1 %552 }
 0x178   : > { %621 = vst.msk [vmem:[#allocation4 + $0xe0] sm:$0xff] %vm592_vm3, %v553_v19  ;;  %1113 = vrot.lane.b32.xlu0 %v5366_v12, %s4925_s27  ;;  %v5779_v19 = vld [vmem:[#allocation2 + $0x31] sm:$0xff] }
 0x179   : > { %898 = vrot.lane.b32.xlu1 %v5232_v37, %s4924_s26 }
 0x17a   : > { %v748_v51 = vpop.permute.xlu0 %747 }
 0x17b   : > { %v555_v25 = vpop.permute.xlu1 %554 }
 0x17c   : > { %622 = vst.msk [vmem:[#allocation4 + $0xe8] sm:$0xff] %vm592_vm3, %v555_v25  ;;  %1117 = vrot.lane.b32.xlu0 %v5398_v7, %s4925_s27 }
 0x17d   : > { %815 = vst.msk [vmem:[#allocation4 + $0xe8] sm:$0xff] %vm785_vm4, %v748_v51  ;;  %902 = vrot.lane.b32.xlu1 %v5253_v43, %s4924_s26 }
 0x17f   : > { %v557_v31 = vpop.permute.xlu1 %556 }
 0x180   : > { %623 = vst.msk [vmem:[#allocation4 + $0xf0] sm:$0xff] %vm592_vm3, %v557_v31  ;;  %1121 = vrot.lane.b32.xlu0 %v5430_v50, %s4925_s27 }
 0x181   : > { %906 = vrot.lane.b32.xlu1 %v5274_v49, %s4924_s26 }
 0x182   : > { %v752_v57 = vpop.permute.xlu0 %751 }
 0x183   : > { %v559_v37 = vpop.permute.xlu1 %558 }
 0x184   : > { %624 = vst.msk [vmem:[#allocation4 + $0xf8] sm:$0xff] %vm592_vm3, %v559_v37  ;;  %1125 = vrot.lane.b32.xlu0 %v5458_v35, %s4925_s27  ;;  %v5732_v35 = vld [vmem:[#allocation2 + $0x189] sm:$0xff] }
 0x185   : > { %817 = vst.msk [vmem:[#allocation4 + $0xf8] sm:$0xff] %vm785_vm4, %v752_v57  ;;  %910 = vrot.lane.b32.xlu1 %v5295_v55, %s4924_s26 }
 0x186   : > { %v885_v1 = vpop.permute.xlu0 %884 }
 0x187   : > { %v690_v43 = vpop.permute.xlu1 %689 }
 0x188   : > { %786 = vst.msk [vmem:[#allocation4] sm:$0xff] %vm785_vm4, %v690_v43  ;;  %1129 = vrot.lane.b32.xlu0 %v5486_v20, %s4925_s27 }
 0x189   : > { %914 = vrot.lane.b32.xlu1 %v5320_v62, %s4924_s26 }
 0x18a   : > { %v889_v50 = vpop.permute.xlu0 %888 }
 0x18b   : > { %v692_v49 = vpop.permute.xlu1 %691 }
 0x18c   : > { %787 = vst.msk [vmem:[#allocation4 + $0x8] sm:$0xff] %vm785_vm4, %v692_v49  ;;  %1133 = vrot.lane.b32.xlu0 %v5513_v9, %s4925_s27 }
 0x18d   : > { %918 = vrot.lane.b32.xlu1 %v5352_v6, %s4924_s26  ;;  %980 = vst.msk [vmem:[#allocation4 + $0x8] sm:$0xff] %vm978_vm5, %v885_v1 }
 0x18e   : > { %v893_v62 = vpop.permute.xlu0 %892 }
 0x18f   : > { %v694_v55 = vpop.permute.xlu1 %693 }
 0x190   : > { %788 = vst.msk [vmem:[#allocation4 + $0x10] sm:$0xff] %vm785_vm4, %v694_v55  ;;  %1137 = vrot.lane.b32.xlu0 %v5732_v35, %s4925_s27 }
 0x191   : > { %922 = vrot.lane.b32.xlu1 %v5384_v42, %s4924_s26 }
 0x192   : > { %v897_v7 = vpop.permute.xlu0 %896 }
 0x193   : > { %v696_v20 = vpop.permute.xlu1 %695 }
 0x194   : > { %789 = vst.msk [vmem:[#allocation4 + $0x18] sm:$0xff] %vm785_vm4, %v696_v20  ;;  %1270 = vrot.lane.b32.xlu0 %v5543_v16, %s4926_s28 }
 0x195   : > { %926 = vrot.lane.b32.xlu1 %v5416_v56, %s4924_s26  ;;  %982 = vst.msk [vmem:[#allocation4 + $0x18] sm:$0xff] %vm978_vm5, %v889_v50 }
 0x196   : > { %v901_v12 = vpop.permute.xlu0 %900 }
 0x197   : > { %v698_v9 = vpop.permute.xlu1 %697 }
 0x198   : > { %790 = vst.msk [vmem:[#allocation4 + $0x20] sm:$0xff] %vm785_vm4, %v698_v9  ;;  %1274 = vrot.lane.b32.xlu0 %v5557_v48, %s4926_s28 }
 0x199   : > { %930 = vrot.lane.b32.xlu1 %v5446_v41, %s4924_s26 }
 0x19a   : > { %v905_v32 = vpop.permute.xlu0 %904 }
 0x19b   : > { %v700_v14 = vpop.permute.xlu1 %699  ;;  %990 = vst.msk [vmem:[#allocation4 + $0x58] sm:$0xff] %vm978_vm5, %v905_v32 }
 0x19c   : > { %791 = vst.msk [vmem:[#allocation4 + $0x28] sm:$0xff] %vm785_vm4, %v700_v14  ;;  %1278 = vrot.lane.b32.xlu0 %v5571_v59, %s4926_s28 }
 0x19d   : > { %984 = vst.msk [vmem:[#allocation4 + $0x28] sm:$0xff] %vm978_vm5, %v893_v62  ;;  %934 = vrot.lane.b32.xlu1 %v5474_v26, %s4924_s26 }
 0x19e   : > { %v909_v18 = vpop.permute.xlu0 %908 }
 0x19f   : > { %v702_v16 = vpop.permute.xlu1 %701  ;;  %992 = vst.msk [vmem:[#allocation4 + $0x68] sm:$0xff] %vm978_vm5, %v909_v18  ;;  %v7375_v18 = vld [vmem:[#allocation39_spill] sm:$0xff] }
 0x1a0   : > { %792 = vst.msk [vmem:[#allocation4 + $0x30] sm:$0xff] %vm785_vm4, %v702_v16  ;;  %1282 = vrot.lane.b32.xlu0 %v5585_v29, %s4926_s28  ;;  %v1011_v29 = vld [vmem:[#allocation2 + $0x19] sm:$0xff] }
 0x1a1   : > { %938 = vrot.lane.b32.xlu1 %v5502_v11, %s4924_s26 }
 0x1a2   : > { %v913_v33 = vpop.permute.xlu0 %912 }
 0x1a3   : > { %v704_v48 = vpop.permute.xlu1 %703  ;;  %994 = vst.msk [vmem:[#allocation4 + $0x78] sm:$0xff] %vm978_vm5, %v913_v33 }
 0x1a4   : > { %793 = vst.msk [vmem:[#allocation4 + $0x38] sm:$0xff] %vm785_vm4, %v704_v48  ;;  %1286 = vrot.lane.b32.xlu0 %v5316_v60, %s4926_s28 }
 0x1a5   : > { %986 = vst.msk [vmem:[#allocation4 + $0x38] sm:$0xff] %vm978_vm5, %v897_v7  ;;  %942 = vrot.lane.b32.xlu1 %v5765_v44, %s4924_s26 }
 0x1a6   : > { %v917_v39 = vpop.permute.xlu0 %916 }
 0x1a7   : > { %v706_v59 = vpop.permute.xlu1 %705  ;;  %996 = vst.msk [vmem:[#allocation4 + $0x88] sm:$0xff] %vm978_vm5, %v917_v39 }
 0x1a8   : > { %794 = vst.msk [vmem:[#allocation4 + $0x40] sm:$0xff] %vm785_vm4, %v706_v59  ;;  %1290 = vrot.lane.b32.xlu0 %v5332_v0, %s4926_s28  ;;  %v5788_v0 = vld [vmem:[#allocation2 + $0x49] sm:$0xff] }
 0x1a9   : > { %1075 = vrot.lane.b32.xlu1 %v1011_v29, %s4925_s27 }
 0x1aa   : > { %v921_v45 = vpop.permute.xlu0 %920 }
 0x1ab   : > { %v708_v13 = vpop.permute.xlu1 %707  ;;  %998 = vst.msk [vmem:[#allocation4 + $0x98] sm:$0xff] %vm978_vm5, %v921_v45  ;;  %v5880_v45 = vld [vmem:[#allocation2 + $0x181] sm:$0xff] }
 0x1ac   : > { %795 = vst.msk [vmem:[#allocation4 + $0x48] sm:$0xff] %vm785_vm4, %v708_v13  ;;  %1294 = vrot.lane.b32.xlu0 %v5348_v4, %s4926_s28  ;;  %v5796_v4 = vld [vmem:[#allocation2 + $0x61] sm:$0xff] }
 0x1ad   : > { %988 = vst.msk [vmem:[#allocation4 + $0x48] sm:$0xff] %vm978_vm5, %v901_v12  ;;  %1079 = vrot.lane.b32.xlu1 %v5779_v19, %s4925_s27 }
 0x1ae   : > { %v925_v25 = vpop.permute.xlu0 %924 }
 0x1af   : > { %v710_v60 = vpop.permute.xlu1 %709  ;;  %1000 = vst.msk [vmem:[#allocation4 + $0xa8] sm:$0xff] %vm978_vm5, %v925_v25 }
 0x1b0   : > { %796 = vst.msk [vmem:[#allocation4 + $0x50] sm:$0xff] %vm785_vm4, %v710_v60  ;;  %1298 = vrot.lane.b32.xlu0 %v5364_v8, %s4926_s28  ;;  %v5804_v8 = vld [vmem:[#allocation2 + $0x79] sm:$0xff] }
 0x1b1   : > { %1083 = vrot.lane.b32.xlu1 %v5788_v0, %s4925_s27 }
 0x1b2   : > { %v929_v31 = vpop.permute.xlu0 %928 }
 0x1b3   : > { %v714_v51 = vpop.permute.xlu1 %713  ;;  %1002 = vst.msk [vmem:[#allocation4 + $0xb8] sm:$0xff] %vm978_vm5, %v929_v31  ;;  %v7380_v31 = vld [vmem:[#allocation24_spill] sm:$0xff] }
 0x1b4   : > { %798 = vst.msk [vmem:[#allocation4 + $0x60] sm:$0xff] %vm785_vm4, %v714_v51  ;;  %1302 = vrot.lane.b32.xlu0 %v5380_v30, %s4926_s28  ;;  %v5812_v30 = vld [vmem:[#allocation2 + $0x91] sm:$0xff] }
 0x1b5   : > { %1087 = vrot.lane.b32.xlu1 %v5796_v4, %s4925_s27 }
 0x1b6   : > { %v933_v57 = vpop.permute.xlu0 %932 }
 0x1b7   : > { %v718_v37 = vpop.permute.xlu1 %717  ;;  %1004 = vst.msk [vmem:[#allocation4 + $0xc8] sm:$0xff] %vm978_vm5, %v933_v57 }
 0x1b8   : > { %800 = vst.msk [vmem:[#allocation4 + $0x70] sm:$0xff] %vm785_vm4, %v718_v37  ;;  %1306 = vrot.lane.b32.xlu0 %v5396_v54, %s4926_s28  ;;  %v5820_v54 = vld [vmem:[#allocation2 + $0xa9] sm:$0xff] }
 0x1b9   : > { %1091 = vrot.lane.b32.xlu1 %v5804_v8, %s4925_s27 }
 0x1ba   : > { %v937_v1 = vpop.permute.xlu0 %936 }
 0x1bb   : > { %v722_v43 = vpop.permute.xlu1 %721  ;;  %1006 = vst.msk [vmem:[#allocation4 + $0xd8] sm:$0xff] %vm978_vm5, %v937_v1 }
 0x1bc   : > { %802 = vst.msk [vmem:[#allocation4 + $0x80] sm:$0xff] %vm785_vm4, %v722_v43  ;;  %1310 = vrot.lane.b32.xlu0 %v5412_v63, %s4926_s28  ;;  %v5828_v63 = vld [vmem:[#allocation2 + $0xc1] sm:$0xff] }
 0x1bd   : > { %1095 = vrot.lane.b32.xlu1 %v5812_v30, %s4925_s27 }
 0x1be   : > { %v941_v50 = vpop.permute.xlu0 %940 }
 0x1bf   : > { %v726_v49 = vpop.permute.xlu1 %725  ;;  %1008 = vst.msk [vmem:[#allocation4 + $0xe8] sm:$0xff] %vm978_vm5, %v941_v50  ;;  %v7383_v50 = vld [vmem:[#allocation29_spill] sm:$0xff] }
 0x1c0   : > { %804 = vst.msk [vmem:[#allocation4 + $0x90] sm:$0xff] %vm785_vm4, %v726_v49  ;;  %1314 = vrot.lane.b32.xlu0 %v5428_v53, %s4926_s28  ;;  %v7382_v49 = vld [vmem:[#allocation53_spill] sm:$0xff] }
 0x1c1   : > { %1099 = vrot.lane.b32.xlu1 %v5820_v54, %s4925_s27 }
 0x1c2   : > { %v945_v62 = vpop.permute.xlu0 %944 }
 0x1c3   : > { %v730_v55 = vpop.permute.xlu1 %729  ;;  %1010 = vst.msk [vmem:[#allocation4 + $0xf8] sm:$0xff] %vm978_vm5, %v945_v62 }
 0x1c4   : > { %806 = vst.msk [vmem:[#allocation4 + $0xa0] sm:$0xff] %vm785_vm4, %v730_v55  ;;  %1318 = vrot.lane.b32.xlu0 %v5456_v38, %s4926_s28 }
 0x1c5   : > { %1103 = vrot.lane.b32.xlu1 %v5828_v63, %s4925_s27 }
 0x1c6   : > { %v1078_v7 = vpop.permute.xlu0 %1077 }
 0x1c7   : > { %v734_v20 = vpop.permute.xlu1 %733  ;;  %1173 = vst.msk [vmem:[#allocation4 + $0x8] sm:$0xff] %vm1171_vm6, %v1078_v7 }
 0x1c8   : > { %808 = vst.msk [vmem:[#allocation4 + $0xb0] sm:$0xff] %vm785_vm4, %v734_v20  ;;  %1322 = vrot.lane.b32.xlu0 %v5484_v23, %s4926_s28  ;;  %v7373_v23 = vld [vmem:[#allocation31_spill] sm:$0xff] }
 0x1c9   : > { %1107 = vrot.lane.b32.xlu1 %v5318_v61, %s4925_s27  ;;  %v5848_v61 = vld [vmem:[#allocation2 + $0x18a] sm:$0xff] }
 0x1ca   : > { %v1082_v9 = vpop.permute.xlu0 %1081 }
 0x1cb   : > { %v738_v53 = vpop.permute.xlu1 %737  ;;  %1175 = vst.msk [vmem:[#allocation4 + $0x18] sm:$0xff] %vm1171_vm6, %v1082_v9 }
 0x1cc   : > { %810 = vst.msk [vmem:[#allocation4 + $0xc0] sm:$0xff] %vm785_vm4, %v738_v53  ;;  %1326 = vrot.lane.b32.xlu0 %v5511_v10, %s4926_s28  ;;  %v7374_v10 = vld [vmem:[#allocation35_spill] sm:$0xff]  ;;  %v7385_v53 = vld [vmem:[#allocation37_spill] sm:$0xff] }
 0x1cd   : > { %1111 = vrot.lane.b32.xlu1 %v5350_v5, %s4925_s27 }
 0x1ce   : > { %v1086_v12 = vpop.permute.xlu0 %1085 }
 0x1cf   : > { %v742_v38 = vpop.permute.xlu1 %741  ;;  %1177 = vst.msk [vmem:[#allocation4 + $0x28] sm:$0xff] %vm1171_vm6, %v1086_v12  ;;  %v7387_v12 = vld [vmem:[#allocation41_spill] sm:$0xff] }
 0x1d0   : > { %812 = vst.msk [vmem:[#allocation4 + $0xd0] sm:$0xff] %vm785_vm4, %v742_v38  ;;  %1330 = vrot.lane.b32.xlu0 %v5848_v61, %s4926_s28 }
 0x1d1   : > { %1115 = vrot.lane.b32.xlu1 %v7373_v23, %s4925_s27 }
 0x1d2   : > { %v1090_v32 = vpop.permute.xlu0 %1089 }
 0x1d3   : > { %v746_v14 = vpop.permute.xlu1 %745  ;;  %1179 = vst.msk [vmem:[#allocation4 + $0x38] sm:$0xff] %vm1171_vm6, %v1090_v32 }
 0x1d4   : > { %814 = vst.msk [vmem:[#allocation4 + $0xe0] sm:$0xff] %vm785_vm4, %v746_v14  ;;  %1464 = vrot.lane.b32.xlu0 %v5180_v22, %s4927_s29  ;;  %v7376_v22 = vld [vmem:[#allocation43_spill] sm:$0xff] }
 0x1d5   : > { %1119 = vrot.lane.b32.xlu1 %v7374_v10, %s4925_s27 }
 0x1d6   : > { %v1094_v16 = vpop.permute.xlu0 %1093 }
 0x1d7   : > { %v750_v5 = vpop.permute.xlu1 %749  ;;  %1181 = vst.msk [vmem:[#allocation4 + $0x48] sm:$0xff] %vm1171_vm6, %v1094_v16  ;;  %v7390_v16 = vld [vmem:[#allocation49_spill] sm:$0xff] }
 0x1d8   : > { %816 = vst.msk [vmem:[#allocation4 + $0xf0] sm:$0xff] %vm785_vm4, %v750_v5  ;;  %1468 = vrot.lane.b32.xlu0 %v5201_v28, %s4927_s29  ;;  %v7377_v28 = vld [vmem:[#allocation46_spill] sm:$0xff]  ;;  %v7389_v5 = vld [vmem:[#allocation55_spill] sm:$0xff] }
 0x1d9   : > { %1123 = vrot.lane.b32.xlu1 %v7375_v18, %s4925_s27 }
 0x1da   : > { %v1098_v33 = vpop.permute.xlu0 %1097 }
 0x1db   : > { %v883_v48 = vpop.permute.xlu1 %882  ;;  %1183 = vst.msk [vmem:[#allocation4 + $0x58] sm:$0xff] %vm1171_vm6, %v1098_v33  ;;  %v1429_v33 = vld [vmem:[#allocation2 + $0x1a0] sm:$0xff] }
 0x1dc   : > { %979 = vst.msk [vmem:[#allocation4] sm:$0xff] %vm978_vm5, %v883_v48  ;;  %1472 = vrot.lane.b32.xlu0 %v5222_v34, %s4927_s29 }
 0x1dd   : > { %1127 = vrot.lane.b32.xlu1 %v7376_v22, %s4925_s27 }
 0x1de   : > { %v1102_v39 = vpop.permute.xlu0 %1101 }
 0x1df   : > { %v887_v59 = vpop.permute.xlu1 %886  ;;  %1185 = vst.msk [vmem:[#allocation4 + $0x68] sm:$0xff] %vm1171_vm6, %v1102_v39 }
 0x1e0   : > { %981 = vst.msk [vmem:[#allocation4 + $0x10] sm:$0xff] %vm978_vm5, %v887_v59  ;;  %1476 = vrot.lane.b32.xlu0 %v5243_v40, %s4927_s29  ;;  %v7378_v40 = vld [vmem:[#allocation50_spill] sm:$0xff] }
 0x1e1   : > { %1131 = vrot.lane.b32.xlu1 %v7377_v28, %s4925_s27 }
 0x1e2   : > { %v1106_v13 = vpop.permute.xlu0 %1105 }
 0x1e3   : > { %v891_v29 = vpop.permute.xlu1 %890  ;;  %1187 = vst.msk [vmem:[#allocation4 + $0x78] sm:$0xff] %vm1171_vm6, %v1106_v13 }
 0x1e4   : > { %983 = vst.msk [vmem:[#allocation4 + $0x20] sm:$0xff] %vm978_vm5, %v891_v29  ;;  %1480 = vrot.lane.b32.xlu0 %v5264_v46, %s4927_s29  ;;  %v7379_v46 = vld [vmem:[#allocation51_spill] sm:$0xff] }
 0x1e5   : > { %1135 = vrot.lane.b32.xlu1 %v5880_v45, %s4925_s27 }
 0x1e6   : > { %v1110_v60 = vpop.permute.xlu0 %1109 }
 0x1e7   : > { %v895_v34 = vpop.permute.xlu1 %894  ;;  %1189 = vst.msk [vmem:[#allocation4 + $0x88] sm:$0xff] %vm1171_vm6, %v1110_v60 }
 0x1e8   : > { %985 = vst.msk [vmem:[#allocation4 + $0x30] sm:$0xff] %vm978_vm5, %v895_v34  ;;  %1484 = vrot.lane.b32.xlu0 %v5285_v52, %s4927_s29  ;;  %v7381_v52 = vld [vmem:[#allocation52_spill] sm:$0xff] }
 0x1e9   : > { %1268 = vrot.lane.b32.xlu1 %v7378_v40, %s4926_s28 }
 0x1ea   : > { %v1114_v51 = vpop.permute.xlu0 %1113 }
 0x1eb   : > { %v899_v25 = vpop.permute.xlu1 %898  ;;  %1191 = vst.msk [vmem:[#allocation4 + $0x98] sm:$0xff] %vm1171_vm6, %v1114_v51 }
 0x1ec   : > { %987 = vst.msk [vmem:[#allocation4 + $0x40] sm:$0xff] %vm978_vm5, %v899_v25  ;;  %1488 = vrot.lane.b32.xlu0 %v7380_v31, %s4927_s29  ;;  %v1600_v31 = vld [vmem:[#allocation2 + $0x99] sm:$0xff] }
 0x1ed   : > { %1272 = vrot.lane.b32.xlu1 %v7379_v46, %s4926_s28 }
 0x1ee   : > { %v1118_v57 = vpop.permute.xlu0 %1117 }
 0x1ef   : > { %v903_v37 = vpop.permute.xlu1 %902  ;;  %1193 = vst.msk [vmem:[#allocation4 + $0xa8] sm:$0xff] %vm1171_vm6, %v1118_v57 }
 0x1f0   : > { %989 = vst.msk [vmem:[#allocation4 + $0x50] sm:$0xff] %vm978_vm5, %v903_v37  ;;  %1492 = vrot.lane.b32.xlu0 %v5336_v2, %s4927_s29  ;;  %v7384_v2 = vld [vmem:[#allocation33_spill] sm:$0xff] }
 0x1f1   : > { %1276 = vrot.lane.b32.xlu1 %v7381_v52, %s4926_s28  ;;  %v1602_v52 = vld [vmem:[#allocation2 + $0xb1] sm:$0xff] }
 0x1f2   : > { %v1122_v1 = vpop.permute.xlu0 %1121 }
 0x1f3   : > { %v907_v43 = vpop.permute.xlu1 %906  ;;  %1195 = vst.msk [vmem:[#allocation4 + $0xb8] sm:$0xff] %vm1171_vm6, %v1122_v1 }
 0x1f4   : > { %991 = vst.msk [vmem:[#allocation4 + $0x60] sm:$0xff] %vm978_vm5, %v907_v43  ;;  %1496 = vrot.lane.b32.xlu0 %v7383_v50, %s4927_s29  ;;  %v1604_v50 = vld [vmem:[#allocation2 + $0xc9] sm:$0xff] }
 0x1f5   : > { %1280 = vrot.lane.b32.xlu1 %v7382_v49, %s4926_s28  ;;  %v1400_v49 = vld [vmem:[#allocation2 + $0x48] sm:$0xff] }
 0x1f6   : > { %v1126_v62 = vpop.permute.xlu0 %1125 }
 0x1f7   : > { %v911_v55 = vpop.permute.xlu1 %910  ;;  %1197 = vst.msk [vmem:[#allocation4 + $0xc8] sm:$0xff] %vm1171_vm6, %v1126_v62 }
 0x1f8   : > { %993 = vst.msk [vmem:[#allocation4 + $0x70] sm:$0xff] %vm978_vm5, %v911_v55  ;;  %1500 = vrot.lane.b32.xlu0 %v7384_v2, %s4927_s29  ;;  %v1402_v2 = vld [vmem:[#allocation2 + $0x60] sm:$0xff] }
 0x1f9   : > { %1284 = vrot.lane.b32.xlu1 %v5592_v58, %s4926_s28  ;;  %v7386_v58 = vld [vmem:[#allocation54_spill] sm:$0xff] }
 0x1fa   : > { %v1130_v7 = vpop.permute.xlu0 %1129 }
 0x1fb   : > { %v915_v20 = vpop.permute.xlu1 %914  ;;  %1199 = vst.msk [vmem:[#allocation4 + $0xd8] sm:$0xff] %vm1171_vm6, %v1130_v7 }
 0x1fc   : > { %995 = vst.msk [vmem:[#allocation4 + $0x80] sm:$0xff] %vm978_vm5, %v915_v20  ;;  %1504 = vrot.lane.b32.xlu0 %v7385_v53, %s4927_s29  ;;  %v1606_v20 = vld [vmem:[#allocation2 + $0xe1] sm:$0xff] }
 0x1fd   : > { %1288 = vrot.lane.b32.xlu1 %v5599_v36, %s4926_s28  ;;  %v7388_v36 = vld [vmem:[#allocation45_spill] sm:$0xff] }
 0x1fe   : > { %v1134_v38 = vpop.permute.xlu0 %1133 }
 0x1ff   : > { %v919_v9 = vpop.permute.xlu1 %918  ;;  %1201 = vst.msk [vmem:[#allocation4 + $0xe8] sm:$0xff] %vm1171_vm6, %v1134_v38  ;;  %v1784_v38 = vld [vmem:[#allocation2 + $0x32] sm:$0xff] }
 0x200   : > { %997 = vst.msk [vmem:[#allocation4 + $0x90] sm:$0xff] %vm978_vm5, %v919_v9  ;;  %1508 = vrot.lane.b32.xlu0 %v7387_v12, %s4927_s29  ;;  %v1404_v9 = vld [vmem:[#allocation2 + $0x78] sm:$0xff] }
 0x201   : > { %1292 = vrot.lane.b32.xlu1 %v7386_v58, %s4926_s28 }
 0x202   : > { %v1138_v14 = vpop.permute.xlu0 %1137 }
 0x203   : > { %v923_v23 = vpop.permute.xlu1 %922  ;;  %1203 = vst.msk [vmem:[#allocation4 + $0xf8] sm:$0xff] %vm1171_vm6, %v1138_v14  ;;  %v1786_v14 = vld [vmem:[#allocation2 + $0x4a] sm:$0xff] }
 0x204   : > { %999 = vst.msk [vmem:[#allocation4 + $0xa0] sm:$0xff] %vm978_vm5, %v923_v23  ;;  %1512 = vrot.lane.b32.xlu0 %v7388_v36, %s4927_s29  ;;  %v1406_v23 = vld [vmem:[#allocation2 + $0x90] sm:$0xff] }
 0x205   : > { %1296 = vrot.lane.b32.xlu1 %v5613_v3, %s4926_s28  ;;  %v7391_v3 = vld [vmem:[#allocation56_spill] sm:$0xff] }
 0x206   : > { %v1271_v10 = vpop.permute.xlu0 %1270 }
 0x207   : > { %v927_v32 = vpop.permute.xlu1 %926  ;;  %1366 = vst.msk [vmem:[#allocation4 + $0x8] sm:$0xff] %vm1364_vm7, %v1271_v10  ;;  %v1408_v10 = vld [vmem:[#allocation2 + $0xa8] sm:$0xff] }
 0x208   : > { %1001 = vst.msk [vmem:[#allocation4 + $0xb0] sm:$0xff] %vm978_vm5, %v927_v32  ;;  %1516 = vrot.lane.b32.xlu0 %v7390_v16, %s4927_s29 }
 0x209   : > { %1300 = vrot.lane.b32.xlu1 %v7389_v5, %s4926_s28  ;;  %v1788_v5 = vld [vmem:[#allocation2 + $0x62] sm:$0xff] }
 0x20a   : > { %v1275_v48 = vpop.permute.xlu0 %1274 }
 0x20b   : > { %v931_v18 = vpop.permute.xlu1 %930  ;;  %1368 = vst.msk [vmem:[#allocation4 + $0x18] sm:$0xff] %vm1364_vm7, %v1275_v48  ;;  %v1410_v48 = vld [vmem:[#allocation2 + $0xc0] sm:$0xff] }
 0x20c   : > { %1003 = vst.msk [vmem:[#allocation4 + $0xc0] sm:$0xff] %vm978_vm5, %v931_v18  ;;  %1520 = vrot.lane.b32.xlu0 %v7391_v3, %s4927_s29  ;;  %v1790_v3 = vld [vmem:[#allocation2 + $0x7a] sm:$0xff] }
 0x20d   : > { %1304 = vrot.lane.b32.xlu1 %v5630_v17, %s4926_s28  ;;  %v1592_v17 = vld [vmem:[#allocation2 + $0x39] sm:$0xff] }
 0x20e   : > { %v1279_v59 = vpop.permute.xlu0 %1278 }
 0x20f   : > { %v935_v22 = vpop.permute.xlu1 %934  ;;  %1370 = vst.msk [vmem:[#allocation4 + $0x28] sm:$0xff] %vm1364_vm7, %v1279_v59  ;;  %v1412_v59 = vld [vmem:[#allocation2 + $0xd8] sm:$0xff] }
 0x210   : > { %1005 = vst.msk [vmem:[#allocation4 + $0xd0] sm:$0xff] %vm978_vm5, %v935_v22  ;;  %1524 = vrot.lane.b32.xlu0 %v1429_v33, %s4927_s29 }
 0x211   : > { %1308 = vrot.lane.b32.xlu1 %v5638_v47, %s4926_s28  ;;  %v1594_v47 = vld [vmem:[#allocation2 + $0x51] sm:$0xff] }
 0x212   : > { %v1283_v28 = vpop.permute.xlu0 %1282 }
 0x213   : > { %v939_v39 = vpop.permute.xlu1 %938  ;;  %1372 = vst.msk [vmem:[#allocation4 + $0x38] sm:$0xff] %vm1364_vm7, %v1283_v28 }
 0x214   : > { %1007 = vst.msk [vmem:[#allocation4 + $0xe0] sm:$0xff] %vm978_vm5, %v939_v39  ;;  %1657 = vrot.lane.b32.xlu0 %v1592_v17, %s4928_s30  ;;  %v1792_v39 = vld [vmem:[#allocation2 + $0x92] sm:$0xff] }
 0x215   : > { %1312 = vrot.lane.b32.xlu1 %v5646_v24, %s4926_s28  ;;  %v1596_v24 = vld [vmem:[#allocation2 + $0x69] sm:$0xff] }
 0x216   : > { %v1287_v13 = vpop.permute.xlu0 %1286 }
 0x217   : > { %v943_v29 = vpop.permute.xlu1 %942  ;;  %1374 = vst.msk [vmem:[#allocation4 + $0x48] sm:$0xff] %vm1364_vm7, %v1287_v13 }
 0x218   : > { %1009 = vst.msk [vmem:[#allocation4 + $0xf0] sm:$0xff] %vm978_vm5, %v943_v29  ;;  %1661 = vrot.lane.b32.xlu0 %v1594_v47, %s4928_s30  ;;  %v1794_v29 = vld [vmem:[#allocation2 + $0xaa] sm:$0xff] }
 0x219   : > { %1316 = vrot.lane.b32.xlu1 %v5654_v15, %s4926_s28  ;;  %v1598_v15 = vld [vmem:[#allocation2 + $0x81] sm:$0xff] }
 0x21a   : > { %v1291_v60 = vpop.permute.xlu0 %1290 }
 0x21b   : > { %v1076_v34 = vpop.permute.xlu1 %1075  ;;  %1376 = vst.msk [vmem:[#allocation4 + $0x58] sm:$0xff] %vm1364_vm7, %v1291_v60 }
 0x21c   : > { %1172 = vst.msk [vmem:[#allocation4] sm:$0xff] %vm1171_vm6, %v1076_v34  ;;  %1665 = vrot.lane.b32.xlu0 %v1596_v24, %s4928_s30  ;;  %v1796_v34 = vld [vmem:[#allocation2 + $0xc2] sm:$0xff] }
 0x21d   : > { %1320 = vrot.lane.b32.xlu1 %v5662_v21, %s4926_s28  ;;  %v5973_v21 = vld [vmem:[#allocation2 + $0x182] sm:$0xff] }
 0x21e   : > { %v1295_v25 = vpop.permute.xlu0 %1294 }
 0x21f   : > { %v1080_v40 = vpop.permute.xlu1 %1079  ;;  %1378 = vst.msk [vmem:[#allocation4 + $0x68] sm:$0xff] %vm1364_vm7, %v1295_v25 }
 0x220   : > { %1174 = vst.msk [vmem:[#allocation4 + $0x10] sm:$0xff] %vm1171_vm6, %v1080_v40  ;;  %1669 = vrot.lane.b32.xlu0 %v1598_v15, %s4928_s30 }
 0x221   : > { %1324 = vrot.lane.b32.xlu1 %v5670_v27, %s4926_s28  ;;  %v1398_v27 = vld [vmem:[#allocation2 + $0x30] sm:$0xff] }
 0x222   : > { %v1299_v46 = vpop.permute.xlu0 %1298 }
 0x223   : > { %v1084_v51 = vpop.permute.xlu1 %1083  ;;  %1380 = vst.msk [vmem:[#allocation4 + $0x78] sm:$0xff] %vm1364_vm7, %v1299_v46 }
 0x224   : > { %1176 = vst.msk [vmem:[#allocation4 + $0x20] sm:$0xff] %vm1171_vm6, %v1084_v51  ;;  %1673 = vrot.lane.b32.xlu0 %v1600_v31, %s4928_s30 }
 0x225   : > { %1328 = vrot.lane.b32.xlu1 %v5973_v21, %s4926_s28 }
 0x226   : > { %v1303_v57 = vpop.permute.xlu0 %1302 }
 0x227   : > { %v1088_v37 = vpop.permute.xlu1 %1087  ;;  %1382 = vst.msk [vmem:[#allocation4 + $0x88] sm:$0xff] %vm1364_vm7, %v1303_v57 }
 0x228   : > { %1178 = vst.msk [vmem:[#allocation4 + $0x30] sm:$0xff] %vm1171_vm6, %v1088_v37  ;;  %1677 = vrot.lane.b32.xlu0 %v1602_v52, %s4928_s30 }
 0x229   : > { %1462 = vrot.lane.b32.xlu1 %v1398_v27, %s4927_s29  ;;  %v1428_v27 = vld [vmem:[#allocation2 + $0x198] sm:$0xff] }
 0x22a   : > { %v1307_v1 = vpop.permute.xlu0 %1306 }
 0x22b   : > { %v1092_v43 = vpop.permute.xlu1 %1091  ;;  %1384 = vst.msk [vmem:[#allocation4 + $0x98] sm:$0xff] %vm1364_vm7, %v1307_v1 }
 0x22c   : > { %1180 = vst.msk [vmem:[#allocation4 + $0x40] sm:$0xff] %vm1171_vm6, %v1092_v43  ;;  %1681 = vrot.lane.b32.xlu0 %v1604_v50, %s4928_s30 }
 0x22d   : > { %1466 = vrot.lane.b32.xlu1 %v1400_v49, %s4927_s29 }
 0x22e   : > { %v1311_v62 = vpop.permute.xlu0 %1310 }
 0x22f   : > { %v1096_v55 = vpop.permute.xlu1 %1095  ;;  %1386 = vst.msk [vmem:[#allocation4 + $0xa8] sm:$0xff] %vm1364_vm7, %v1311_v62  ;;  %v1614_v62 = vld [vmem:[#allocation2 + $0x141] sm:$0xff] }
 0x230   : > { %1182 = vst.msk [vmem:[#allocation4 + $0x50] sm:$0xff] %vm1171_vm6, %v1096_v55  ;;  %1685 = vrot.lane.b32.xlu0 %v1606_v20, %s4928_s30 }
 0x231   : > { %1470 = vrot.lane.b32.xlu1 %v1402_v2, %s4927_s29 }
 0x232   : > { %v1315_v53 = vpop.permute.xlu0 %1314 }
 0x233   : > { %v1100_v7 = vpop.permute.xlu1 %1099  ;;  %1388 = vst.msk [vmem:[#allocation4 + $0xb8] sm:$0xff] %vm1364_vm7, %v1315_v53 }
 0x234   : > { %1184 = vst.msk [vmem:[#allocation4 + $0x60] sm:$0xff] %vm1171_vm6, %v1100_v7  ;;  %1848 = vrot.lane.b32.xlu0 %v1784_v38, %s4929_s6 }
 0x235   : > { %1474 = vrot.lane.b32.xlu1 %v1404_v9, %s4927_s29 }
 0x236   : > { %v1319_v12 = vpop.permute.xlu0 %1318 }
 0x237   : > { %v1104_v58 = vpop.permute.xlu1 %1103  ;;  %1390 = vst.msk [vmem:[#allocation4 + $0xc8] sm:$0xff] %vm1364_vm7, %v1319_v12 }
 0x238   : > { %1186 = vst.msk [vmem:[#allocation4 + $0x70] sm:$0xff] %vm1171_vm6, %v1104_v58  ;;  %1852 = vrot.lane.b32.xlu0 %v1786_v14, %s4929_s6  ;;  %v2010_v14 = vld [vmem:[%s7266_s1 + $0x8] sm:$0xff] }
 0x239   : > { %1478 = vrot.lane.b32.xlu1 %v1406_v23, %s4927_s29  ;;  %v2009_v23 = vld [vmem:[%s7266_s1] sm:$0xff] }
 0x23a   : > { %v1323_v32 = vpop.permute.xlu0 %1322 }
 0x23b   : > { %v1108_v36 = vpop.permute.xlu1 %1107  ;;  %1392 = vst.msk [vmem:[#allocation4 + $0xd8] sm:$0xff] %vm1364_vm7, %v1323_v32 }
 0x23c   : > { %1188 = vst.msk [vmem:[#allocation4 + $0x80] sm:$0xff] %vm1171_vm6, %v1108_v36  ;;  %1856 = vrot.lane.b32.xlu0 %v1788_v5, %s4929_s6  ;;  %v2011_v5 = vld [vmem:[%s7266_s1 + $0x10] sm:$0xff] }
 0x23d   : > { %1482 = vrot.lane.b32.xlu1 %v1408_v10, %s4927_s29  ;;  %v1811_v10 = vld [vmem:[#allocation2 + $0x172] sm:$0xff] }
 0x23e   : > { %v1327_v18 = vpop.permute.xlu0 %1326 }
 0x23f   : > { %v1112_v16 = vpop.permute.xlu1 %1111  ;;  %1394 = vst.msk [vmem:[#allocation4 + $0xe8] sm:$0xff] %vm1364_vm7, %v1327_v18 }
 0x240   : > { %1190 = vst.msk [vmem:[#allocation4 + $0x90] sm:$0xff] %vm1171_vm6, %v1112_v16  ;;  %1860 = vrot.lane.b32.xlu0 %v1790_v3, %s4929_s6  ;;  %v1605_v3 = vld [vmem:[#allocation2 + $0xd9] sm:$0xff] }
 0x241   : > { %1486 = vrot.lane.b32.xlu1 %v1410_v48, %s4927_s29 }
 0x242   : > { %v1331_v22 = vpop.permute.xlu0 %1330 }
 0x243   : > { %v1116_v33 = vpop.permute.xlu1 %1115  ;;  %1396 = vst.msk [vmem:[#allocation4 + $0xf8] sm:$0xff] %vm1364_vm7, %v1331_v22 }
 0x244   : > { %1192 = vst.msk [vmem:[#allocation4 + $0xa0] sm:$0xff] %vm1171_vm6, %v1116_v33  ;;  %1864 = vrot.lane.b32.xlu0 %v1792_v39, %s4929_s6  ;;  %v2013_v33 = vld [vmem:[%s7266_s1 + $0x20] sm:$0xf] }
 0x245   : > { %1490 = vrot.lane.b32.xlu1 %v1412_v59, %s4927_s29  ;;  %v1607_v59 = vld [vmem:[#allocation2 + $0xf1] sm:$0xff] }
 0x246   : > { %v1465_v17 = vpop.permute.xlu0 %1464 }
 0x247   : > { %v1120_v28 = vpop.permute.xlu1 %1119  ;;  %1560 = vst.msk [vmem:[#allocation4 + $0x8] sm:$0xff] %vm1558_vm8, %v1465_v17 }
 0x248   : > { %1194 = vst.msk [vmem:[#allocation4 + $0xb0] sm:$0xff] %vm1171_vm6, %v1120_v28  ;;  %1868 = vrot.lane.b32.xlu0 %v1794_v29, %s4929_s6 }
 0x249   : > { %1494 = vrot.lane.b32.xlu1 %v5352_v6, %s4927_s29  ;;  %v1798_v6 = vld [vmem:[#allocation2 + $0xda] sm:$0xff] }
 0x24a   : > { %v1469_v47 = vpop.permute.xlu0 %1468 }
 0x24b   : > { %v1124_v13 = vpop.permute.xlu1 %1123  ;;  %1562 = vst.msk [vmem:[#allocation4 + $0x18] sm:$0xff] %vm1558_vm8, %v1469_v47 }
 0x24c   : > { %1196 = vst.msk [vmem:[#allocation4 + $0xc0] sm:$0xff] %vm1171_vm6, %v1124_v13  ;;  %1872 = vrot.lane.b32.xlu0 %v1796_v34, %s4929_s6  ;;  %v1787_v13 = vld [vmem:[#allocation2 + $0x52] sm:$0xff]  ;;  %v1789_v34 = vld [vmem:[#allocation2 + $0x6a] sm:$0xff] }
 0x24d   : > { %1498 = vrot.lane.b32.xlu1 %v5384_v42, %s4927_s29  ;;  %v1608_v42 = vld [vmem:[#allocation2 + $0xf9] sm:$0xff] }
 0x24e   : > { %v1473_v24 = vpop.permute.xlu0 %1472 }
 0x24f   : > { %v1128_v60 = vpop.permute.xlu1 %1127  ;;  %1564 = vst.msk [vmem:[#allocation4 + $0x28] sm:$0xff] %vm1558_vm8, %v1473_v24 }
 0x250   : > { %1198 = vst.msk [vmem:[#allocation4 + $0xd0] sm:$0xff] %vm1171_vm6, %v1128_v60  ;;  %1876 = vrot.lane.b32.xlu0 %v1798_v6, %s4929_s6  ;;  %v1791_v6 = vld [vmem:[#allocation2 + $0x82] sm:$0xff] }
 0x251   : > { %1502 = vrot.lane.b32.xlu1 %v5416_v56, %s4927_s29  ;;  %v1801_v56 = vld [vmem:[#allocation2 + $0xfa] sm:$0xff] }
 0x252   : > { %v1477_v25 = vpop.permute.xlu0 %1476 }
 0x253   : > { %v1132_v40 = vpop.permute.xlu1 %1131  ;;  %1566 = vst.msk [vmem:[#allocation4 + $0x38] sm:$0xff] %vm1558_vm8, %v1477_v25 }
 0x254   : > { %1200 = vst.msk [vmem:[#allocation4 + $0xe0] sm:$0xff] %vm1171_vm6, %v1132_v40  ;;  %1689 = vrot.lane.b32.xlu0 %v1608_v42, %s4928_s30  ;;  %v1793_v42 = vld [vmem:[#allocation2 + $0x9a] sm:$0xff] }
 0x255   : > { %1506 = vrot.lane.b32.xlu1 %v5446_v41, %s4927_s29  ;;  %v1610_v41 = vld [vmem:[#allocation2 + $0x111] sm:$0xff] }
 0x256   : > { %v1481_v51 = vpop.permute.xlu0 %1480 }
 0x257   : > { %v1136_v15 = vpop.permute.xlu1 %1135  ;;  %1568 = vst.msk [vmem:[#allocation4 + $0x48] sm:$0xff] %vm1558_vm8, %v1481_v51 }
 0x258   : > { %1202 = vst.msk [vmem:[#allocation4 + $0xf0] sm:$0xff] %vm1171_vm6, %v1136_v15  ;;  %1882 = vrot.lane.b32.xlu0 %v1801_v56, %s4929_s6  ;;  %v1795_v56 = vld [vmem:[#allocation2 + $0xb2] sm:$0xff] }
 0x259   : > { %1510 = vrot.lane.b32.xlu1 %v5474_v26, %s4927_s29  ;;  %v1803_v26 = vld [vmem:[#allocation2 + $0x112] sm:$0xff] }
 0x25a   : > { %v1485_v31 = vpop.permute.xlu0 %1484 }
 0x25b   : > { %v1269_v46 = vpop.permute.xlu1 %1268  ;;  %1570 = vst.msk [vmem:[#allocation4 + $0x58] sm:$0xff] %vm1558_vm8, %v1485_v31 }
 0x25c   : > { %1365 = vst.msk [vmem:[#allocation4] sm:$0xff] %vm1364_vm7, %v1269_v46  ;;  %1693 = vrot.lane.b32.xlu0 %v1610_v41, %s4928_s30  ;;  %v1797_v41 = vld [vmem:[#allocation2 + $0xca] sm:$0xff] }
 0x25d   : > { %1514 = vrot.lane.b32.xlu1 %v5502_v11, %s4927_s29  ;;  %v1612_v11 = vld [vmem:[#allocation2 + $0x129] sm:$0xff] }
 0x25e   : > { %v1489_v57 = vpop.permute.xlu0 %1488 }
 0x25f   : > { %v1273_v37 = vpop.permute.xlu1 %1272  ;;  %1572 = vst.msk [vmem:[#allocation4 + $0x68] sm:$0xff] %vm1558_vm8, %v1489_v57 }
 0x260   : > { %1367 = vst.msk [vmem:[#allocation4 + $0x10] sm:$0xff] %vm1364_vm7, %v1273_v37  ;;  %1886 = vrot.lane.b32.xlu0 %v1803_v26, %s4929_s6  ;;  %v1799_v26 = vld [vmem:[#allocation2 + $0xe2] sm:$0xff] }
 0x261   : > { %1518 = vrot.lane.b32.xlu1 %v5765_v44, %s4927_s29  ;;  %v1805_v44 = vld [vmem:[#allocation2 + $0x12a] sm:$0xff] }
 0x262   : > { %v1493_v43 = vpop.permute.xlu0 %1492 }
 0x263   : > { %v1277_v52 = vpop.permute.xlu1 %1276  ;;  %1574 = vst.msk [vmem:[#allocation4 + $0x78] sm:$0xff] %vm1558_vm8, %v1493_v43  ;;  %v1800_v43 = vld [vmem:[#allocation2 + $0xf2] sm:$0xff] }
 0x264   : > { %1369 = vst.msk [vmem:[#allocation4 + $0x20] sm:$0xff] %vm1364_vm7, %v1277_v52  ;;  %1697 = vrot.lane.b32.xlu0 %v1612_v11, %s4928_s30 }
 0x265   : > { %1522 = vrot.lane.b32.xlu1 %v1428_v27, %s4927_s29 }
 0x266   : > { %v1497_v49 = vpop.permute.xlu0 %1496 }
 0x267   : > { %v1281_v1 = vpop.permute.xlu1 %1280  ;;  %1576 = vst.msk [vmem:[#allocation4 + $0x88] sm:$0xff] %vm1558_vm8, %v1497_v49  ;;  %v1609_v49 = vld [vmem:[#allocation2 + $0x109] sm:$0xff] }
 0x268   : > { %1371 = vst.msk [vmem:[#allocation4 + $0x30] sm:$0xff] %vm1364_vm7, %v1281_v1  ;;  %1890 = vrot.lane.b32.xlu0 %v1805_v44, %s4929_s6 }
 0x269   : > { %1655 = vrot.lane.b32.xlu1 %v5779_v19, %s4928_s30  ;;  %v1807_v19 = vld [vmem:[#allocation2 + $0x142] sm:$0xff] }
 0x26a   : > { %v1501_v55 = vpop.permute.xlu0 %1500 }
 0x26b   : > { %v1285_v50 = vpop.permute.xlu1 %1284  ;;  %1578 = vst.msk [vmem:[#allocation4 + $0x98] sm:$0xff] %vm1558_vm8, %v1501_v55  ;;  %v1802_v55 = vld [vmem:[#allocation2 + $0x10a] sm:$0xff] }
 0x26c   : > { %1373 = vst.msk [vmem:[#allocation4 + $0x40] sm:$0xff] %vm1364_vm7, %v1285_v50  ;;  %1701 = vrot.lane.b32.xlu0 %v1614_v62, %s4928_s30 }
 0x26d   : > { %1659 = vrot.lane.b32.xlu1 %v5788_v0, %s4928_s30  ;;  %v1616_v0 = vld [vmem:[#allocation2 + $0x159] sm:$0xff] }
 0x26e   : > { %v1505_v20 = vpop.permute.xlu0 %1504 }
 0x26f   : > { %v1289_v2 = vpop.permute.xlu1 %1288  ;;  %1580 = vst.msk [vmem:[#allocation4 + $0xa8] sm:$0xff] %vm1558_vm8, %v1505_v20  ;;  %v1611_v20 = vld [vmem:[#allocation2 + $0x121] sm:$0xff] }
 0x270   : > { %1375 = vst.msk [vmem:[#allocation4 + $0x50] sm:$0xff] %vm1364_vm7, %v1289_v2  ;;  %1894 = vrot.lane.b32.xlu0 %v1807_v19, %s4929_s6 }
 0x271   : > { %1663 = vrot.lane.b32.xlu1 %v5796_v4, %s4928_s30  ;;  %v1809_v4 = vld [vmem:[#allocation2 + $0x15a] sm:$0xff] }
 0x272   : > { %v1509_v53 = vpop.permute.xlu0 %1508 }
 0x273   : > { %v1293_v7 = vpop.permute.xlu1 %1292  ;;  %1582 = vst.msk [vmem:[#allocation4 + $0xb8] sm:$0xff] %vm1558_vm8, %v1509_v53  ;;  %v1804_v53 = vld [vmem:[#allocation2 + $0x122] sm:$0xff] }
 0x274   : > { %1377 = vst.msk [vmem:[#allocation4 + $0x60] sm:$0xff] %vm1364_vm7, %v1293_v7  ;;  %1705 = vrot.lane.b32.xlu0 %v1616_v0, %s4928_s30 }
 0x275   : > { %1667 = vrot.lane.b32.xlu1 %v5804_v8, %s4928_s30  ;;  %v1618_v8 = vld [vmem:[#allocation2 + $0x171] sm:$0xff] }
 0x276   : > { %v1513_v38 = vpop.permute.xlu0 %1512 }
 0x277   : > { %v1297_v9 = vpop.permute.xlu1 %1296  ;;  %1584 = vst.msk [vmem:[#allocation4 + $0xc8] sm:$0xff] %vm1558_vm8, %v1513_v38  ;;  %v1613_v38 = vld [vmem:[#allocation2 + $0x139] sm:$0xff] }
 0x278   : > { %1379 = vst.msk [vmem:[#allocation4 + $0x70] sm:$0xff] %vm1364_vm7, %v1297_v9  ;;  %1898 = vrot.lane.b32.xlu0 %v1809_v4, %s4929_s6 }
 0x279   : > { %1671 = vrot.lane.b32.xlu1 %v5812_v30, %s4928_s30  ;;  %v4879_v30 = vpack.c.bf16 %v2010_v14, %v2009_v23  ;;  %v1615_v14 = vld [vmem:[#allocation2 + $0x151] sm:$0xff] }
 0x27a   : > { %v1517_v12 = vpop.permute.xlu0 %1516 }
 0x27b   : > { %v1301_v58 = vpop.permute.xlu1 %1300  ;;  %1586 = vst.msk [vmem:[#allocation4 + $0xd8] sm:$0xff] %vm1558_vm8, %v1517_v12  ;;  %4880 = vmatprep.subr.bf16.mxu0 %v4879_v30  ;;  %v1806_v12 = vld [vmem:[#allocation2 + $0x13a] sm:$0xff] }
 0x27c   : > { %1381 = vst.msk [vmem:[#allocation4 + $0x80] sm:$0xff] %vm1364_vm7, %v1301_v58  ;;  %1709 = vrot.lane.b32.xlu0 %v1618_v8, %s4928_s30  ;;  %4882 = vmatpush3.bf16.msra.mxu0 %v4879_v30 }
 0x27d   : > { %1675 = vrot.lane.b32.xlu1 %v5820_v54, %s4928_s30  ;;  %v2012_v54 = vld [vmem:[%s7266_s1 + $0x18] sm:$0xff] }
 0x27e   : > { %v1521_v32 = vpop.permute.xlu0 %1520  ;;  %v4883_v16 = vpack.c.bf16 %v2012_v54, %v2011_v5  ;;  %v1617_v54 = vld [vmem:[#allocation2 + $0x169] sm:$0xff] }
 0x27f   : > { %v1305_v36 = vpop.permute.xlu1 %1304  ;;  %1588 = vst.msk [vmem:[#allocation4 + $0xe8] sm:$0xff] %vm1558_vm8, %v1521_v32  ;;  %v1808_v32 = vld [vmem:[#allocation2 + $0x152] sm:$0xff] }
 0x280   : > { %1383 = vst.msk [vmem:[#allocation4 + $0x90] sm:$0xff] %vm1364_vm7, %v1305_v36  ;;  %1902 = vrot.lane.b32.xlu0 %v1811_v10, %s4929_s6  ;;  %4884 = vmatprep.subr.bf16.mxu0 %v4883_v16 }
 0x281   : > { %1679 = vrot.lane.b32.xlu1 %v5828_v63, %s4928_s30  ;;  %4886 = vmatpush3.bf16.msra.mxu0 %v4883_v16 }
 0x282   : > { %v1525_v48 = vpop.permute.xlu0 %1524  ;;  %4771 = vmatprep.subr.msk.mxu0 %vm2118_vm9, %v2013_v33 }
 0x283   : > { %v1309_v18 = vpop.permute.xlu1 %1308  ;;  %1590 = vst.msk [vmem:[#allocation4 + $0xf8] sm:$0xff] %vm1558_vm8, %v1525_v48  ;;  %v1810_v48 = vld [vmem:[#allocation2 + $0x16a] sm:$0xff] }
 0x284   : > { %1385 = vst.msk [vmem:[#allocation4 + $0xa0] sm:$0xff] %vm1364_vm7, %v1309_v18  ;;  %1713 = vrot.lane.b32.xlu0 %v5732_v35, %s4928_s30  ;;  %v1785_v35 = vld [vmem:[#allocation2 + $0x3a] sm:$0xff] }
 0x285   : > { %1683 = vrot.lane.b32.xlu1 %v1605_v3, %s4928_s30  ;;  %4772 = vmatpush3.msk.msra.mxu0 %vm2118_vm9, %v2013_v33 }
 0x286   : > { %v1658_v22 = vpop.permute.xlu0 %1657 }
 0x287   : > { %v1313_v63 = vpop.permute.xlu1 %1312  ;;  %1753 = vst.msk [vmem:[#allocation4 + $0x8] sm:$0xff] %vm1751_vm10, %v1658_v22  ;;  %v1815_v22 = vld [vmem:[#allocation2 + $0x1a2] sm:$0xff] }
 0x288   : > { %1387 = vst.msk [vmem:[#allocation4 + $0xb0] sm:$0xff] %vm1364_vm7, %v1313_v63  ;;  %1906 = vrot.lane.b32.xlu0 %v5848_v61, %s4929_s6  ;;  %v1622_v63 = vld [vmem:[#allocation2 + $0x1a1] sm:$0xff] }
 0x289   : > { %1687 = vrot.lane.b32.xlu1 %v1607_v59, %s4928_s30 }
 0x28a   : > { %v1662_v28 = vpop.permute.xlu0 %1661 }
 0x28b   : > { %v1317_v39 = vpop.permute.xlu1 %1316  ;;  %1755 = vst.msk [vmem:[#allocation4 + $0x18] sm:$0xff] %vm1751_vm10, %v1662_v28  ;;  %v1621_v28 = vld [vmem:[#allocation2 + $0x199] sm:$0xff] }
 0x28c   : > { %1389 = vst.msk [vmem:[#allocation4 + $0xc0] sm:$0xff] %vm1364_vm7, %v1317_v39  ;;  %1717 = vrot.lane.b32.xlu0 %v1622_v63, %s4928_s30 }
 0x28d   : > { %1850 = vrot.lane.b32.xlu1 %v1785_v35, %s4929_s6 }
 0x28e   : > { %v1666_v29 = vpop.permute.xlu0 %1665 }
 0x28f   : > { %v1321_v17 = vpop.permute.xlu1 %1320  ;;  %1757 = vst.msk [vmem:[#allocation4 + $0x28] sm:$0xff] %vm1751_vm10, %v1666_v29 }
 0x290   : > { %1391 = vst.msk [vmem:[#allocation4 + $0xd0] sm:$0xff] %vm1364_vm7, %v1321_v17  ;;  %1910 = vrot.lane.b32.xlu0 %v1815_v22, %s4929_s6  ;;  %v1814_v17 = vld [vmem:[#allocation2 + $0x19a] sm:$0xff] }
 0x291   : > { %1854 = vrot.lane.b32.xlu1 %v1787_v13, %s4929_s6 }
 0x292   : > { %v1670_v61 = vpop.permute.xlu0 %1669 }
 0x293   : > { %v1325_v47 = vpop.permute.xlu1 %1324  ;;  %1759 = vst.msk [vmem:[#allocation4 + $0x38] sm:$0xff] %vm1751_vm10, %v1670_v61 }
 0x294   : > { %1393 = vst.msk [vmem:[#allocation4 + $0xe0] sm:$0xff] %vm1364_vm7, %v1325_v47 }
 0x295   : > { %1858 = vrot.lane.b32.xlu1 %v1789_v34, %s4929_s6 }
 0x296   : > { %v1674_v24 = vpop.permute.xlu0 %1673 }
 0x297   : > { %v1329_v60 = vpop.permute.xlu1 %1328  ;;  %1761 = vst.msk [vmem:[#allocation4 + $0x48] sm:$0xff] %vm1751_vm10, %v1674_v24 }
 0x298   : > { %1395 = vst.msk [vmem:[#allocation4 + $0xf0] sm:$0xff] %vm1364_vm7, %v1329_v60 }
 0x299   : > { %1862 = vrot.lane.b32.xlu1 %v1791_v6, %s4929_s6 }
 0x29a   : > { %v1678_v25 = vpop.permute.xlu0 %1677 }
 0x29b   : > { %v1463_v40 = vpop.permute.xlu1 %1462  ;;  %1763 = vst.msk [vmem:[#allocation4 + $0x58] sm:$0xff] %vm1751_vm10, %v1678_v25 }
 0x29c   : > { %1559 = vst.msk [vmem:[#allocation4] sm:$0xff] %vm1558_vm8, %v1463_v40 }
 0x29d   : > { %1866 = vrot.lane.b32.xlu1 %v1793_v42, %s4929_s6 }
 0x29e   : > { %v1682_v51 = vpop.permute.xlu0 %1681 }
 0x29f   : > { %v1467_v15 = vpop.permute.xlu1 %1466  ;;  %1765 = vst.msk [vmem:[#allocation4 + $0x68] sm:$0xff] %vm1751_vm10, %v1682_v51 }
 0x2a0   : > { %1561 = vst.msk [vmem:[#allocation4 + $0x10] sm:$0xff] %vm1558_vm8, %v1467_v15 }
 0x2a1   : > { %1870 = vrot.lane.b32.xlu1 %v1795_v56, %s4929_s6 }
 0x2a2   : > { %v1686_v31 = vpop.permute.xlu0 %1685 }
 0x2a3   : > { %v1471_v46 = vpop.permute.xlu1 %1470  ;;  %1767 = vst.msk [vmem:[#allocation4 + $0x78] sm:$0xff] %vm1751_vm10, %v1686_v31 }
 0x2a4   : > { %1563 = vst.msk [vmem:[#allocation4 + $0x20] sm:$0xff] %vm1558_vm8, %v1471_v46 }
 0x2a5   : > { %1874 = vrot.lane.b32.xlu1 %v1797_v41, %s4929_s6 }
 0x2a6   : > { %v6132_v57 = vpop.permute.xlu0 %1848 }
 0x2a7   : > { %v1475_v37 = vpop.permute.xlu1 %1474 }
 0x2a8   : > { %1565 = vst.msk [vmem:[#allocation4 + $0x30] sm:$0xff] %vm1558_vm8, %v1475_v37 }
 0x2a9   : > { %1878 = vrot.lane.b32.xlu1 %v1799_v26, %s4929_s6 }
 0x2aa   : > { %v6136_v52 = vpop.permute.xlu0 %1852 }
 0x2ab   : > { %v1479_v27 = vpop.permute.xlu1 %1478 }
 0x2ac   : > { %1567 = vst.msk [vmem:[#allocation4 + $0x40] sm:$0xff] %vm1558_vm8, %v1479_v27 }
 0x2ad   : > { %1880 = vrot.lane.b32.xlu1 %v1800_v43, %s4929_s6 }
 0x2ae   : > { %v6140_v1 = vpop.permute.xlu0 %1856 }
 0x2af   : > { %v1483_v11 = vpop.permute.xlu1 %1482 }
 0x2b0   : > { %1569 = vst.msk [vmem:[#allocation4 + $0x50] sm:$0xff] %vm1558_vm8, %v1483_v11 }
 0x2b1   : > { %1691 = vrot.lane.b32.xlu1 %v1609_v49, %s4928_s30 }
 0x2b2   : > { %v6144_v50 = vpop.permute.xlu0 %1860 }
 0x2b3   : > { %v1487_v44 = vpop.permute.xlu1 %1486 }
 0x2b4   : > { %1571 = vst.msk [vmem:[#allocation4 + $0x60] sm:$0xff] %vm1558_vm8, %v1487_v44 }
 0x2b5   : > { %1884 = vrot.lane.b32.xlu1 %v1802_v55, %s4929_s6 }
 0x2b6   : > { %v6148_v2 = vpop.permute.xlu0 %1864 }
 0x2b7   : > { %v1491_v62 = vpop.permute.xlu1 %1490 }
 0x2b8   : > { %1573 = vst.msk [vmem:[#allocation4 + $0x70] sm:$0xff] %vm1558_vm8, %v1491_v62 }
 0x2b9   : > { %1695 = vrot.lane.b32.xlu1 %v1611_v20, %s4928_s30 }
 0x2ba   : > { %v6152_v7 = vpop.permute.xlu0 %1868 }
 0x2bb   : > { %v1495_v19 = vpop.permute.xlu1 %1494 }
 0x2bc   : > { %1575 = vst.msk [vmem:[#allocation4 + $0x80] sm:$0xff] %vm1558_vm8, %v1495_v19 }
 0x2bd   : > { %1888 = vrot.lane.b32.xlu1 %v1804_v53, %s4929_s6 }
 0x2be   : > { %v6156_v9 = vpop.permute.xlu0 %1872 }
 0x2bf   : > { %v1499_v0 = vpop.permute.xlu1 %1498 }
 0x2c0   : > { %1577 = vst.msk [vmem:[#allocation4 + $0x90] sm:$0xff] %vm1558_vm8, %v1499_v0 }
 0x2c1   : > { %1699 = vrot.lane.b32.xlu1 %v1613_v38, %s4928_s30 }
 0x2c2   : > { %v6160_v58 = vpop.permute.xlu0 %1876 }
 0x2c3   : > { %v1503_v4 = vpop.permute.xlu1 %1502 }
 0x2c4   : > { %1579 = vst.msk [vmem:[#allocation4 + $0xa0] sm:$0xff] %vm1558_vm8, %v1503_v4 }
 0x2c5   : > { %1892 = vrot.lane.b32.xlu1 %v1806_v12, %s4929_s6 }
 0x2c6   : > { %v1690_v23 = vpop.permute.xlu0 %1689 }
 0x2c7   : > { %v1507_v8 = vpop.permute.xlu1 %1506  ;;  %1769 = vst.msk [vmem:[#allocation4 + $0x88] sm:$0xff] %vm1751_vm10, %v1690_v23 }
 0x2c8   : > { %1581 = vst.msk [vmem:[#allocation4 + $0xb0] sm:$0xff] %vm1558_vm8, %v1507_v8 }
 0x2c9   : > { %1703 = vrot.lane.b32.xlu1 %v1615_v14, %s4928_s30 }
 0x2ca   : > { %v1883_v36 = vpop.permute.xlu0 %1882 }
 0x2cb   : > { %v1511_v30 = vpop.permute.xlu1 %1510  ;;  %1962 = vst.msk [vmem:[#allocation4 + $0x88] sm:$0xff] %vm1944_vm11, %v1883_v36 }
 0x2cc   : > { %1583 = vst.msk [vmem:[#allocation4 + $0xc0] sm:$0xff] %vm1558_vm8, %v1511_v30 }
 0x2cd   : > { %1896 = vrot.lane.b32.xlu1 %v1808_v32, %s4929_s6 }
 0x2ce   : > { %v1694_v5 = vpop.permute.xlu0 %1693 }
 0x2cf   : > { %v1515_v10 = vpop.permute.xlu1 %1514  ;;  %1771 = vst.msk [vmem:[#allocation4 + $0x98] sm:$0xff] %vm1751_vm10, %v1694_v5 }
 0x2d0   : > { %1585 = vst.msk [vmem:[#allocation4 + $0xd0] sm:$0xff] %vm1558_vm8, %v1515_v10 }
 0x2d1   : > { %1707 = vrot.lane.b32.xlu1 %v1617_v54, %s4928_s30 }
 0x2d2   : > { %v1887_v18 = vpop.permute.xlu0 %1886  ;;  %v1994_v8 = vld [vmem:[#allocation4 + $0x88] sm:$0xff] }
 0x2d3   : > { %v1519_v16 = vpop.permute.xlu1 %1518  ;;  %1964 = vst.msk [vmem:[#allocation4 + $0x98] sm:$0xff] %vm1944_vm11, %v1887_v18 }
 0x2d4   : > { %1587 = vst.msk [vmem:[#allocation4 + $0xe0] sm:$0xff] %vm1558_vm8, %v1519_v16 }
 0x2d5   : > { %1900 = vrot.lane.b32.xlu1 %v1810_v48, %s4929_s6 }
 0x2d6   : > { %v1698_v33 = vpop.permute.xlu0 %1697 }
 0x2d7   : > { %v1523_v3 = vpop.permute.xlu1 %1522  ;;  %1773 = vst.msk [vmem:[#allocation4 + $0xa8] sm:$0xff] %vm1751_vm10, %v1698_v33 }
 0x2d8   : > { %1589 = vst.msk [vmem:[#allocation4 + $0xf0] sm:$0xff] %vm1558_vm8, %v1523_v3 }
 0x2d9   : > { %1711 = vrot.lane.b32.xlu1 %v5880_v45, %s4928_s30 }
 0x2da   : > { %v1891_v39 = vpop.permute.xlu0 %1890  ;;  %v1996_v36 = vld [vmem:[#allocation4 + $0x98] sm:$0xff] }
 0x2db   : > { %v1656_v59 = vpop.permute.xlu1 %1655  ;;  %1966 = vst.msk [vmem:[#allocation4 + $0xa8] sm:$0xff] %vm1944_vm11, %v1891_v39 }
 0x2dc   : > { %1752 = vst.msk [vmem:[#allocation4] sm:$0xff] %vm1751_vm10, %v1656_v59 }
 0x2dd   : > { %1945 = vst.msk [vmem:[#allocation4] sm:$0xff] %vm1944_vm11, %v6132_v57  ;;  %1904 = vrot.lane.b32.xlu1 %v5973_v21, %s4929_s6 }
 0x2de   : > { %v1702_v45 = vpop.permute.xlu0 %1701 }
 0x2df   : > { %v1660_v35 = vpop.permute.xlu1 %1659  ;;  %1775 = vst.msk [vmem:[#allocation4 + $0xb8] sm:$0xff] %vm1751_vm10, %v1702_v45 }
 0x2e0   : > { %1754 = vst.msk [vmem:[#allocation4 + $0x10] sm:$0xff] %vm1751_vm10, %v1660_v35 }
 0x2e1   : > { %1947 = vst.msk [vmem:[#allocation4 + $0x10] sm:$0xff] %vm1944_vm11, %v6136_v52  ;;  %1715 = vrot.lane.b32.xlu1 %v1621_v28, %s4928_s30 }
 0x2e2   : > { %v1895_v13 = vpop.permute.xlu0 %1894  ;;  %v1998_v54 = vld [vmem:[#allocation4 + $0xa8] sm:$0xff] }
 0x2e3   : > { %v1664_v29 = vpop.permute.xlu1 %1663  ;;  %1968 = vst.msk [vmem:[#allocation4 + $0xb8] sm:$0xff] %vm1944_vm11, %v1895_v13 }
 0x2e4   : > { %1756 = vst.msk [vmem:[#allocation4 + $0x20] sm:$0xff] %vm1751_vm10, %v1664_v29  ;;  %v1977_v21 = vld [vmem:[#allocation4] sm:$0xff] }
 0x2e5   : > { %1949 = vst.msk [vmem:[#allocation4 + $0x20] sm:$0xff] %vm1944_vm11, %v6140_v1  ;;  %4773 = vmatprep.mubr.msk.f32.mxu0 %vm2021_vm12, %v1977_v21  ;;  %1908 = vrot.lane.b32.xlu1 %v1814_v17, %s4929_s6 }
 0x2e6   : > { %v1706_v61 = vpop.permute.xlu0 %1705 }
 0x2e7   : > { %v1668_v47 = vpop.permute.xlu1 %1667  ;;  %1777 = vst.msk [vmem:[#allocation4 + $0xc8] sm:$0xff] %vm1751_vm10, %v1706_v61 }
 0x2e8   : > { %1758 = vst.msk [vmem:[#allocation4 + $0x30] sm:$0xff] %vm1751_vm10, %v1668_v47  ;;  %v1979_v57 = vld [vmem:[#allocation4 + $0x10] sm:$0xff] }
 0x2e9   : > { %1951 = vst.msk [vmem:[#allocation4 + $0x30] sm:$0xff] %vm1944_vm11, %v6144_v50 }
 0x2ea   : > { %v1899_v60 = vpop.permute.xlu0 %1898  ;;  %v2000_v3 = vld [vmem:[#allocation4 + $0xb8] sm:$0xff] }
 0x2eb   : > { %v1672_v34 = vpop.permute.xlu1 %1671  ;;  %1970 = vst.msk [vmem:[#allocation4 + $0xc8] sm:$0xff] %vm1944_vm11, %v1899_v60 }
 0x2ec   : > { %1760 = vst.msk [vmem:[#allocation4 + $0x40] sm:$0xff] %vm1751_vm10, %v1672_v34  ;;  %v1981_v52 = vld [vmem:[#allocation4 + $0x20] sm:$0xff] }
 0x2ed   : > { %1953 = vst.msk [vmem:[#allocation4 + $0x40] sm:$0xff] %vm1944_vm11, %v6148_v2 }
 0x2ee   : > { %v1710_v6 = vpop.permute.xlu0 %1709 }
 0x2ef   : > { %v1676_v24 = vpop.permute.xlu1 %1675  ;;  %1779 = vst.msk [vmem:[#allocation4 + $0xd8] sm:$0xff] %vm1751_vm10, %v1710_v6  ;;  %v2515_v6 = vld [vmem:[#allocation3 + $0x1] sm:$0xff] }
 0x2f0   : > { %1762 = vst.msk [vmem:[#allocation4 + $0x50] sm:$0xff] %vm1751_vm10, %v1676_v24  ;;  %v1983_v1 = vld [vmem:[#allocation4 + $0x30] sm:$0xff]  ;;  %v2516_v24 = vld [vmem:[#allocation3 + $0x9] sm:$0xff]  ;;  %2579 = vrot.lane.b32.xlu1 %v2515_v6, %s4922_s24 }
 0x2f1   : > { %1955 = vst.msk [vmem:[#allocation4 + $0x50] sm:$0xff] %vm1944_vm11, %v6152_v7  ;;  %2581 = vrot.lane.b32.xlu0 %v2516_v24, %s4922_s24 }
 0x2f2   : > { %v1903_v25 = vpop.permute.xlu0 %1902  ;;  %v2002_v59 = vld [vmem:[#allocation4 + $0xc8] sm:$0xff] }
 0x2f3   : > { %v1680_v40 = vpop.permute.xlu1 %1679  ;;  %1972 = vst.msk [vmem:[#allocation4 + $0xd8] sm:$0xff] %vm1944_vm11, %v1903_v25  ;;  %v2451_v25 = vld [vmem:[#allocation3] sm:$0xff] }
 0x2f4   : > { %1764 = vst.msk [vmem:[#allocation4 + $0x60] sm:$0xff] %vm1751_vm10, %v1680_v40  ;;  %v1985_v50 = vld [vmem:[#allocation4 + $0x40] sm:$0xff]  ;;  %v2452_v40 = vld [vmem:[#allocation3 + $0x8] sm:$0xff] }
 0x2f5   : > { %1957 = vst.msk [vmem:[#allocation4 + $0x60] sm:$0xff] %vm1944_vm11, %v6156_v9 }
 0x2f6   : > { %v1714_v15 = vpop.permute.xlu0 %1713  ;;  %2484 = vst.msk [vmem:[#allocation5 + $0x8] sm:$0xff] %vm293_vm0, %v2452_v40  ;;  %2483 = vst.msk [vmem:[#allocation5] sm:$0xff] %vm293_vm0, %v2451_v25 }
 0x2f7   : > { %v1684_v42 = vpop.permute.xlu1 %1683  ;;  %1781 = vst.msk [vmem:[#allocation4 + $0xe8] sm:$0xff] %vm1751_vm10, %v1714_v15  ;;  %v6284_v15 = vld [vmem:[%s7267_s2] ss:$0 sm:$0xff] }
 0x2f8   : > { %1766 = vst.msk [vmem:[#allocation4 + $0x70] sm:$0xff] %vm1751_vm10, %v1684_v42  ;;  %v1987_v2 = vld [vmem:[#allocation4 + $0x50] sm:$0xff] }
 0x2f9   : > { %1959 = vst.msk [vmem:[#allocation4 + $0x70] sm:$0xff] %vm1944_vm11, %v6160_v58 }
 0x2fa   : > { %v1907_v56 = vpop.permute.xlu0 %1906  ;;  %v2004_v29 = vld [vmem:[#allocation4 + $0xd8] sm:$0xff] }
 0x2fb   : > { %v1688_v51 = vpop.permute.xlu1 %1687  ;;  %1974 = vst.msk [vmem:[#allocation4 + $0xe8] sm:$0xff] %vm1944_vm11, %v1907_v56 }
 0x2fc   : > { %1768 = vst.msk [vmem:[#allocation4 + $0x80] sm:$0xff] %vm1751_vm10, %v1688_v51  ;;  %v1989_v7 = vld [vmem:[#allocation4 + $0x60] sm:$0xff] }
 0x2fe   : > { %v1718_v28 = vpop.permute.xlu0 %1717 }
 0x2ff   : > { %v1851_v46 = vpop.permute.xlu1 %1850  ;;  %1783 = vst.msk [vmem:[#allocation4 + $0xf8] sm:$0xff] %vm1751_vm10, %v1718_v28 }
 0x300   : > { %1946 = vst.msk [vmem:[#allocation4 + $0x8] sm:$0xff] %vm1944_vm11, %v1851_v46  ;;  %v1991_v9 = vld [vmem:[#allocation4 + $0x70] sm:$0xff] }
 0x302   : > { %v1911_v17 = vpop.permute.xlu0 %1910  ;;  %v2006_v61 = vld [vmem:[#allocation4 + $0xe8] sm:$0xff] }
 0x303   : > { %v1855_v31 = vpop.permute.xlu1 %1854  ;;  %1976 = vst.msk [vmem:[#allocation4 + $0xf8] sm:$0xff] %vm1944_vm11, %v1911_v17 }
 0x304   : > { %1948 = vst.msk [vmem:[#allocation4 + $0x18] sm:$0xff] %vm1944_vm11, %v1855_v31 }
 0x307   : > { %v1859_v41 = vpop.permute.xlu1 %1858  ;;  %v1978_v37 = vld [vmem:[#allocation4 + $0x8] sm:$0xff] }
 0x308   : > { %1950 = vst.msk [vmem:[#allocation4 + $0x28] sm:$0xff] %vm1944_vm11, %v1859_v41  ;;  %4774 = vmatmul.mubr.msk.f32.vlgmr.msra.gmra.mrb[0].mxu0 %vm2021_vm12, %v1978_v37 }
 0x309   : > { %4776 = vmatprep.mubr.msk.f32.mxu0 %vm2021_vm12, %v1979_v57 }
 0x30a   : > { %v2008_v34 = vld [vmem:[#allocation4 + $0xf8] sm:$0xff] }
 0x30b   : > { %v1863_v26 = vpop.permute.xlu1 %1862  ;;  %v1980_v27 = vld [vmem:[#allocation4 + $0x18] sm:$0xff] }
 0x30c   : > { %1952 = vst.msk [vmem:[#allocation4 + $0x38] sm:$0xff] %vm1944_vm11, %v1863_v26  ;;  %4777 = vmatmul.mubr.msk.f32.gmra.mrb[2].mxu0 %vm2021_vm12, %v1980_v27 }
 0x30d   : > { %4779 = vmatprep.mubr.msk.f32.mxu0 %vm2021_vm12, %v1981_v52 }
 0x30f   : > { %v1867_v43 = vpop.permute.xlu1 %1866  ;;  %v1982_v11 = vld [vmem:[#allocation4 + $0x28] sm:$0xff] }
 0x310   : > { %1954 = vst.msk [vmem:[#allocation4 + $0x48] sm:$0xff] %vm1944_vm11, %v1867_v43  ;;  %4780 = vmatmul.mubr.msk.f32.gmra.mrb[4].mxu0 %vm2021_vm12, %v1982_v11 }
 0x311   : > { %4782 = vmatprep.mubr.msk.f32.mxu0 %vm2021_vm12, %v1983_v1 }
 0x313   : > { %v1871_v49 = vpop.permute.xlu1 %1870  ;;  %v1984_v44 = vld [vmem:[#allocation4 + $0x38] sm:$0xff] }
 0x314   : > { %1956 = vst.msk [vmem:[#allocation4 + $0x58] sm:$0xff] %vm1944_vm11, %v1871_v49  ;;  %4783 = vmatmul.mubr.msk.f32.gmra.mrb[6].mxu0 %vm2021_vm12, %v1984_v44 }
 0x315   : > { %4785 = vmatprep.mubr.msk.f32.mxu0 %vm2021_vm12, %v1985_v50 }
 0x317   : > { %v1875_v55 = vpop.permute.xlu1 %1874  ;;  %v1986_v62 = vld [vmem:[#allocation4 + $0x48] sm:$0xff] }
 0x318   : > { %1958 = vst.msk [vmem:[#allocation4 + $0x68] sm:$0xff] %vm1944_vm11, %v1875_v55  ;;  %4786 = vmatmul.mubr.msk.f32.gmra.mrb[8].mxu0 %vm2021_vm12, %v1986_v62 }
 0x319   : > { %4788 = vmatprep.mubr.msk.f32.mxu0 %vm2021_vm12, %v1987_v2 }
 0x31b   : > { %v1879_v20 = vpop.permute.xlu1 %1878  ;;  %v1988_v19 = vld [vmem:[#allocation4 + $0x58] sm:$0xff] }
 0x31c   : > { %1960 = vst.msk [vmem:[#allocation4 + $0x78] sm:$0xff] %vm1944_vm11, %v1879_v20  ;;  %4789 = vmatmul.mubr.msk.f32.gmra.mrb[10].mxu0 %vm2021_vm12, %v1988_v19 }
 0x31d   : > { %4791 = vmatprep.mubr.msk.f32.mxu0 %vm2021_vm12, %v1989_v7 }
 0x31f   : > { %v1881_v53 = vpop.permute.xlu1 %1880  ;;  %v1990_v0 = vld [vmem:[#allocation4 + $0x68] sm:$0xff] }
 0x320   : > { %1961 = vst.msk [vmem:[#allocation4 + $0x80] sm:$0xff] %vm1944_vm11, %v1881_v53  ;;  %4792 = vmatmul.mubr.msk.f32.gmra.mrb[12].mxu0 %vm2021_vm12, %v1990_v0 }
 0x321   : > { %4794 = vmatprep.mubr.msk.f32.mxu0 %vm2021_vm12, %v1991_v9 }
 0x323   : > { %v1692_v38 = vpop.permute.xlu1 %1691  ;;  %v1992_v4 = vld [vmem:[#allocation4 + $0x78] sm:$0xff] }
 0x324   : > { %1770 = vst.msk [vmem:[#allocation4 + $0x90] sm:$0xff] %vm1751_vm10, %v1692_v38  ;;  %4795 = vmatmul.mubr.msk.f32.gmra.mrb[14].mxu0 %vm2021_vm12, %v1992_v4 }
 0x327   : > { %v1885_v58 = vpop.permute.xlu1 %1884  ;;  %v1993_v12 = vld [vmem:[#allocation4 + $0x80] sm:$0xff] }
 0x328   : > { %1963 = vst.msk [vmem:[#allocation4 + $0x90] sm:$0xff] %vm1944_vm11, %v1885_v58  ;;  %4797 = vmatprep.mubr.msk.f32.mxu0 %vm2021_vm12, %v1993_v12 }
 0x329   : > { %4798 = vmatmul.mubr.msk.f32.gmra.mrb[16].mxu0 %vm2021_vm12, %v1994_v8 }
 0x32b   : > { %v1696_v23 = vpop.permute.xlu1 %1695 }
 0x32c   : > { %1772 = vst.msk [vmem:[#allocation4 + $0xa0] sm:$0xff] %vm1751_vm10, %v1696_v23 }
 0x32f   : > { %v1889_v14 = vpop.permute.xlu1 %1888  ;;  %v1995_v30 = vld [vmem:[#allocation4 + $0x90] sm:$0xff] }
 0x330   : > { %1965 = vst.msk [vmem:[#allocation4 + $0xa0] sm:$0xff] %vm1944_vm11, %v1889_v14  ;;  %4800 = vmatprep.mubr.msk.f32.mxu0 %vm2021_vm12, %v1995_v30 }
 0x331   : > { %4801 = vmatmul.mubr.msk.f32.gmra.mrb[18].mxu0 %vm2021_vm12, %v1996_v36 }
 0x333   : > { %v1700_v32 = vpop.permute.xlu1 %1699 }
 0x334   : > { %1774 = vst.msk [vmem:[#allocation4 + $0xb0] sm:$0xff] %vm1751_vm10, %v1700_v32 }
 0x337   : > { %v1893_v10 = vpop.permute.xlu1 %1892  ;;  %v1997_v5 = vld [vmem:[#allocation4 + $0xa0] sm:$0xff] }
 0x338   : > { %1967 = vst.msk [vmem:[#allocation4 + $0xb0] sm:$0xff] %vm1944_vm11, %v1893_v10  ;;  %4803 = vmatprep.mubr.msk.f32.mxu0 %vm2021_vm12, %v1997_v5 }
 0x339   : > { %4804 = vmatmul.mubr.msk.f32.gmra.mrb[20].mxu0 %vm2021_vm12, %v1998_v54 }
 0x33b   : > { %v1704_v16 = vpop.permute.xlu1 %1703 }
 0x33c   : > { %1776 = vst.msk [vmem:[#allocation4 + $0xc0] sm:$0xff] %vm1751_vm10, %v1704_v16 }
 0x33f   : > { %v1897_v18 = vpop.permute.xlu1 %1896  ;;  %v1999_v48 = vld [vmem:[#allocation4 + $0xb0] sm:$0xff] }
 0x340   : > { %1969 = vst.msk [vmem:[#allocation4 + $0xc0] sm:$0xff] %vm1944_vm11, %v1897_v18  ;;  %4806 = vmatprep.mubr.msk.f32.mxu0 %vm2021_vm12, %v1999_v48 }
 0x341   : > { %4807 = vmatmul.mubr.msk.f32.gmra.mrb[22].mxu0 %vm2021_vm12, %v2000_v3 }
 0x343   : > { %v1708_v33 = vpop.permute.xlu1 %1707 }
 0x344   : > { %1778 = vst.msk [vmem:[#allocation4 + $0xd0] sm:$0xff] %vm1751_vm10, %v1708_v33 }
 0x347   : > { %v1901_v63 = vpop.permute.xlu1 %1900  ;;  %v2001_v22 = vld [vmem:[#allocation4 + $0xc0] sm:$0xff] }
 0x348   : > { %1971 = vst.msk [vmem:[#allocation4 + $0xd0] sm:$0xff] %vm1944_vm11, %v1901_v63  ;;  %4809 = vmatprep.mubr.msk.f32.mxu0 %vm2021_vm12, %v2001_v22 }
 0x349   : > { %4810 = vmatmul.mubr.msk.f32.gmra.mrb[24].mxu0 %vm2021_vm12, %v2002_v59 }
 0x34b   : > { %v1712_v39 = vpop.permute.xlu1 %1711 }
 0x34c   : > { %1780 = vst.msk [vmem:[#allocation4 + $0xe0] sm:$0xff] %vm1751_vm10, %v1712_v39 }
 0x34f   : > { %v1905_v35 = vpop.permute.xlu1 %1904  ;;  %v2003_v45 = vld [vmem:[#allocation4 + $0xd0] sm:$0xff] }
 0x350   : > { %1973 = vst.msk [vmem:[#allocation4 + $0xe0] sm:$0xff] %vm1944_vm11, %v1905_v35  ;;  %4812 = vmatprep.mubr.msk.f32.mxu0 %vm2021_vm12, %v2003_v45 }
 0x351   : > { %4813 = vmatmul.mubr.msk.f32.gmra.mrb[26].mxu0 %vm2021_vm12, %v2004_v29 }
 0x353   : > { %v1716_v13 = vpop.permute.xlu1 %1715 }
 0x354   : > { %1782 = vst.msk [vmem:[#allocation4 + $0xf0] sm:$0xff] %vm1751_vm10, %v1716_v13 }
 0x357   : > { %v2005_v21 = vld [vmem:[#allocation4 + $0xe0] sm:$0xff]  ;;  %v1909_v47 = vpop.permute.xlu1 %1908 }
 0x358   : > { %4815 = vmatprep.mubr.msk.f32.mxu0 %vm2021_vm12, %v2005_v21  ;;  %1975 = vst.msk [vmem:[#allocation4 + $0xf0] sm:$0xff] %vm1944_vm11, %v1909_v47 }
 0x359   : > { %4816 = vmatmul.mubr.msk.f32.gmra.mrb[28].mxu0 %vm2021_vm12, %v2006_v61 }
 0x35f   : > { %v2007_v60 = vld [vmem:[#allocation4 + $0xf0] sm:$0xff] }
 0x360   : > { %4818 = vmatprep.mubr.msk.f32.mxu0 %vm2021_vm12, %v2007_v60 }
 0x361   : > { %4819 = vmatmul.mubr.msk.f32.gmra.mrb[30].mxu0 %vm2021_vm12, %v2008_v34 }
 0x362   : > { %v2580_v51 = vpop.permute.xlu1 %2579 }
 0x363   : > { %v2582_v42 = vpop.permute.xlu0 %2581  ;;  %2675 = vst.msk [vmem:[#allocation5] sm:$0xff] %vm592_vm3, %v2580_v51 }
 0x364   : > { %2676 = vst.msk [vmem:[#allocation5 + $0x8] sm:$0xff] %vm592_vm3, %v2582_v42 }
 0x3db   : > { %v4775_v56 = vpop.f32.mrb[0].mxu0 }
 0x3dc   : > { %v2194_v46 = vadd.f32 %v4775_v56, %v6284_v15  ;;  %v2188_v31 = vpop.f32.mrb[1].mxu0 }
 0x3dd   : > { %v2189_v41 = vadd.f32 %v6284_v15, %v2188_v31 }
 0x3de   : > { %v2348_v37 = vmax.f32 %v2194_v46, 0.0 }
 0x3df   : > { %v2347_v57 = vmax.f32 %v2189_v41, 0.0  ;;  %v4778_v26 = vpop.f32.mrb[2].mxu0 }
 0x3e0   : > { %2420 = vst.msk [vmem:[#allocation3 + $0x21] sm:$0xff] %vm293_vm0, %v2348_v37  ;;  %v2204_v27 = vadd.f32 %v4778_v26, %v6284_v15  ;;  %v2198_v52 = vpop.f32.mrb[3].mxu0 }
 0x3e1   : > { %2419 = vst.msk [vmem:[#allocation3 + $0x19] sm:$0xff] %vm293_vm0, %v2347_v57  ;;  %v2199_v43 = vadd.f32 %v6284_v15, %v2198_v52 }
 0x3e2   : > { %v2350_v11 = vmax.f32 %v2204_v27, 0.0 }
 0x3e3   : > { %v2349_v1 = vmax.f32 %v2199_v43, 0.0  ;;  %v4781_v49 = vpop.f32.mrb[4].mxu0 }
 0x3e4   : > { %2422 = vst.msk [vmem:[#allocation3 + $0x39] sm:$0xff] %vm293_vm0, %v2350_v11  ;;  %v2214_v44 = vadd.f32 %v4781_v49, %v6284_v15  ;;  %v2208_v50 = vpop.f32.mrb[5].mxu0 }
 0x3e5   : > { %2421 = vst.msk [vmem:[#allocation3 + $0x31] sm:$0xff] %vm293_vm0, %v2349_v1  ;;  %v2209_v55 = vadd.f32 %v6284_v15, %v2208_v50 }
 0x3e6   : > { %v2352_v62 = vmax.f32 %v2214_v44, 0.0 }
 0x3e7   : > { %v2351_v2 = vmax.f32 %v2209_v55, 0.0  ;;  %v4784_v20 = vpop.f32.mrb[6].mxu0  ;;  %v6298_v19 = vld [vmem:[#allocation3 + $0x21] sm:$0xff] }
 0x3e8   : > { %2424 = vst.msk [vmem:[#allocation3 + $0x51] sm:$0xff] %vm293_vm0, %v2352_v62  ;;  %v2224_v7 = vadd.f32 %v4784_v20, %v6284_v15  ;;  %2585 = vrot.lane.b32.xlu0 %v6298_v19, %s4922_s24  ;;  %v2218_v53 = vpop.f32.mrb[7].mxu0  ;;  %v6304_v0 = vld [vmem:[#allocation3 + $0x19] sm:$0xff] }
 0x3e9   : > { %v6306_v9 = vld [vmem:[#allocation3 + $0x20] sm:$0xff]  ;;  %2423 = vst.msk [vmem:[#allocation3 + $0x49] sm:$0xff] %vm293_vm0, %v2351_v2  ;;  %v2219_v38 = vadd.f32 %v6284_v15, %v2218_v53  ;;  %2583 = vrot.lane.b32.xlu1 %v6304_v0, %s4922_s24  ;;  %v6314_v4 = vld [vmem:[#allocation3 + $0x18] sm:$0xff] }
 0x3ea   : > { %2486 = vst.msk [vmem:[#allocation5 + $0x18] sm:$0xff] %vm293_vm0, %v6306_v9  ;;  %v2354_v58 = vmax.f32 %v2224_v7, 0.0  ;;  %2485 = vst.msk [vmem:[#allocation5 + $0x10] sm:$0xff] %vm293_vm0, %v6314_v4 }
 0x3eb   : > { %v2353_v12 = vmax.f32 %v2219_v38, 0.0  ;;  %v4787_v8 = vpop.f32.mrb[8].mxu0  ;;  %v6318_v23 = vld [vmem:[#allocation3 + $0x39] sm:$0xff] }
 0x3ec   : > { %2426 = vst.msk [vmem:[#allocation3 + $0x69] sm:$0xff] %vm293_vm0, %v2354_v58  ;;  %v2234_v14 = vadd.f32 %v4787_v8, %v6284_v15  ;;  %2589 = vrot.lane.b32.xlu0 %v6318_v23, %s4922_s24  ;;  %v2228_v30 = vpop.f32.mrb[9].mxu0  ;;  %v6324_v36 = vld [vmem:[#allocation3 + $0x31] sm:$0xff] }
 0x3ed   : > { %v6326_v32 = vld [vmem:[#allocation3 + $0x38] sm:$0xff]  ;;  %2425 = vst.msk [vmem:[#allocation3 + $0x61] sm:$0xff] %vm293_vm0, %v2353_v12  ;;  %v2229_v10 = vadd.f32 %v6284_v15, %v2228_v30  ;;  %2587 = vrot.lane.b32.xlu1 %v6324_v36, %s4922_s24  ;;  %v6334_v5 = vld [vmem:[#allocation3 + $0x30] sm:$0xff] }
 0x3ee   : > { %2488 = vst.msk [vmem:[#allocation5 + $0x28] sm:$0xff] %vm293_vm0, %v6326_v32  ;;  %v2356_v54 = vmax.f32 %v2234_v14, 0.0  ;;  %2487 = vst.msk [vmem:[#allocation5 + $0x20] sm:$0xff] %vm293_vm0, %v6334_v5 }
 0x3ef   : > { %v2355_v16 = vmax.f32 %v2229_v10, 0.0  ;;  %v4790_v18 = vpop.f32.mrb[10].mxu0  ;;  %v6338_v48 = vld [vmem:[#allocation3 + $0x51] sm:$0xff] }
 0x3f0   : > { %2428 = vst.msk [vmem:[#allocation3 + $0x81] sm:$0xff] %vm293_vm0, %v2356_v54  ;;  %v2244_v3 = vadd.f32 %v4790_v18, %v6284_v15  ;;  %2593 = vrot.lane.b32.xlu0 %v6338_v48, %s4922_s24  ;;  %v2238_v33 = vpop.f32.mrb[11].mxu0  ;;  %v6344_v63 = vld [vmem:[#allocation3 + $0x49] sm:$0xff] }
 0x3f1   : > { %v6346_v22 = vld [vmem:[#allocation3 + $0x50] sm:$0xff]  ;;  %2427 = vst.msk [vmem:[#allocation3 + $0x79] sm:$0xff] %vm293_vm0, %v2355_v16  ;;  %v2239_v59 = vadd.f32 %v6284_v15, %v2238_v33  ;;  %2591 = vrot.lane.b32.xlu1 %v6344_v63, %s4922_s24  ;;  %v6354_v39 = vld [vmem:[#allocation3 + $0x48] sm:$0xff] }
 0x3f2   : > { %2490 = vst.msk [vmem:[#allocation5 + $0x38] sm:$0xff] %vm293_vm0, %v6346_v22  ;;  %v2358_v28 = vmax.f32 %v2244_v3, 0.0  ;;  %2489 = vst.msk [vmem:[#allocation5 + $0x30] sm:$0xff] %vm293_vm0, %v6354_v39 }
 0x3f3   : > { %v2357_v35 = vmax.f32 %v2239_v59, 0.0  ;;  %v4793_v45 = vpop.f32.mrb[12].mxu0  ;;  %v6358_v17 = vld [vmem:[#allocation3 + $0x69] sm:$0xff] }
 0x3f4   : > { %2430 = vst.msk [vmem:[#allocation3 + $0x99] sm:$0xff] %vm293_vm0, %v2358_v28  ;;  %v2254_v29 = vadd.f32 %v4793_v45, %v6284_v15  ;;  %2597 = vrot.lane.b32.xlu0 %v6358_v17, %s4922_s24  ;;  %v2248_v13 = vpop.f32.mrb[13].mxu0  ;;  %v6364_v21 = vld [vmem:[#allocation3 + $0x61] sm:$0xff] }
 0x3f5   : > { %v6366_v47 = vld [vmem:[#allocation3 + $0x68] sm:$0xff]  ;;  %2429 = vst.msk [vmem:[#allocation3 + $0x91] sm:$0xff] %vm293_vm0, %v2357_v35  ;;  %v2249_v61 = vadd.f32 %v6284_v15, %v2248_v13  ;;  %2595 = vrot.lane.b32.xlu1 %v6364_v21, %s4922_s24  ;;  %v6374_v34 = vld [vmem:[#allocation3 + $0x60] sm:$0xff] }
 0x3f6   : > { %2492 = vst.msk [vmem:[#allocation5 + $0x48] sm:$0xff] %vm293_vm0, %v6366_v47  ;;  %v2360_v60 = vmax.f32 %v2254_v29, 0.0  ;;  %2491 = vst.msk [vmem:[#allocation5 + $0x40] sm:$0xff] %vm293_vm0, %v6374_v34 }
 0x3f7   : > { %v2359_v24 = vmax.f32 %v2249_v61, 0.0  ;;  %v4796_v6 = vpop.f32.mrb[14].mxu0  ;;  %v2526_v40 = vld [vmem:[#allocation3 + $0x81] sm:$0xff] }
 0x3f8   : > { %2432 = vst.msk [vmem:[#allocation3 + $0xb1] sm:$0xff] %vm293_vm0, %v2360_v60  ;;  %v2264_v25 = vadd.f32 %v4796_v6, %v6284_v15  ;;  %2601 = vrot.lane.b32.xlu0 %v2526_v40, %s4922_s24  ;;  %v2258_v42 = vpop.f32.mrb[15].mxu0  ;;  %v2525_v51 = vld [vmem:[#allocation3 + $0x79] sm:$0xff] }
 0x3f9   : > { %v6381_v56 = vld [vmem:[#allocation3 + $0x80] sm:$0xff]  ;;  %2431 = vst.msk [vmem:[#allocation3 + $0xa9] sm:$0xff] %vm293_vm0, %v2359_v24  ;;  %v2259_v46 = vadd.f32 %v6284_v15, %v2258_v42  ;;  %2599 = vrot.lane.b32.xlu1 %v2525_v51, %s4922_s24  ;;  %v6388_v31 = vld [vmem:[#allocation3 + $0x78] sm:$0xff] }
 0x3fa   : > { %2494 = vst.msk [vmem:[#allocation5 + $0x58] sm:$0xff] %vm293_vm0, %v6381_v56  ;;  %v2362_v41 = vmax.f32 %v2264_v25, 0.0  ;;  %2493 = vst.msk [vmem:[#allocation5 + $0x50] sm:$0xff] %vm293_vm0, %v6388_v31 }
 0x3fb   : > { %v2361_v37 = vmax.f32 %v2259_v46, 0.0  ;;  %v2528_v57 = vld [vmem:[#allocation3 + $0x99] sm:$0xff] }
 0x3fc   : > { %2434 = vst.msk [vmem:[#allocation3 + $0xc9] sm:$0xff] %vm293_vm0, %v2362_v41  ;;  %2605 = vrot.lane.b32.xlu0 %v2528_v57, %s4922_s24  ;;  %v4799_v26 = vpop.f32.mrb[16].mxu0  ;;  %v2527_v27 = vld [vmem:[#allocation3 + $0x91] sm:$0xff] }
 0x3fd   : > { %v6394_v52 = vld [vmem:[#allocation3 + $0x98] sm:$0xff]  ;;  %2433 = vst.msk [vmem:[#allocation3 + $0xc1] sm:$0xff] %vm293_vm0, %v2361_v37  ;;  %v2274_v43 = vadd.f32 %v4799_v26, %v6284_v15  ;;  %2603 = vrot.lane.b32.xlu1 %v2527_v27, %s4922_s24  ;;  %v2268_v11 = vpop.f32.mrb[17].mxu0  ;;  %v6401_v1 = vld [vmem:[#allocation3 + $0x90] sm:$0xff] }
 0x3fe   : > { %2496 = vst.msk [vmem:[#allocation5 + $0x68] sm:$0xff] %vm293_vm0, %v6394_v52  ;;  %v2269_v49 = vadd.f32 %v6284_v15, %v2268_v11  ;;  %2495 = vst.msk [vmem:[#allocation5 + $0x60] sm:$0xff] %vm293_vm0, %v6401_v1 }
 0x3ff   : > { %v2364_v44 = vmax.f32 %v2274_v43, 0.0  ;;  %v2530_v50 = vld [vmem:[#allocation3 + $0xb1] sm:$0xff] }
 0x400   : > { %v2363_v55 = vmax.f32 %v2269_v49, 0.0  ;;  %2609 = vrot.lane.b32.xlu0 %v2530_v50, %s4922_s24  ;;  %v2529_v62 = vld [vmem:[#allocation3 + $0xa9] sm:$0xff] }
 0x401   : > { %v6407_v2 = vld [vmem:[#allocation3 + $0xb0] sm:$0xff]  ;;  %2436 = vst.msk [vmem:[#allocation3 + $0xe1] sm:$0xff] %vm293_vm0, %v2364_v44  ;;  %2607 = vrot.lane.b32.xlu1 %v2529_v62, %s4922_s24  ;;  %v6413_v20 = vld [vmem:[#allocation3 + $0xa8] sm:$0xff] }
 0x402   : > { %2498 = vst.msk [vmem:[#allocation5 + $0x78] sm:$0xff] %vm293_vm0, %v6407_v2  ;;  %2435 = vst.msk [vmem:[#allocation3 + $0xd9] sm:$0xff] %vm293_vm0, %v2363_v55 }
 0x403   : > { %2497 = vst.msk [vmem:[#allocation5 + $0x70] sm:$0xff] %vm293_vm0, %v6413_v20  ;;  %v2532_v7 = vld [vmem:[#allocation3 + $0xc9] sm:$0xff] }
 0x404   : > { %2613 = vrot.lane.b32.xlu0 %v2532_v7, %s4922_s24  ;;  %v4802_v53 = vpop.f32.mrb[18].mxu0  ;;  %v2531_v38 = vld [vmem:[#allocation3 + $0xc1] sm:$0xff] }
 0x405   : > { %v6419_v58 = vld [vmem:[#allocation3 + $0xc8] sm:$0xff]  ;;  %v2284_v12 = vadd.f32 %v4802_v53, %v6284_v15  ;;  %2611 = vrot.lane.b32.xlu1 %v2531_v38, %s4922_s24  ;;  %v2278_v8 = vpop.f32.mrb[19].mxu0  ;;  %v6425_v14 = vld [vmem:[#allocation3 + $0xc0] sm:$0xff] }
 0x406   : > { %2500 = vst.msk [vmem:[#allocation5 + $0x88] sm:$0xff] %vm293_vm0, %v6419_v58  ;;  %v2279_v30 = vadd.f32 %v6284_v15, %v2278_v8  ;;  %2499 = vst.msk [vmem:[#allocation5 + $0x80] sm:$0xff] %vm293_vm0, %v6425_v14 }
 0x407   : > { %v2366_v10 = vmax.f32 %v2284_v12, 0.0 }
 0x408   : > { %v2365_v54 = vmax.f32 %v2279_v30, 0.0  ;;  %v2534_v16 = vld [vmem:[#allocation3 + $0xe1] sm:$0xff] }
 0x409   : > { %2438 = vst.msk [vmem:[#allocation3 + $0xf9] sm:$0xff] %vm293_vm0, %v2366_v10  ;;  %2617 = vrot.lane.b32.xlu0 %v2534_v16, %s4922_s24  ;;  %v2533_v18 = vld [vmem:[#allocation3 + $0xd9] sm:$0xff] }
 0x40a   : > { %v6432_v3 = vld [vmem:[#allocation3 + $0xe0] sm:$0xff]  ;;  %2437 = vst.msk [vmem:[#allocation3 + $0xf1] sm:$0xff] %vm293_vm0, %v2365_v54  ;;  %2615 = vrot.lane.b32.xlu1 %v2533_v18, %s4922_s24  ;;  %v6438_v33 = vld [vmem:[#allocation3 + $0xd8] sm:$0xff] }
 0x40b   : > { %2502 = vst.msk [vmem:[#allocation5 + $0x98] sm:$0xff] %vm293_vm0, %v6432_v3  ;;  %2501 = vst.msk [vmem:[#allocation5 + $0x90] sm:$0xff] %vm293_vm0, %v6438_v33 }
 0x40c   : > { %v4805_v59 = vpop.f32.mrb[20].mxu0 }
 0x40d   : > { %v2294_v28 = vadd.f32 %v4805_v59, %v6284_v15  ;;  %v2288_v35 = vpop.f32.mrb[21].mxu0 }
 0x40e   : > { %v2289_v45 = vadd.f32 %v6284_v15, %v2288_v35 }
 0x40f   : > { %v2368_v29 = vmax.f32 %v2294_v28, 0.0 }
 0x410   : > { %v2367_v13 = vmax.f32 %v2289_v45, 0.0  ;;  %v2536_v61 = vld [vmem:[#allocation3 + $0xf9] sm:$0xff] }
 0x411   : > { %2440 = vst.msk [vmem:[#allocation3 + $0x111] sm:$0xff] %vm293_vm0, %v2368_v29  ;;  %2621 = vrot.lane.b32.xlu0 %v2536_v61, %s4922_s24  ;;  %v2535_v60 = vld [vmem:[#allocation3 + $0xf1] sm:$0xff] }
 0x412   : > { %v6446_v24 = vld [vmem:[#allocation3 + $0xf8] sm:$0xff]  ;;  %2439 = vst.msk [vmem:[#allocation3 + $0x109] sm:$0xff] %vm293_vm0, %v2367_v13  ;;  %2619 = vrot.lane.b32.xlu1 %v2535_v60, %s4922_s24  ;;  %v6452_v6 = vld [vmem:[#allocation3 + $0xf0] sm:$0xff] }
 0x413   : > { %2504 = vst.msk [vmem:[#allocation5 + $0xa8] sm:$0xff] %vm293_vm0, %v6446_v24  ;;  %2503 = vst.msk [vmem:[#allocation5 + $0xa0] sm:$0xff] %vm293_vm0, %v6452_v6 }
 0x414   : > { %v4808_v40 = vpop.f32.mrb[22].mxu0 }
 0x415   : > { %v2304_v25 = vadd.f32 %v4808_v40, %v6284_v15  ;;  %v2298_v42 = vpop.f32.mrb[23].mxu0 }
 0x416   : > { %v2299_v51 = vadd.f32 %v6284_v15, %v2298_v42 }
 0x417   : > { %v2370_v46 = vmax.f32 %v2304_v25, 0.0 }
 0x418   : > { %v2369_v41 = vmax.f32 %v2299_v51, 0.0  ;;  %v2538_v37 = vld [vmem:[#allocation3 + $0x111] sm:$0xff] }
 0x419   : > { %2442 = vst.msk [vmem:[#allocation3 + $0x129] sm:$0xff] %vm293_vm0, %v2370_v46  ;;  %2625 = vrot.lane.b32.xlu0 %v2538_v37, %s4922_s24  ;;  %v2537_v57 = vld [vmem:[#allocation3 + $0x109] sm:$0xff] }
 0x41a   : > { %v6460_v26 = vld [vmem:[#allocation3 + $0x110] sm:$0xff]  ;;  %2441 = vst.msk [vmem:[#allocation3 + $0x121] sm:$0xff] %vm293_vm0, %v2369_v41  ;;  %2623 = vrot.lane.b32.xlu1 %v2537_v57, %s4922_s24  ;;  %v6466_v27 = vld [vmem:[#allocation3 + $0x108] sm:$0xff] }
 0x41b   : > { %2506 = vst.msk [vmem:[#allocation5 + $0xb8] sm:$0xff] %vm293_vm0, %v6460_v26  ;;  %2505 = vst.msk [vmem:[#allocation5 + $0xb0] sm:$0xff] %vm293_vm0, %v6466_v27 }
 0x41c   : > { %v4811_v43 = vpop.f32.mrb[24].mxu0 }
 0x41d   : > { %v2314_v11 = vadd.f32 %v4811_v43, %v6284_v15  ;;  %v2308_v49 = vpop.f32.mrb[25].mxu0 }
 0x41e   : > { %v2309_v44 = vadd.f32 %v6284_v15, %v2308_v49 }
 0x41f   : > { %v2372_v50 = vmax.f32 %v2314_v11, 0.0 }
 0x420   : > { %v2371_v55 = vmax.f32 %v2309_v44, 0.0  ;;  %v2540_v62 = vld [vmem:[#allocation3 + $0x129] sm:$0xff] }
 0x421   : > { %2444 = vst.msk [vmem:[#allocation3 + $0x141] sm:$0xff] %vm293_vm0, %v2372_v50  ;;  %2629 = vrot.lane.b32.xlu0 %v2540_v62, %s4922_s24  ;;  %v2539_v7 = vld [vmem:[#allocation3 + $0x121] sm:$0xff]  ;;  %v2708_v62 = vld [vmem:[#allocation3 + $0xa] sm:$0xff] }
 0x422   : > { %v6474_v53 = vld [vmem:[#allocation3 + $0x128] sm:$0xff]  ;;  %2443 = vst.msk [vmem:[#allocation3 + $0x139] sm:$0xff] %vm293_vm0, %v2371_v55  ;;  %2627 = vrot.lane.b32.xlu1 %v2539_v7, %s4922_s24  ;;  %v6480_v38 = vld [vmem:[#allocation3 + $0x120] sm:$0xff] }
 0x423   : > { %2508 = vst.msk [vmem:[#allocation5 + $0xc8] sm:$0xff] %vm293_vm0, %v6474_v53  ;;  %2507 = vst.msk [vmem:[#allocation5 + $0xc0] sm:$0xff] %vm293_vm0, %v6480_v38 }
 0x424   : > { %v4814_v12 = vpop.f32.mrb[26].mxu0 }
 0x425   : > { %v2324_v8 = vadd.f32 %v4814_v12, %v6284_v15  ;;  %v2318_v30 = vpop.f32.mrb[27].mxu0  ;;  %v6528_v12 = vld [vmem:[#allocation3 + $0x22] sm:$0xff] }
 0x426   : > { %v2319_v10 = vadd.f32 %v6284_v15, %v2318_v30  ;;  %v6536_v30 = vld [vmem:[#allocation3 + $0x3a] sm:$0xff] }
 0x427   : > { %v2374_v54 = vmax.f32 %v2324_v8, 0.0  ;;  %v6532_v8 = vld [vmem:[#allocation3 + $0x1a] sm:$0xff] }
 0x428   : > { %v2373_v16 = vmax.f32 %v2319_v10, 0.0  ;;  %v2542_v18 = vld [vmem:[#allocation3 + $0x141] sm:$0xff]  ;;  %v6540_v10 = vld [vmem:[#allocation3 + $0x32] sm:$0xff] }
 0x429   : > { %2446 = vst.msk [vmem:[#allocation3 + $0x159] sm:$0xff] %vm293_vm0, %v2374_v54  ;;  %2633 = vrot.lane.b32.xlu0 %v2542_v18, %s4922_s24  ;;  %v2541_v59 = vld [vmem:[#allocation3 + $0x139] sm:$0xff]  ;;  %v6552_v18 = vld [vmem:[#allocation3 + $0x6a] sm:$0xff] }
 0x42a   : > { %v6488_v28 = vld [vmem:[#allocation3 + $0x140] sm:$0xff]  ;;  %2445 = vst.msk [vmem:[#allocation3 + $0x151] sm:$0xff] %vm293_vm0, %v2373_v16  ;;  %2631 = vrot.lane.b32.xlu1 %v2541_v59, %s4922_s24  ;;  %v6494_v35 = vld [vmem:[#allocation3 + $0x138] sm:$0xff]  ;;  %v6548_v16 = vld [vmem:[#allocation3 + $0x4a] sm:$0xff] }
 0x42b   : > { %2510 = vst.msk [vmem:[#allocation5 + $0xd8] sm:$0xff] %vm293_vm0, %v6488_v28  ;;  %2509 = vst.msk [vmem:[#allocation5 + $0xd0] sm:$0xff] %vm293_vm0, %v6494_v35  ;;  %v6544_v54 = vld [vmem:[#allocation3 + $0x52] sm:$0xff]  ;;  %v6556_v59 = vld [vmem:[#allocation3 + $0x62] sm:$0xff] }
 0x42c   : > { %v4817_v45 = vpop.f32.mrb[28].mxu0 }
 0x42d   : > { %v2334_v29 = vadd.f32 %v4817_v45, %v6284_v15  ;;  %v2328_v13 = vpop.f32.mrb[29].mxu0  ;;  %v6560_v45 = vld [vmem:[#allocation3 + $0x82] sm:$0xff] }
 0x42e   : > { %v2329_v61 = vadd.f32 %v6284_v15, %v2328_v13  ;;  %v6568_v13 = vld [vmem:[#allocation3 + $0x9a] sm:$0xff] }
 0x42f   : > { %v2376_v60 = vmax.f32 %v2334_v29, 0.0  ;;  %v6564_v29 = vld [vmem:[#allocation3 + $0x7a] sm:$0xff] }
 0x430   : > { %v2375_v40 = vmax.f32 %v2329_v61, 0.0  ;;  %v2544_v25 = vld [vmem:[#allocation3 + $0x159] sm:$0xff] }
 0x431   : > { %2448 = vst.msk [vmem:[#allocation3 + $0x171] sm:$0xff] %vm293_vm0, %v2376_v60  ;;  %2637 = vrot.lane.b32.xlu0 %v2544_v25, %s4922_s24  ;;  %v2543_v42 = vld [vmem:[#allocation3 + $0x151] sm:$0xff] }
 0x432   : > { %v6502_v51 = vld [vmem:[#allocation3 + $0x158] sm:$0xff]  ;;  %2447 = vst.msk [vmem:[#allocation3 + $0x169] sm:$0xff] %vm293_vm0, %v2375_v40  ;;  %2635 = vrot.lane.b32.xlu1 %v2543_v42, %s4922_s24  ;;  %v6508_v46 = vld [vmem:[#allocation3 + $0x150] sm:$0xff] }
 0x433   : > { %2512 = vst.msk [vmem:[#allocation5 + $0xe8] sm:$0xff] %vm293_vm0, %v6502_v51  ;;  %2511 = vst.msk [vmem:[#allocation5 + $0xe0] sm:$0xff] %vm293_vm0, %v6508_v46  ;;  %v6572_v61 = vld [vmem:[#allocation3 + $0x92] sm:$0xff]  ;;  %v6580_v40 = vld [vmem:[#allocation3 + $0xaa] sm:$0xff] }
 0x434   : > { %v4820_v41 = vpop.f32.mrb[30].mxu0  ;;  %v6576_v60 = vld [vmem:[#allocation3 + $0xb2] sm:$0xff] }
 0x435   : > { %v2344_v37 = vadd.f32 %v4820_v41, %v6284_v15  ;;  %v2338_v57 = vpop.f32.mrb[31].mxu0  ;;  %v2724_v41 = vld [vmem:[#allocation3 + $0xca] sm:$0xff] }
 0x436   : > { %v2339_v43 = vadd.f32 %v6284_v15, %v2338_v57  ;;  %v2707_v15 = vld [vmem:[#allocation3 + $0x2] sm:$0xff] }
 0x437   : > { %v2378_v11 = vmax.f32 %v2344_v37, 0.0  ;;  %v6587_v37 = vld [vmem:[#allocation3 + $0xc2] sm:$0xff] }
 0x438   : > { %v2546_v49 = vld [vmem:[#allocation3 + $0x171] sm:$0xff]  ;;  %v2377_v44 = vmax.f32 %v2339_v43, 0.0 }
 0x439   : > { %2641 = vrot.lane.b32.xlu0 %v2546_v49, %s4922_s24  ;;  %v2545_v50 = vld [vmem:[#allocation3 + $0x169] sm:$0xff]  ;;  %2450 = vst.msk [vmem:[#allocation3 + $0x189] sm:$0xff] %vm293_vm0, %v2378_v11  ;;  %v2725_v49 = vld [vmem:[#allocation3 + $0xda] sm:$0xff] }
 0x43a   : > { %v6516_v55 = vld [vmem:[#allocation3 + $0x170] sm:$0xff]  ;;  %2639 = vrot.lane.b32.xlu1 %v2545_v50, %s4922_s24  ;;  %v6521_v7 = vld [vmem:[#allocation3 + $0x168] sm:$0xff]  ;;  %2449 = vst.msk [vmem:[#allocation3 + $0x181] sm:$0xff] %vm293_vm0, %v2377_v44 }
 0x43b   : > { %2514 = vst.msk [vmem:[#allocation5 + $0xf8] sm:$0xff] %vm293_vm0, %v6516_v55  ;;  %2513 = vst.msk [vmem:[#allocation5 + $0xf0] sm:$0xff] %vm293_vm0, %v6521_v7  ;;  %v2726_v11 = vld [vmem:[#allocation3 + $0xe2] sm:$0xff] }
 0x43d   : > { %2773 = vrot.lane.b32.xlu0 %v2708_v62, %s4923_s25  ;;  %v2728_v62 = vld [vmem:[#allocation3 + $0xfa] sm:$0xff] }
 0x43e   : > { %2771 = vrot.lane.b32.xlu1 %v2707_v15, %s4923_s25  ;;  %v2727_v15 = vld [vmem:[#allocation3 + $0xf2] sm:$0xff] }
 0x441   : > { %2777 = vrot.lane.b32.xlu0 %v6528_v12, %s4923_s25 }
 0x442   : > { %2775 = vrot.lane.b32.xlu1 %v6532_v8, %s4923_s25 }
 0x445   : > { %2781 = vrot.lane.b32.xlu0 %v6536_v30, %s4923_s25 }
 0x446   : > { %2779 = vrot.lane.b32.xlu1 %v6540_v10, %s4923_s25 }
 0x449   : > { %2785 = vrot.lane.b32.xlu0 %v6544_v54, %s4923_s25 }
 0x44a   : > { %2783 = vrot.lane.b32.xlu1 %v6548_v16, %s4923_s25 }
 0x44d   : > { %2789 = vrot.lane.b32.xlu0 %v6552_v18, %s4923_s25 }
 0x44e   : > { %2787 = vrot.lane.b32.xlu1 %v6556_v59, %s4923_s25 }
 0x451   : > { %2793 = vrot.lane.b32.xlu0 %v6560_v45, %s4923_s25 }
 0x452   : > { %2791 = vrot.lane.b32.xlu1 %v6564_v29, %s4923_s25 }
 0x455   : > { %2797 = vrot.lane.b32.xlu0 %v6568_v13, %s4923_s25 }
 0x456   : > { %2795 = vrot.lane.b32.xlu1 %v6572_v61, %s4923_s25 }
 0x459   : > { %2801 = vrot.lane.b32.xlu0 %v6576_v60, %s4923_s25 }
 0x45a   : > { %2799 = vrot.lane.b32.xlu1 %v6580_v40, %s4923_s25  ;;  %v2586_v25 = vpop.permute.xlu0 %2585 }
 0x45b   : > { %2678 = vst.msk [vmem:[#allocation5 + $0x18] sm:$0xff] %vm592_vm3, %v2586_v25  ;;  %v2584_v42 = vpop.permute.xlu1 %2583 }
 0x45c   : > { %2677 = vst.msk [vmem:[#allocation5 + $0x10] sm:$0xff] %vm592_vm3, %v2584_v42 }
 0x45d   : > { %2805 = vrot.lane.b32.xlu0 %v2724_v41, %s4923_s25  ;;  %v2730_v41 = vld [vmem:[#allocation3 + $0x112] sm:$0xff] }
 0x45e   : > { %2803 = vrot.lane.b32.xlu1 %v6587_v37, %s4923_s25  ;;  %v2590_v57 = vpop.permute.xlu0 %2589 }
 0x45f   : > { %2680 = vst.msk [vmem:[#allocation5 + $0x28] sm:$0xff] %vm592_vm3, %v2590_v57  ;;  %v2588_v43 = vpop.permute.xlu1 %2587  ;;  %v2729_v57 = vld [vmem:[#allocation3 + $0x10a] sm:$0xff] }
 0x460   : > { %2679 = vst.msk [vmem:[#allocation5 + $0x20] sm:$0xff] %vm592_vm3, %v2588_v43 }
 0x461   : > { %2809 = vrot.lane.b32.xlu0 %v2726_v11, %s4923_s25 }
 0x462   : > { %2807 = vrot.lane.b32.xlu1 %v2725_v49, %s4923_s25  ;;  %v2594_v44 = vpop.permute.xlu0 %2593  ;;  %v2732_v49 = vld [vmem:[#allocation3 + $0x12a] sm:$0xff] }
 0x463   : > { %2682 = vst.msk [vmem:[#allocation5 + $0x38] sm:$0xff] %vm592_vm3, %v2594_v44  ;;  %v2592_v50 = vpop.permute.xlu1 %2591  ;;  %v2731_v44 = vld [vmem:[#allocation3 + $0x122] sm:$0xff] }
 0x464   : > { %2681 = vst.msk [vmem:[#allocation5 + $0x30] sm:$0xff] %vm592_vm3, %v2592_v50 }
 0x465   : > { %2813 = vrot.lane.b32.xlu0 %v2728_v62, %s4923_s25 }
 0x466   : > { %2811 = vrot.lane.b32.xlu1 %v2727_v15, %s4923_s25  ;;  %v2598_v25 = vpop.permute.xlu0 %2597  ;;  %v2734_v15 = vld [vmem:[#allocation3 + $0x142] sm:$0xff] }
 0x467   : > { %2684 = vst.msk [vmem:[#allocation5 + $0x48] sm:$0xff] %vm592_vm3, %v2598_v25  ;;  %v2596_v42 = vpop.permute.xlu1 %2595  ;;  %v2733_v25 = vld [vmem:[#allocation3 + $0x13a] sm:$0xff] }
 0x468   : > { %2683 = vst.msk [vmem:[#allocation5 + $0x40] sm:$0xff] %vm592_vm3, %v2596_v42 }
 0x469   : > { %2817 = vrot.lane.b32.xlu0 %v2730_v41, %s4923_s25 }
 0x46a   : > { %2815 = vrot.lane.b32.xlu1 %v2729_v57, %s4923_s25  ;;  %v2602_v43 = vpop.permute.xlu0 %2601  ;;  %v2736_v57 = vld [vmem:[#allocation3 + $0x15a] sm:$0xff] }
 0x46b   : > { %2686 = vst.msk [vmem:[#allocation5 + $0x58] sm:$0xff] %vm592_vm3, %v2602_v43  ;;  %v2600_v11 = vpop.permute.xlu1 %2599  ;;  %v2735_v43 = vld [vmem:[#allocation3 + $0x152] sm:$0xff] }
 0x46c   : > { %2685 = vst.msk [vmem:[#allocation5 + $0x50] sm:$0xff] %vm592_vm3, %v2600_v11 }
 0x46d   : > { %2821 = vrot.lane.b32.xlu0 %v2732_v49, %s4923_s25 }
 0x46e   : > { %2819 = vrot.lane.b32.xlu1 %v2731_v44, %s4923_s25  ;;  %v2606_v50 = vpop.permute.xlu0 %2605  ;;  %v2738_v44 = vld [vmem:[#allocation3 + $0x172] sm:$0xff] }
 0x46f   : > { %2688 = vst.msk [vmem:[#allocation5 + $0x68] sm:$0xff] %vm592_vm3, %v2606_v50  ;;  %v2604_v62 = vpop.permute.xlu1 %2603  ;;  %v2737_v50 = vld [vmem:[#allocation3 + $0x16a] sm:$0xff] }
 0x470   : > { %2687 = vst.msk [vmem:[#allocation5 + $0x60] sm:$0xff] %vm592_vm3, %v2604_v62 }
 0x471   : > { %2825 = vrot.lane.b32.xlu0 %v2734_v15, %s4923_s25 }
 0x472   : > { %2823 = vrot.lane.b32.xlu1 %v2733_v25, %s4923_s25  ;;  %v2610_v42 = vpop.permute.xlu0 %2609 }
 0x473   : > { %2690 = vst.msk [vmem:[#allocation5 + $0x78] sm:$0xff] %vm592_vm3, %v2610_v42  ;;  %v2608_v41 = vpop.permute.xlu1 %2607 }
 0x474   : > { %2689 = vst.msk [vmem:[#allocation5 + $0x70] sm:$0xff] %vm592_vm3, %v2608_v41 }
 0x475   : > { %2829 = vrot.lane.b32.xlu0 %v2736_v57, %s4923_s25 }
 0x476   : > { %2827 = vrot.lane.b32.xlu1 %v2735_v43, %s4923_s25  ;;  %v2614_v11 = vpop.permute.xlu0 %2613 }
 0x477   : > { %2692 = vst.msk [vmem:[#allocation5 + $0x88] sm:$0xff] %vm592_vm3, %v2614_v11  ;;  %v2612_v49 = vpop.permute.xlu1 %2611 }
 0x478   : > { %2691 = vst.msk [vmem:[#allocation5 + $0x80] sm:$0xff] %vm592_vm3, %v2612_v49 }
 0x479   : > { %2833 = vrot.lane.b32.xlu0 %v2738_v44, %s4923_s25 }
 0x47a   : > { %2831 = vrot.lane.b32.xlu1 %v2737_v50, %s4923_s25 }
 0x47b   : > { %v2618_v62 = vpop.permute.xlu0 %2617 }
 0x47c   : > { %2694 = vst.msk [vmem:[#allocation5 + $0x98] sm:$0xff] %vm592_vm3, %v2618_v62  ;;  %v2616_v15 = vpop.permute.xlu1 %2615 }
 0x47d   : > { %2693 = vst.msk [vmem:[#allocation5 + $0x90] sm:$0xff] %vm592_vm3, %v2616_v15  ;;  %2965 = vrot.lane.b32.xlu0 %v6306_v9, %s4924_s26 }
 0x47e   : > { %2963 = vrot.lane.b32.xlu1 %v6314_v4, %s4924_s26 }
 0x481   : > { %2969 = vrot.lane.b32.xlu0 %v6326_v32, %s4924_s26 }
 0x482   : > { %2967 = vrot.lane.b32.xlu1 %v6334_v5, %s4924_s26 }
 0x483   : > { %v2622_v25 = vpop.permute.xlu0 %2621 }
 0x484   : > { %2696 = vst.msk [vmem:[#allocation5 + $0xa8] sm:$0xff] %vm592_vm3, %v2622_v25  ;;  %v2620_v42 = vpop.permute.xlu1 %2619 }
 0x485   : > { %2695 = vst.msk [vmem:[#allocation5 + $0xa0] sm:$0xff] %vm592_vm3, %v2620_v42  ;;  %2973 = vrot.lane.b32.xlu0 %v6346_v22, %s4924_s26  ;;  %v2929_v42 = vld [vmem:[#allocation3 + $0x180] sm:$0xff] }
 0x486   : > { %2971 = vrot.lane.b32.xlu1 %v6354_v39, %s4924_s26 }
 0x489   : > { %2977 = vrot.lane.b32.xlu0 %v6366_v47, %s4924_s26 }
 0x48a   : > { %2975 = vrot.lane.b32.xlu1 %v6374_v34, %s4924_s26 }
 0x48b   : > { %v2626_v9 = vpop.permute.xlu0 %2625 }
 0x48c   : > { %2698 = vst.msk [vmem:[#allocation5 + $0xb8] sm:$0xff] %vm592_vm3, %v2626_v9  ;;  %v2624_v4 = vpop.permute.xlu1 %2623 }
 0x48d   : > { %2697 = vst.msk [vmem:[#allocation5 + $0xb0] sm:$0xff] %vm592_vm3, %v2624_v4  ;;  %2981 = vrot.lane.b32.xlu0 %v6381_v56, %s4924_s26 }
 0x48e   : > { %2979 = vrot.lane.b32.xlu1 %v6388_v31, %s4924_s26 }
 0x491   : > { %2985 = vrot.lane.b32.xlu0 %v6394_v52, %s4924_s26 }
 0x492   : > { %2983 = vrot.lane.b32.xlu1 %v6401_v1, %s4924_s26 }
 0x493   : > { %v2630_v41 = vpop.permute.xlu0 %2629 }
 0x494   : > { %2700 = vst.msk [vmem:[#allocation5 + $0xc8] sm:$0xff] %vm592_vm3, %v2630_v41  ;;  %v2628_v57 = vpop.permute.xlu1 %2627 }
 0x495   : > { %2699 = vst.msk [vmem:[#allocation5 + $0xc0] sm:$0xff] %vm592_vm3, %v2628_v57  ;;  %2989 = vrot.lane.b32.xlu0 %v6407_v2, %s4924_s26 }
 0x496   : > { %2987 = vrot.lane.b32.xlu1 %v6413_v20, %s4924_s26 }
 0x499   : > { %2993 = vrot.lane.b32.xlu0 %v6419_v58, %s4924_s26 }
 0x49a   : > { %2991 = vrot.lane.b32.xlu1 %v6425_v14, %s4924_s26 }
 0x49b   : > { %v2634_v43 = vpop.permute.xlu0 %2633 }
 0x49c   : > { %2702 = vst.msk [vmem:[#allocation5 + $0xd8] sm:$0xff] %vm592_vm3, %v2634_v43  ;;  %v2632_v11 = vpop.permute.xlu1 %2631 }
 0x49d   : > { %2701 = vst.msk [vmem:[#allocation5 + $0xd0] sm:$0xff] %vm592_vm3, %v2632_v11  ;;  %2997 = vrot.lane.b32.xlu0 %v6432_v3, %s4924_s26 }
 0x49e   : > { %2995 = vrot.lane.b32.xlu1 %v6438_v33, %s4924_s26 }
 0x4a1   : > { %3001 = vrot.lane.b32.xlu0 %v6446_v24, %s4924_s26 }
 0x4a2   : > { %2999 = vrot.lane.b32.xlu1 %v6452_v6, %s4924_s26 }
 0x4a3   : > { %v2638_v49 = vpop.permute.xlu0 %2637 }
 0x4a4   : > { %2704 = vst.msk [vmem:[#allocation5 + $0xe8] sm:$0xff] %vm592_vm3, %v2638_v49  ;;  %v2636_v44 = vpop.permute.xlu1 %2635  ;;  %v4087_v49 = vld [vmem:[%s7268_s3 + $0x18] sm:$0xff] }
 0x4a5   : > { %2703 = vst.msk [vmem:[#allocation5 + $0xe0] sm:$0xff] %vm592_vm3, %v2636_v44  ;;  %3005 = vrot.lane.b32.xlu0 %v6460_v26, %s4924_s26 }
 0x4a6   : > { %3003 = vrot.lane.b32.xlu1 %v6466_v27, %s4924_s26 }
 0x4a9   : > { %3009 = vrot.lane.b32.xlu0 %v6474_v53, %s4924_s26 }
 0x4aa   : > { %3007 = vrot.lane.b32.xlu1 %v6480_v38, %s4924_s26 }
 0x4ab   : > { %v2642_v50 = vpop.permute.xlu0 %2641 }
 0x4ac   : > { %2706 = vst.msk [vmem:[#allocation5 + $0xf8] sm:$0xff] %vm592_vm3, %v2642_v50  ;;  %v2640_v62 = vpop.permute.xlu1 %2639 }
 0x4ad   : > { %2705 = vst.msk [vmem:[#allocation5 + $0xf0] sm:$0xff] %vm592_vm3, %v2640_v62  ;;  %3013 = vrot.lane.b32.xlu0 %v6488_v28, %s4924_s26  ;;  %v2930_v28 = vld [vmem:[#allocation3 + $0x188] sm:$0xff] }
 0x4ae   : > { %3011 = vrot.lane.b32.xlu1 %v6494_v35, %s4924_s26 }
 0x4af   : > { %v2774_v15 = vpop.permute.xlu0 %2773 }
 0x4b0   : > { %2868 = vst.msk [vmem:[#allocation5 + $0x8] sm:$0xff] %vm785_vm4, %v2774_v15  ;;  %v2772_v25 = vpop.permute.xlu1 %2771 }
 0x4b1   : > { %2867 = vst.msk [vmem:[#allocation5] sm:$0xff] %vm785_vm4, %v2772_v25  ;;  %3017 = vrot.lane.b32.xlu0 %v6502_v51, %s4924_s26 }
 0x4b2   : > { %3015 = vrot.lane.b32.xlu1 %v6508_v46, %s4924_s26 }
 0x4b3   : > { %v2778_v53 = vpop.permute.xlu0 %2777 }
 0x4b4   : > { %2870 = vst.msk [vmem:[#allocation5 + $0x18] sm:$0xff] %vm785_vm4, %v2778_v53  ;;  %v2776_v38 = vpop.permute.xlu1 %2775 }
 0x4b5   : > { %2869 = vst.msk [vmem:[#allocation5 + $0x10] sm:$0xff] %vm785_vm4, %v2776_v38  ;;  %3021 = vrot.lane.b32.xlu0 %v6516_v55, %s4924_s26 }
 0x4b6   : > { %3019 = vrot.lane.b32.xlu1 %v6521_v7, %s4924_s26 }
 0x4b7   : > { %v2782_v35 = vpop.permute.xlu0 %2781 }
 0x4b8   : > { %2872 = vst.msk [vmem:[#allocation5 + $0x28] sm:$0xff] %vm785_vm4, %v2782_v35  ;;  %v2780_v51 = vpop.permute.xlu1 %2779 }
 0x4b9   : > { %2871 = vst.msk [vmem:[#allocation5 + $0x20] sm:$0xff] %vm785_vm4, %v2780_v51  ;;  %3025 = vrot.lane.b32.xlu0 %v2930_v28, %s4924_s26 }
 0x4ba   : > { %3023 = vrot.lane.b32.xlu1 %v2929_v42, %s4924_s26 }
 0x4bb   : > { %v2786_v46 = vpop.permute.xlu0 %2785 }
 0x4bc   : > { %2874 = vst.msk [vmem:[#allocation5 + $0x38] sm:$0xff] %vm785_vm4, %v2786_v46  ;;  %v2784_v9 = vpop.permute.xlu1 %2783 }
 0x4bd   : > { %2873 = vst.msk [vmem:[#allocation5 + $0x30] sm:$0xff] %vm785_vm4, %v2784_v9  ;;  %3157 = vrot.lane.b32.xlu0 %v6298_v19, %s4925_s27  ;;  %v4084_v19 = vld [vmem:[%s7268_s3] sm:$0xff] }
 0x4be   : > { %3155 = vrot.lane.b32.xlu1 %v6304_v0, %s4925_s27  ;;  %v4085_v0 = vld [vmem:[%s7268_s3 + $0x8] sm:$0xff] }
 0x4bf   : > { %v2790_v55 = vpop.permute.xlu0 %2789  ;;  %v4887_v57 = vpack.c.bf16 %v4085_v0, %v4084_v19 }
 0x4c0   : > { %2876 = vst.msk [vmem:[#allocation5 + $0x48] sm:$0xff] %vm785_vm4, %v2790_v55  ;;  %v2788_v7 = vpop.permute.xlu1 %2787 }
 0x4c1   : > { %2875 = vst.msk [vmem:[#allocation5 + $0x40] sm:$0xff] %vm785_vm4, %v2788_v7  ;;  %3161 = vrot.lane.b32.xlu0 %v6318_v23, %s4925_s27  ;;  %4888 = vmatprep.subr.bf16.mxu1 %v4887_v57 }
 0x4c2   : > { %3159 = vrot.lane.b32.xlu1 %v6324_v36, %s4925_s27  ;;  %4890 = vmatpush3.bf16.msra.mxu1 %v4887_v57 }
 0x4c3   : > { %v2794_v4 = vpop.permute.xlu0 %2793 }
 0x4c4   : > { %2878 = vst.msk [vmem:[#allocation5 + $0x58] sm:$0xff] %vm785_vm4, %v2794_v4  ;;  %v2792_v41 = vpop.permute.xlu1 %2791  ;;  %v3099_v4 = vld [vmem:[#allocation3 + $0x79] sm:$0xff] }
 0x4c5   : > { %2877 = vst.msk [vmem:[#allocation5 + $0x50] sm:$0xff] %vm785_vm4, %v2792_v41  ;;  %3347 = vrot.lane.b32.xlu0 %v6532_v8, %s4926_s28  ;;  %v4086_v8 = vld [vmem:[%s7268_s3 + $0x10] sm:$0xff] }
 0x4c6   : > { %3163 = vrot.lane.b32.xlu1 %v6344_v63, %s4925_s27  ;;  %v4891_v44 = vpack.c.bf16 %v4087_v49, %v4086_v8  ;;  %v3101_v49 = vld [vmem:[#allocation3 + $0x91] sm:$0xff] }
 0x4c7   : > { %v2798_v43 = vpop.permute.xlu0 %2797 }
 0x4c8   : > { %2880 = vst.msk [vmem:[#allocation5 + $0x68] sm:$0xff] %vm785_vm4, %v2798_v43  ;;  %v2796_v11 = vpop.permute.xlu1 %2795  ;;  %4892 = vmatprep.subr.bf16.mxu1 %v4891_v44 }
 0x4c9   : > { %2879 = vst.msk [vmem:[#allocation5 + $0x60] sm:$0xff] %vm785_vm4, %v2796_v11  ;;  %3540 = vrot.lane.b32.xlu0 %v6334_v5, %s4927_s29  ;;  %4894 = vmatpush3.bf16.msra.mxu1 %v4891_v44  ;;  %v4088_v5 = vld [vmem:[%s7268_s3 + $0x20] sm:$0xf] }
 0x4ca   : > { %3349 = vrot.lane.b32.xlu1 %v6528_v12, %s4926_s28  ;;  %4829 = vmatprep.subr.msk.mxu1 %vm2118_vm9, %v4088_v5 }
 0x4cb   : > { %v2802_v50 = vpop.permute.xlu0 %2801 }
 0x4cc   : > { %2882 = vst.msk [vmem:[#allocation5 + $0x78] sm:$0xff] %vm785_vm4, %v2802_v50  ;;  %v2800_v62 = vpop.permute.xlu1 %2799 }
 0x4cd   : > { %2881 = vst.msk [vmem:[#allocation5 + $0x70] sm:$0xff] %vm785_vm4, %v2800_v62  ;;  %3732 = vrot.lane.b32.xlu0 %v6324_v36, %s4928_s30  ;;  %4830 = vmatpush3.msk.msra.mxu1 %vm2118_vm9, %v4088_v5 }
 0x4ce   : > { %3542 = vrot.lane.b32.xlu1 %v6326_v32, %s4927_s29 }
 0x4cf   : > { %v2806_v12 = vpop.permute.xlu0 %2805 }
 0x4d0   : > { %2884 = vst.msk [vmem:[#allocation5 + $0x88] sm:$0xff] %vm785_vm4, %v2806_v12  ;;  %v2804_v15 = vpop.permute.xlu1 %2803 }
 0x4d1   : > { %2883 = vst.msk [vmem:[#allocation5 + $0x80] sm:$0xff] %vm785_vm4, %v2804_v15  ;;  %3924 = vrot.lane.b32.xlu0 %v6540_v10, %s4929_s6 }
 0x4d2   : > { %3734 = vrot.lane.b32.xlu1 %v6318_v23, %s4928_s30 }
 0x4d3   : > { %v2810_v36 = vpop.permute.xlu0 %2809 }
 0x4d4   : > { %2886 = vst.msk [vmem:[#allocation5 + $0x98] sm:$0xff] %vm785_vm4, %v2810_v36  ;;  %v2808_v32 = vpop.permute.xlu1 %2807 }
 0x4d5   : > { %2885 = vst.msk [vmem:[#allocation5 + $0x90] sm:$0xff] %vm785_vm4, %v2808_v32  ;;  %3926 = vrot.lane.b32.xlu0 %v6536_v30, %s4929_s6  ;;  %v3103_v32 = vld [vmem:[#allocation3 + $0xa9] sm:$0xff] }
 0x4d6   : > { %3351 = vrot.lane.b32.xlu1 %v6540_v10, %s4926_s28 }
 0x4d7   : > { %v2814_v25 = vpop.permute.xlu0 %2813 }
 0x4d8   : > { %2888 = vst.msk [vmem:[#allocation5 + $0xa8] sm:$0xff] %vm785_vm4, %v2814_v25  ;;  %v2812_v53 = vpop.permute.xlu1 %2811 }
 0x4d9   : > { %2887 = vst.msk [vmem:[#allocation5 + $0xa0] sm:$0xff] %vm785_vm4, %v2812_v53  ;;  %3544 = vrot.lane.b32.xlu0 %v6354_v39, %s4927_s29 }
 0x4da   : > { %3353 = vrot.lane.b32.xlu1 %v6536_v30, %s4926_s28 }
 0x4db   : > { %v2818_v23 = vpop.permute.xlu0 %2817 }
 0x4dc   : > { %2890 = vst.msk [vmem:[#allocation5 + $0xb8] sm:$0xff] %vm785_vm4, %v2818_v23  ;;  %v2816_v38 = vpop.permute.xlu1 %2815 }
 0x4dd   : > { %2889 = vst.msk [vmem:[#allocation5 + $0xb0] sm:$0xff] %vm785_vm4, %v2816_v38  ;;  %3736 = vrot.lane.b32.xlu0 %v6344_v63, %s4928_s30 }
 0x4de   : > { %3546 = vrot.lane.b32.xlu1 %v6346_v22, %s4927_s29 }
 0x4df   : > { %v2822_v10 = vpop.permute.xlu0 %2821 }
 0x4e0   : > { %2892 = vst.msk [vmem:[#allocation5 + $0xc8] sm:$0xff] %vm785_vm4, %v2822_v10  ;;  %v2820_v28 = vpop.permute.xlu1 %2819 }
 0x4e1   : > { %2891 = vst.msk [vmem:[#allocation5 + $0xc0] sm:$0xff] %vm785_vm4, %v2820_v28  ;;  %3928 = vrot.lane.b32.xlu0 %v6548_v16, %s4929_s6 }
 0x4e2   : > { %3738 = vrot.lane.b32.xlu1 %v6338_v48, %s4928_s30 }
 0x4e3   : > { %v2826_v39 = vpop.permute.xlu0 %2825 }
 0x4e4   : > { %2894 = vst.msk [vmem:[#allocation5 + $0xd8] sm:$0xff] %vm785_vm4, %v2826_v39  ;;  %v2824_v30 = vpop.permute.xlu1 %2823 }
 0x4e5   : > { %2893 = vst.msk [vmem:[#allocation5 + $0xd0] sm:$0xff] %vm785_vm4, %v2824_v30  ;;  %3355 = vrot.lane.b32.xlu0 %v6548_v16, %s4926_s28  ;;  %v3105_v30 = vld [vmem:[#allocation3 + $0xc1] sm:$0xff] }
 0x4e6   : > { %3165 = vrot.lane.b32.xlu1 %v6338_v48, %s4925_s27 }
 0x4e7   : > { %v2830_v63 = vpop.permute.xlu0 %2829 }
 0x4e8   : > { %2896 = vst.msk [vmem:[#allocation5 + $0xe8] sm:$0xff] %vm785_vm4, %v2830_v63  ;;  %v2828_v22 = vpop.permute.xlu1 %2827 }
 0x4e9   : > { %2895 = vst.msk [vmem:[#allocation5 + $0xe0] sm:$0xff] %vm785_vm4, %v2828_v22  ;;  %3357 = vrot.lane.b32.xlu0 %v6544_v54, %s4926_s28 }
 0x4ea   : > { %3930 = vrot.lane.b32.xlu1 %v6544_v54, %s4929_s6 }
 0x4eb   : > { %v2834_v35 = vpop.permute.xlu0 %2833 }
 0x4ec   : > { %2898 = vst.msk [vmem:[#allocation5 + $0xf8] sm:$0xff] %vm785_vm4, %v2834_v35  ;;  %v2832_v42 = vpop.permute.xlu1 %2831  ;;  %v3297_v35 = vld [vmem:[#allocation3 + $0xc2] sm:$0xff] }
 0x4ed   : > { %2897 = vst.msk [vmem:[#allocation5 + $0xf0] sm:$0xff] %vm785_vm4, %v2832_v42  ;;  %3550 = vrot.lane.b32.xlu0 %v6366_v47, %s4927_s29 }
 0x4ee   : > { %3548 = vrot.lane.b32.xlu1 %v6374_v34, %s4927_s29 }
 0x4ef   : > { %v2966_v48 = vpop.permute.xlu0 %2965 }
 0x4f0   : > { %3060 = vst.msk [vmem:[#allocation5 + $0x8] sm:$0xff] %vm978_vm5, %v2966_v48  ;;  %v2964_v16 = vpop.permute.xlu1 %2963 }
 0x4f1   : > { %3059 = vst.msk [vmem:[#allocation5] sm:$0xff] %vm978_vm5, %v2964_v16  ;;  %3167 = vrot.lane.b32.xlu0 %v6364_v21, %s4925_s27 }
 0x4f2   : > { %3740 = vrot.lane.b32.xlu1 %v6364_v21, %s4928_s30  ;;  %v3098_v21 = vld [vmem:[#allocation3 + $0x69] sm:$0xff] }
 0x4f3   : > { %v2970_v54 = vpop.permute.xlu0 %2969 }
 0x4f4   : > { %3062 = vst.msk [vmem:[#allocation5 + $0x18] sm:$0xff] %vm978_vm5, %v2970_v54  ;;  %v2968_v51 = vpop.permute.xlu1 %2967 }
 0x4f5   : > { %3061 = vst.msk [vmem:[#allocation5 + $0x10] sm:$0xff] %vm978_vm5, %v2968_v51  ;;  %3932 = vrot.lane.b32.xlu0 %v6556_v59, %s4929_s6 }
 0x4f6   : > { %3742 = vrot.lane.b32.xlu1 %v6358_v17, %s4928_s30 }
 0x4f7   : > { %v2974_v47 = vpop.permute.xlu0 %2973 }
 0x4f8   : > { %3064 = vst.msk [vmem:[#allocation5 + $0x28] sm:$0xff] %vm978_vm5, %v2974_v47  ;;  %v2972_v34 = vpop.permute.xlu1 %2971 }
 0x4f9   : > { %3063 = vst.msk [vmem:[#allocation5 + $0x20] sm:$0xff] %vm978_vm5, %v2972_v34  ;;  %3359 = vrot.lane.b32.xlu0 %v6556_v59, %s4926_s28 }
 0x4fa   : > { %3169 = vrot.lane.b32.xlu1 %v3098_v21, %s4925_s27 }
 0x4fb   : > { %v2978_v46 = vpop.permute.xlu0 %2977 }
 0x4fc   : > { %3066 = vst.msk [vmem:[#allocation5 + $0x38] sm:$0xff] %vm978_vm5, %v2978_v46  ;;  %v2976_v9 = vpop.permute.xlu1 %2975  ;;  %v3107_v46 = vld [vmem:[#allocation3 + $0xd9] sm:$0xff] }
 0x4fd   : > { %3065 = vst.msk [vmem:[#allocation5 + $0x30] sm:$0xff] %vm978_vm5, %v2976_v9  ;;  %3361 = vrot.lane.b32.xlu0 %v6552_v18, %s4926_s28 }
 0x4fe   : > { %3934 = vrot.lane.b32.xlu1 %v6552_v18, %s4929_s6 }
 0x4ff   : > { %v2982_v17 = vpop.permute.xlu0 %2981 }
 0x500   : > { %3068 = vst.msk [vmem:[#allocation5 + $0x48] sm:$0xff] %vm978_vm5, %v2982_v17  ;;  %v2980_v55 = vpop.permute.xlu1 %2979 }
 0x501   : > { %3067 = vst.msk [vmem:[#allocation5 + $0x40] sm:$0xff] %vm978_vm5, %v2980_v55  ;;  %3554 = vrot.lane.b32.xlu0 %v6381_v56, %s4927_s29  ;;  %v3675_v56 = vld [vmem:[#allocation3 + $0x81] sm:$0xff] }
 0x502   : > { %3552 = vrot.lane.b32.xlu1 %v6388_v31, %s4927_s29  ;;  %v3874_v55 = vld [vmem:[#allocation3 + $0xda] sm:$0xff] }
 0x503   : > { %v2986_v59 = vpop.permute.xlu0 %2985 }
 0x504   : > { %3070 = vst.msk [vmem:[#allocation5 + $0x58] sm:$0xff] %vm978_vm5, %v2986_v59  ;;  %v2984_v7 = vpop.permute.xlu1 %2983 }
 0x505   : > { %3069 = vst.msk [vmem:[#allocation5 + $0x50] sm:$0xff] %vm978_vm5, %v2984_v7  ;;  %3171 = vrot.lane.b32.xlu0 %v3099_v4, %s4925_s27 }
 0x506   : > { %3744 = vrot.lane.b32.xlu1 %v3099_v4, %s4928_s30 }
 0x507   : > { %v2990_v18 = vpop.permute.xlu0 %2989 }
 0x508   : > { %3072 = vst.msk [vmem:[#allocation5 + $0x68] sm:$0xff] %vm978_vm5, %v2990_v18  ;;  %v2988_v41 = vpop.permute.xlu1 %2987 }
 0x509   : > { %3071 = vst.msk [vmem:[#allocation5 + $0x60] sm:$0xff] %vm978_vm5, %v2988_v41  ;;  %3936 = vrot.lane.b32.xlu0 %v6564_v29, %s4929_s6  ;;  %v3300_v41 = vld [vmem:[#allocation3 + $0xe2] sm:$0xff] }
 0x50a   : > { %3746 = vrot.lane.b32.xlu1 %v3675_v56, %s4928_s30 }
 0x50b   : > { %v2994_v31 = vpop.permute.xlu0 %2993 }
 0x50c   : > { %3074 = vst.msk [vmem:[#allocation5 + $0x78] sm:$0xff] %vm978_vm5, %v2994_v31  ;;  %v2992_v19 = vpop.permute.xlu1 %2991 }
 0x50d   : > { %3073 = vst.msk [vmem:[#allocation5 + $0x70] sm:$0xff] %vm978_vm5, %v2992_v19  ;;  %3363 = vrot.lane.b32.xlu0 %v6564_v29, %s4926_s28 }
 0x50e   : > { %3173 = vrot.lane.b32.xlu1 %v3675_v56, %s4925_s27 }
 0x50f   : > { %v2998_v0 = vpop.permute.xlu0 %2997 }
 0x510   : > { %3076 = vst.msk [vmem:[#allocation5 + $0x88] sm:$0xff] %vm978_vm5, %v2998_v0  ;;  %v2996_v57 = vpop.permute.xlu1 %2995 }
 0x511   : > { %3075 = vst.msk [vmem:[#allocation5 + $0x80] sm:$0xff] %vm978_vm5, %v2996_v57  ;;  %3365 = vrot.lane.b32.xlu0 %v6560_v45, %s4926_s28 }
 0x512   : > { %3938 = vrot.lane.b32.xlu1 %v6560_v45, %s4929_s6 }
 0x513   : > { %v3002_v43 = vpop.permute.xlu0 %3001 }
 0x514   : > { %3078 = vst.msk [vmem:[#allocation5 + $0x98] sm:$0xff] %vm978_vm5, %v3002_v43  ;;  %v3000_v11 = vpop.permute.xlu1 %2999  ;;  %v3109_v43 = vld [vmem:[#allocation3 + $0xf1] sm:$0xff] }
 0x515   : > { %3077 = vst.msk [vmem:[#allocation5 + $0x90] sm:$0xff] %vm978_vm5, %v3000_v11  ;;  %3558 = vrot.lane.b32.xlu0 %v6394_v52, %s4927_s29  ;;  %v3677_v52 = vld [vmem:[#allocation3 + $0x99] sm:$0xff] }
 0x516   : > { %3556 = vrot.lane.b32.xlu1 %v6401_v1, %s4927_s29 }
 0x517   : > { %v3006_v29 = vpop.permute.xlu0 %3005 }
 0x518   : > { %3080 = vst.msk [vmem:[#allocation5 + $0xa8] sm:$0xff] %vm978_vm5, %v3006_v29  ;;  %v3004_v8 = vpop.permute.xlu1 %3003  ;;  %v3876_v29 = vld [vmem:[#allocation3 + $0xf2] sm:$0xff] }
 0x519   : > { %3079 = vst.msk [vmem:[#allocation5 + $0xa0] sm:$0xff] %vm978_vm5, %v3004_v8  ;;  %3175 = vrot.lane.b32.xlu0 %v3101_v49, %s4925_s27 }
 0x51a   : > { %3748 = vrot.lane.b32.xlu1 %v3101_v49, %s4928_s30 }
 0x51b   : > { %v3010_v45 = vpop.permute.xlu0 %3009 }
 0x51c   : > { %3082 = vst.msk [vmem:[#allocation5 + $0xb8] sm:$0xff] %vm978_vm5, %v3010_v45  ;;  %v3008_v44 = vpop.permute.xlu1 %3007 }
 0x51d   : > { %3081 = vst.msk [vmem:[#allocation5 + $0xb0] sm:$0xff] %vm978_vm5, %v3008_v44  ;;  %3940 = vrot.lane.b32.xlu0 %v6572_v61, %s4929_s6 }
 0x51e   : > { %3750 = vrot.lane.b32.xlu1 %v3677_v52, %s4928_s30 }
 0x51f   : > { %v3014_v1 = vpop.permute.xlu0 %3013 }
 0x520   : > { %3084 = vst.msk [vmem:[#allocation5 + $0xc8] sm:$0xff] %vm978_vm5, %v3014_v1  ;;  %v3012_v50 = vpop.permute.xlu1 %3011  ;;  %v3302_v1 = vld [vmem:[#allocation3 + $0xfa] sm:$0xff] }
 0x521   : > { %3083 = vst.msk [vmem:[#allocation5 + $0xc0] sm:$0xff] %vm978_vm5, %v3012_v50  ;;  %3367 = vrot.lane.b32.xlu0 %v6572_v61, %s4926_s28 }
 0x522   : > { %3177 = vrot.lane.b32.xlu1 %v3677_v52, %s4925_s27 }
 0x523   : > { %v3018_v62 = vpop.permute.xlu0 %3017 }
 0x524   : > { %3086 = vst.msk [vmem:[#allocation5 + $0xd8] sm:$0xff] %vm978_vm5, %v3018_v62  ;;  %v3016_v5 = vpop.permute.xlu1 %3015 }
 0x525   : > { %3085 = vst.msk [vmem:[#allocation5 + $0xd0] sm:$0xff] %vm978_vm5, %v3016_v5  ;;  %3369 = vrot.lane.b32.xlu0 %v6568_v13, %s4926_s28 }
 0x526   : > { %3942 = vrot.lane.b32.xlu1 %v6568_v13, %s4929_s6 }
 0x527   : > { %v3022_v12 = vpop.permute.xlu0 %3021 }
 0x528   : > { %3088 = vst.msk [vmem:[#allocation5 + $0xe8] sm:$0xff] %vm978_vm5, %v3022_v12  ;;  %v3020_v15 = vpop.permute.xlu1 %3019 }
 0x529   : > { %3087 = vst.msk [vmem:[#allocation5 + $0xe0] sm:$0xff] %vm978_vm5, %v3020_v15  ;;  %3562 = vrot.lane.b32.xlu0 %v6407_v2, %s4927_s29  ;;  %v3679_v2 = vld [vmem:[#allocation3 + $0xb1] sm:$0xff] }
 0x52a   : > { %3560 = vrot.lane.b32.xlu1 %v6413_v20, %s4927_s29 }
 0x52b   : > { %v3026_v61 = vpop.permute.xlu0 %3025 }
 0x52c   : > { %3090 = vst.msk [vmem:[#allocation5 + $0xf8] sm:$0xff] %vm978_vm5, %v3026_v61  ;;  %v3024_v36 = vpop.permute.xlu1 %3023  ;;  %v3111_v61 = vld [vmem:[#allocation3 + $0x109] sm:$0xff] }
 0x52d   : > { %3089 = vst.msk [vmem:[#allocation5 + $0xf0] sm:$0xff] %vm978_vm5, %v3024_v36  ;;  %3179 = vrot.lane.b32.xlu0 %v3103_v32, %s4925_s27 }
 0x52e   : > { %3752 = vrot.lane.b32.xlu1 %v3103_v32, %s4928_s30  ;;  %v3878_v32 = vld [vmem:[#allocation3 + $0x10a] sm:$0xff] }
 0x52f   : > { %v3158_v13 = vpop.permute.xlu0 %3157 }
 0x530   : > { %3252 = vst.msk [vmem:[#allocation5 + $0x8] sm:$0xff] %vm1171_vm6, %v3158_v13  ;;  %v3156_v25 = vpop.permute.xlu1 %3155 }
 0x531   : > { %3251 = vst.msk [vmem:[#allocation5] sm:$0xff] %vm1171_vm6, %v3156_v25  ;;  %3944 = vrot.lane.b32.xlu0 %v6580_v40, %s4929_s6 }
 0x532   : > { %3754 = vrot.lane.b32.xlu1 %v3679_v2, %s4928_s30 }
 0x533   : > { %v3162_v20 = vpop.permute.xlu0 %3161 }
 0x534   : > { %3254 = vst.msk [vmem:[#allocation5 + $0x18] sm:$0xff] %vm1171_vm6, %v3162_v20  ;;  %v3160_v53 = vpop.permute.xlu1 %3159 }
 0x535   : > { %3253 = vst.msk [vmem:[#allocation5 + $0x10] sm:$0xff] %vm1171_vm6, %v3160_v53  ;;  %3371 = vrot.lane.b32.xlu0 %v6580_v40, %s4926_s28 }
 0x536   : > { %3181 = vrot.lane.b32.xlu1 %v3679_v2, %s4925_s27 }
 0x537   : > { %v3348_v23 = vpop.permute.xlu0 %3347 }
 0x538   : > { %3443 = vst.msk [vmem:[#allocation5] sm:$0xff] %vm1364_vm7, %v3348_v23  ;;  %v3164_v38 = vpop.permute.xlu1 %3163  ;;  %v3304_v23 = vld [vmem:[#allocation3 + $0x112] sm:$0xff] }
 0x539   : > { %3255 = vst.msk [vmem:[#allocation5 + $0x20] sm:$0xff] %vm1171_vm6, %v3164_v38  ;;  %3373 = vrot.lane.b32.xlu0 %v6576_v60, %s4926_s28 }
 0x53a   : > { %3946 = vrot.lane.b32.xlu1 %v6576_v60, %s4929_s6 }
 0x53b   : > { %v3541_v10 = vpop.permute.xlu0 %3540 }
 0x53c   : > { %3636 = vst.msk [vmem:[#allocation5] sm:$0xff] %vm1558_vm8, %v3541_v10  ;;  %v3350_v28 = vpop.permute.xlu1 %3349 }
 0x53d   : > { %3444 = vst.msk [vmem:[#allocation5 + $0x8] sm:$0xff] %vm1364_vm7, %v3350_v28  ;;  %3566 = vrot.lane.b32.xlu0 %v6419_v58, %s4927_s29  ;;  %v3681_v58 = vld [vmem:[#allocation3 + $0xc9] sm:$0xff] }
 0x53e   : > { %3564 = vrot.lane.b32.xlu1 %v6425_v14, %s4927_s29  ;;  %v3497_v28 = vld [vmem:[#allocation3 + $0x128] sm:$0xff] }
 0x53f   : > { %v3733_v40 = vpop.permute.xlu0 %3732 }
 0x540   : > { %3828 = vst.msk [vmem:[#allocation5] sm:$0xff] %vm1751_vm10, %v3733_v40  ;;  %v3543_v39 = vpop.permute.xlu1 %3542 }
 0x541   : > { %3637 = vst.msk [vmem:[#allocation5 + $0x8] sm:$0xff] %vm1558_vm8, %v3543_v39  ;;  %3183 = vrot.lane.b32.xlu0 %v3105_v30, %s4925_s27  ;;  %v3496_v39 = vld [vmem:[#allocation3 + $0x120] sm:$0xff] }
 0x542   : > { %3756 = vrot.lane.b32.xlu1 %v3105_v30, %s4928_s30 }
 0x543   : > { %v3925_v60 = vpop.permute.xlu0 %3924 }
 0x544   : > { %4020 = vst.msk [vmem:[#allocation5] sm:$0xff] %vm1944_vm11, %v3925_v60  ;;  %v3735_v63 = vpop.permute.xlu1 %3734 }
 0x545   : > { %3829 = vst.msk [vmem:[#allocation5 + $0x8] sm:$0xff] %vm1751_vm10, %v3735_v63  ;;  %3948 = vrot.lane.b32.xlu0 %v6587_v37, %s4929_s6  ;;  %v3298_v37 = vld [vmem:[#allocation3 + $0xca] sm:$0xff]  ;;  %v3113_v63 = vld [vmem:[#allocation3 + $0x121] sm:$0xff] }
 0x546   : > { %3758 = vrot.lane.b32.xlu1 %v3681_v58, %s4928_s30 }
 0x547   : > { %v3927_v14 = vpop.permute.xlu0 %3926 }
 0x548   : > { %4021 = vst.msk [vmem:[#allocation5 + $0x8] sm:$0xff] %vm1944_vm11, %v3927_v14  ;;  %v3352_v22 = vpop.permute.xlu1 %3351 }
 0x549   : > { %3445 = vst.msk [vmem:[#allocation5 + $0x10] sm:$0xff] %vm1364_vm7, %v3352_v22  ;;  %3375 = vrot.lane.b32.xlu0 %v3297_v35, %s4926_s28  ;;  %v3880_v22 = vld [vmem:[#allocation3 + $0x122] sm:$0xff] }
 0x54a   : > { %3185 = vrot.lane.b32.xlu1 %v3681_v58, %s4925_s27  ;;  %v3689_v35 = vld [vmem:[#allocation3 + $0x129] sm:$0xff] }
 0x54b   : > { %v3545_v42 = vpop.permute.xlu0 %3544  ;;  %v4052_v48 = vld [vmem:[#allocation5] sm:$0xff] }
 0x54c   : > { %3638 = vst.msk [vmem:[#allocation5 + $0x10] sm:$0xff] %vm1558_vm8, %v3545_v42  ;;  %v3354_v16 = vpop.permute.xlu1 %3353  ;;  %4831 = vmatprep.mubr.msk.f32.mxu1 %vm2021_vm12, %v4052_v48 }
 0x54d   : > { %3446 = vst.msk [vmem:[#allocation5 + $0x18] sm:$0xff] %vm1364_vm7, %v3354_v16  ;;  %3377 = vrot.lane.b32.xlu0 %v3298_v37, %s4926_s28 }
 0x54e   : > { %3950 = vrot.lane.b32.xlu1 %v3298_v37, %s4929_s6 }
 0x54f   : > { %v3737_v54 = vpop.permute.xlu0 %3736  ;;  %v4053_v51 = vld [vmem:[#allocation5 + $0x8] sm:$0xff] }
 0x550   : > { %3830 = vst.msk [vmem:[#allocation5 + $0x10] sm:$0xff] %vm1751_vm10, %v3737_v54  ;;  %v3547_v47 = vpop.permute.xlu1 %3546  ;;  %4832 = vmatmul.mubr.msk.f32.vlgmr.msra.gmra.mrb[0].mxu1 %vm2021_vm12, %v4053_v51  ;;  %v3306_v51 = vld [vmem:[#allocation3 + $0x12a] sm:$0xff] }
 0x551   : > { %3639 = vst.msk [vmem:[#allocation5 + $0x18] sm:$0xff] %vm1558_vm8, %v3547_v47  ;;  %3570 = vrot.lane.b32.xlu0 %v6432_v3, %s4927_s29  ;;  %v3683_v3 = vld [vmem:[#allocation3 + $0xe1] sm:$0xff] }
 0x552   : > { %3568 = vrot.lane.b32.xlu1 %v6438_v33, %s4927_s29 }
 0x553   : > { %v3929_v34 = vpop.permute.xlu0 %3928 }
 0x554   : > { %4022 = vst.msk [vmem:[#allocation5 + $0x10] sm:$0xff] %vm1944_vm11, %v3929_v34  ;;  %v3739_v21 = vpop.permute.xlu1 %3738 }
 0x555   : > { %3831 = vst.msk [vmem:[#allocation5 + $0x18] sm:$0xff] %vm1751_vm10, %v3739_v21  ;;  %3187 = vrot.lane.b32.xlu0 %v3107_v46, %s4925_s27  ;;  %v3499_v21 = vld [vmem:[#allocation3 + $0x140] sm:$0xff] }
 0x556   : > { %3760 = vrot.lane.b32.xlu1 %v3107_v46, %s4928_s30 }
 0x557   : > { %v3356_v9 = vpop.permute.xlu0 %3355 }
 0x558   : > { %3447 = vst.msk [vmem:[#allocation5 + $0x20] sm:$0xff] %vm1364_vm7, %v3356_v9  ;;  %v3166_v17 = vpop.permute.xlu1 %3165  ;;  %v3498_v9 = vld [vmem:[#allocation3 + $0x138] sm:$0xff] }
 0x559   : > { %3256 = vst.msk [vmem:[#allocation5 + $0x28] sm:$0xff] %vm1171_vm6, %v3166_v17  ;;  %3952 = vrot.lane.b32.xlu0 %v3874_v55, %s4929_s6 }
 0x55a   : > { %3762 = vrot.lane.b32.xlu1 %v3683_v3, %s4928_s30 }
 0x55b   : > { %v3358_v33 = vpop.permute.xlu0 %3357  ;;  %v4054_v59 = vld [vmem:[#allocation5 + $0x10] sm:$0xff] }
 0x55c   : > { %3448 = vst.msk [vmem:[#allocation5 + $0x28] sm:$0xff] %vm1364_vm7, %v3358_v33  ;;  %v3931_v7 = vpop.permute.xlu1 %3930  ;;  %4834 = vmatprep.mubr.msk.f32.mxu1 %vm2021_vm12, %v4054_v59 }
 0x55d   : > { %4023 = vst.msk [vmem:[#allocation5 + $0x18] sm:$0xff] %vm1944_vm11, %v3931_v7  ;;  %3379 = vrot.lane.b32.xlu0 %v3874_v55, %s4926_s28  ;;  %v3882_v7 = vld [vmem:[#allocation3 + $0x13a] sm:$0xff] }
 0x55e   : > { %3189 = vrot.lane.b32.xlu1 %v3683_v3, %s4925_s27  ;;  %v3115_v3 = vld [vmem:[#allocation3 + $0x139] sm:$0xff] }
 0x55f   : > { %v3551_v4 = vpop.permute.xlu0 %3550 }
 0x560   : > { %3641 = vst.msk [vmem:[#allocation5 + $0x28] sm:$0xff] %vm1558_vm8, %v3551_v4  ;;  %v3549_v18 = vpop.permute.xlu1 %3548  ;;  %v3691_v4 = vld [vmem:[#allocation3 + $0x141] sm:$0xff] }
 0x561   : > { %3640 = vst.msk [vmem:[#allocation5 + $0x20] sm:$0xff] %vm1558_vm8, %v3549_v18  ;;  %3381 = vrot.lane.b32.xlu0 %v3300_v41, %s4926_s28 }
 0x562   : > { %3954 = vrot.lane.b32.xlu1 %v3300_v41, %s4929_s6 }
 0x563   : > { %v3168_v56 = vpop.permute.xlu0 %3167 }
 0x564   : > { %3257 = vst.msk [vmem:[#allocation5 + $0x30] sm:$0xff] %vm1171_vm6, %v3168_v56  ;;  %v3741_v31 = vpop.permute.xlu1 %3740  ;;  %v4055_v19 = vld [vmem:[#allocation5 + $0x18] sm:$0xff] }
 0x565   : > { %3832 = vst.msk [vmem:[#allocation5 + $0x20] sm:$0xff] %vm1751_vm10, %v3741_v31  ;;  %3574 = vrot.lane.b32.xlu0 %v6446_v24, %s4927_s29  ;;  %4835 = vmatmul.mubr.msk.f32.gmra.mrb[2].mxu1 %vm2021_vm12, %v4055_v19 }
 0x566   : > { %3572 = vrot.lane.b32.xlu1 %v6452_v6, %s4927_s29  ;;  %v3685_v6 = vld [vmem:[#allocation3 + $0xf9] sm:$0xff] }
 0x567   : > { %v3933_v0 = vpop.permute.xlu0 %3932 }
 0x568   : > { %4024 = vst.msk [vmem:[#allocation5 + $0x20] sm:$0xff] %vm1944_vm11, %v3933_v0  ;;  %v3743_v57 = vpop.permute.xlu1 %3742  ;;  %v3308_v0 = vld [vmem:[#allocation3 + $0x142] sm:$0xff] }
 0x569   : > { %3833 = vst.msk [vmem:[#allocation5 + $0x28] sm:$0xff] %vm1751_vm10, %v3743_v57  ;;  %3191 = vrot.lane.b32.xlu0 %v3109_v43, %s4925_s27 }
 0x56a   : > { %3764 = vrot.lane.b32.xlu1 %v3109_v43, %s4928_s30 }
 0x56b   : > { %v3360_v11 = vpop.permute.xlu0 %3359 }
 0x56c   : > { %3449 = vst.msk [vmem:[#allocation5 + $0x30] sm:$0xff] %vm1364_vm7, %v3360_v11  ;;  %v3170_v24 = vpop.permute.xlu1 %3169  ;;  %v3501_v11 = vld [vmem:[#allocation3 + $0x158] sm:$0xff] }
 0x56d   : > { %3258 = vst.msk [vmem:[#allocation5 + $0x38] sm:$0xff] %vm1171_vm6, %v3170_v24  ;;  %3956 = vrot.lane.b32.xlu0 %v3876_v29, %s4929_s6 }
 0x56e   : > { %3766 = vrot.lane.b32.xlu1 %v3685_v6, %s4928_s30 }
 0x56f   : > { %v3362_v8 = vpop.permute.xlu0 %3361  ;;  %v4056_v49 = vld [vmem:[#allocation5 + $0x20] sm:$0xff] }
 0x570   : > { %3450 = vst.msk [vmem:[#allocation5 + $0x38] sm:$0xff] %vm1364_vm7, %v3362_v8  ;;  %v3935_v45 = vpop.permute.xlu1 %3934  ;;  %4837 = vmatprep.mubr.msk.f32.mxu1 %vm2021_vm12, %v4056_v49  ;;  %v3117_v49 = vld [vmem:[#allocation3 + $0x151] sm:$0xff] }
 0x571   : > { %4025 = vst.msk [vmem:[#allocation5 + $0x28] sm:$0xff] %vm1944_vm11, %v3935_v45  ;;  %3383 = vrot.lane.b32.xlu0 %v3876_v29, %s4926_s28  ;;  %v3500_v29 = vld [vmem:[#allocation3 + $0x150] sm:$0xff] }
 0x572   : > { %3193 = vrot.lane.b32.xlu1 %v3685_v6, %s4925_s27 }
 0x573   : > { %v3555_v44 = vpop.permute.xlu0 %3554 }
 0x574   : > { %3643 = vst.msk [vmem:[#allocation5 + $0x38] sm:$0xff] %vm1558_vm8, %v3555_v44  ;;  %v3553_v52 = vpop.permute.xlu1 %3552 }
 0x575   : > { %3642 = vst.msk [vmem:[#allocation5 + $0x30] sm:$0xff] %vm1558_vm8, %v3553_v52  ;;  %3385 = vrot.lane.b32.xlu0 %v3302_v1, %s4926_s28  ;;  %v3884_v52 = vld [vmem:[#allocation3 + $0x152] sm:$0xff] }
 0x576   : > { %3958 = vrot.lane.b32.xlu1 %v3302_v1, %s4929_s6  ;;  %v3693_v1 = vld [vmem:[#allocation3 + $0x159] sm:$0xff] }
 0x577   : > { %v3172_v50 = vpop.permute.xlu0 %3171 }
 0x578   : > { %3259 = vst.msk [vmem:[#allocation5 + $0x40] sm:$0xff] %vm1171_vm6, %v3172_v50  ;;  %v3745_v62 = vpop.permute.xlu1 %3744  ;;  %v4057_v5 = vld [vmem:[#allocation5 + $0x28] sm:$0xff] }
 0x579   : > { %3834 = vst.msk [vmem:[#allocation5 + $0x30] sm:$0xff] %vm1751_vm10, %v3745_v62  ;;  %3578 = vrot.lane.b32.xlu0 %v6460_v26, %s4927_s29  ;;  %4838 = vmatmul.mubr.msk.f32.gmra.mrb[4].mxu1 %vm2021_vm12, %v4057_v5 }
 0x57a   : > { %3576 = vrot.lane.b32.xlu1 %v6466_v27, %s4927_s29  ;;  %v3687_v27 = vld [vmem:[#allocation3 + $0x111] sm:$0xff] }
 0x57b   : > { %v3937_v12 = vpop.permute.xlu0 %3936 }
 0x57c   : > { %4026 = vst.msk [vmem:[#allocation5 + $0x30] sm:$0xff] %vm1944_vm11, %v3937_v12  ;;  %v3747_v15 = vpop.permute.xlu1 %3746 }
 0x57d   : > { %3835 = vst.msk [vmem:[#allocation5 + $0x38] sm:$0xff] %vm1751_vm10, %v3747_v15  ;;  %3195 = vrot.lane.b32.xlu0 %v3111_v61, %s4925_s27 }
 0x57e   : > { %3768 = vrot.lane.b32.xlu1 %v3111_v61, %s4928_s30  ;;  %v3310_v61 = vld [vmem:[#allocation3 + $0x15a] sm:$0xff] }
 0x57f   : > { %v3364_v36 = vpop.permute.xlu0 %3363 }
 0x580   : > { %3451 = vst.msk [vmem:[#allocation5 + $0x40] sm:$0xff] %vm1364_vm7, %v3364_v36  ;;  %v3174_v26 = vpop.permute.xlu1 %3173 }
 0x581   : > { %3260 = vst.msk [vmem:[#allocation5 + $0x48] sm:$0xff] %vm1171_vm6, %v3174_v26  ;;  %3960 = vrot.lane.b32.xlu0 %v3878_v32, %s4929_s6 }
 0x582   : > { %3770 = vrot.lane.b32.xlu1 %v3687_v27, %s4928_s30 }
 0x583   : > { %v3366_v13 = vpop.permute.xlu0 %3365  ;;  %v4058_v25 = vld [vmem:[#allocation5 + $0x30] sm:$0xff] }
 0x584   : > { %3452 = vst.msk [vmem:[#allocation5 + $0x48] sm:$0xff] %vm1364_vm7, %v3366_v13  ;;  %v3939_v2 = vpop.permute.xlu1 %3938  ;;  %4840 = vmatprep.mubr.msk.f32.mxu1 %vm2021_vm12, %v4058_v25  ;;  %v3502_v13 = vld [vmem:[#allocation3 + $0x168] sm:$0xff] }
 0x585   : > { %4027 = vst.msk [vmem:[#allocation5 + $0x38] sm:$0xff] %vm1944_vm11, %v3939_v2  ;;  %3387 = vrot.lane.b32.xlu0 %v3878_v32, %s4926_s28  ;;  %v3503_v32 = vld [vmem:[#allocation3 + $0x170] sm:$0xff] }
 0x586   : > { %3197 = vrot.lane.b32.xlu1 %v3687_v27, %s4925_s27 }
 0x587   : > { %v3559_v20 = vpop.permute.xlu0 %3558 }
 0x588   : > { %3645 = vst.msk [vmem:[#allocation5 + $0x48] sm:$0xff] %vm1558_vm8, %v3559_v20  ;;  %v3557_v53 = vpop.permute.xlu1 %3556  ;;  %v3119_v20 = vld [vmem:[#allocation3 + $0x169] sm:$0xff] }
 0x589   : > { %3644 = vst.msk [vmem:[#allocation5 + $0x40] sm:$0xff] %vm1558_vm8, %v3557_v53  ;;  %3389 = vrot.lane.b32.xlu0 %v3304_v23, %s4926_s28 }
 0x58a   : > { %3962 = vrot.lane.b32.xlu1 %v3304_v23, %s4929_s6 }
 0x58b   : > { %v3176_v38 = vpop.permute.xlu0 %3175 }
 0x58c   : > { %3261 = vst.msk [vmem:[#allocation5 + $0x50] sm:$0xff] %vm1171_vm6, %v3176_v38  ;;  %v3749_v10 = vpop.permute.xlu1 %3748  ;;  %v4059_v40 = vld [vmem:[#allocation5 + $0x38] sm:$0xff] }
 0x58d   : > { %3836 = vst.msk [vmem:[#allocation5 + $0x40] sm:$0xff] %vm1751_vm10, %v3749_v10  ;;  %3582 = vrot.lane.b32.xlu0 %v3497_v28, %s4927_s29  ;;  %4841 = vmatmul.mubr.msk.f32.gmra.mrb[6].mxu1 %vm2021_vm12, %v4059_v40  ;;  %v3886_v38 = vld [vmem:[#allocation3 + $0x16a] sm:$0xff] }
 0x58e   : > { %3580 = vrot.lane.b32.xlu1 %v3496_v39, %s4927_s29  ;;  %v3695_v10 = vld [vmem:[#allocation3 + $0x171] sm:$0xff] }
 0x58f   : > { %v3941_v30 = vpop.permute.xlu0 %3940 }
 0x590   : > { %4028 = vst.msk [vmem:[#allocation5 + $0x40] sm:$0xff] %vm1944_vm11, %v3941_v30  ;;  %v3751_v60 = vpop.permute.xlu1 %3750 }
 0x591   : > { %3837 = vst.msk [vmem:[#allocation5 + $0x48] sm:$0xff] %vm1751_vm10, %v3751_v60  ;;  %3199 = vrot.lane.b32.xlu0 %v3113_v63, %s4925_s27 }
 0x592   : > { %3772 = vrot.lane.b32.xlu1 %v3113_v63, %s4928_s30  ;;  %v3312_v63 = vld [vmem:[#allocation3 + $0x172] sm:$0xff] }
 0x593   : > { %v3368_v58 = vpop.permute.xlu0 %3367 }
 0x594   : > { %3453 = vst.msk [vmem:[#allocation5 + $0x50] sm:$0xff] %vm1364_vm7, %v3368_v58  ;;  %v3178_v14 = vpop.permute.xlu1 %3177 }
 0x595   : > { %3262 = vst.msk [vmem:[#allocation5 + $0x58] sm:$0xff] %vm1171_vm6, %v3178_v14  ;;  %3964 = vrot.lane.b32.xlu0 %v3880_v22, %s4929_s6 }
 0x596   : > { %3774 = vrot.lane.b32.xlu1 %v3689_v35, %s4928_s30 }
 0x597   : > { %v3370_v42 = vpop.permute.xlu0 %3369  ;;  %v4060_v48 = vld [vmem:[#allocation5 + $0x40] sm:$0xff] }
 0x598   : > { %3454 = vst.msk [vmem:[#allocation5 + $0x58] sm:$0xff] %vm1364_vm7, %v3370_v42  ;;  %v3943_v16 = vpop.permute.xlu1 %3942  ;;  %4843 = vmatprep.mubr.msk.f32.mxu1 %vm2021_vm12, %v4060_v48  ;;  %v3504_v42 = vld [vmem:[#allocation3 + $0x180] sm:$0xff] }
 0x599   : > { %4029 = vst.msk [vmem:[#allocation5 + $0x48] sm:$0xff] %vm1944_vm11, %v3943_v16  ;;  %3391 = vrot.lane.b32.xlu0 %v3880_v22, %s4926_s28  ;;  %v3505_v22 = vld [vmem:[#allocation3 + $0x188] sm:$0xff] }
 0x59a   : > { %3201 = vrot.lane.b32.xlu1 %v3689_v35, %s4925_s27 }
 0x59b   : > { %v3563_v37 = vpop.permute.xlu0 %3562 }
 0x59c   : > { %3647 = vst.msk [vmem:[#allocation5 + $0x58] sm:$0xff] %vm1558_vm8, %v3563_v37  ;;  %v3561_v54 = vpop.permute.xlu1 %3560  ;;  %v3121_v37 = vld [vmem:[#allocation3 + $0x181] sm:$0xff] }
 0x59d   : > { %3646 = vst.msk [vmem:[#allocation5 + $0x50] sm:$0xff] %vm1558_vm8, %v3561_v54  ;;  %3393 = vrot.lane.b32.xlu0 %v3306_v51, %s4926_s28 }
 0x59e   : > { %3966 = vrot.lane.b32.xlu1 %v3306_v51, %s4929_s6 }
 0x59f   : > { %v3180_v47 = vpop.permute.xlu0 %3179 }
 0x5a0   : > { %3263 = vst.msk [vmem:[#allocation5 + $0x60] sm:$0xff] %vm1171_vm6, %v3180_v47  ;;  %v3753_v34 = vpop.permute.xlu1 %3752  ;;  %v4061_v46 = vld [vmem:[#allocation5 + $0x48] sm:$0xff]  ;;  %v3888_v47 = vld [vmem:[#allocation3 + $0x182] sm:$0xff] }
 0x5a1   : > { %3838 = vst.msk [vmem:[#allocation5 + $0x50] sm:$0xff] %vm1751_vm10, %v3753_v34  ;;  %3586 = vrot.lane.b32.xlu0 %v3499_v21, %s4927_s29  ;;  %4844 = vmatmul.mubr.msk.f32.gmra.mrb[8].mxu1 %vm2021_vm12, %v4061_v46  ;;  %v3697_v34 = vld [vmem:[#allocation3 + $0x189] sm:$0xff] }
 0x5a2   : > { %3584 = vrot.lane.b32.xlu1 %v3498_v9, %s4927_s29 }
 0x5a3   : > { %v3945_v17 = vpop.permute.xlu0 %3944 }
 0x5a4   : > { %4030 = vst.msk [vmem:[#allocation5 + $0x50] sm:$0xff] %vm1944_vm11, %v3945_v17  ;;  %v3755_v55 = vpop.permute.xlu1 %3754 }
 0x5a5   : > { %3839 = vst.msk [vmem:[#allocation5 + $0x58] sm:$0xff] %vm1751_vm10, %v3755_v55  ;;  %3203 = vrot.lane.b32.xlu0 %v3115_v3, %s4925_s27 }
 0x5a6   : > { %3776 = vrot.lane.b32.xlu1 %v3115_v3, %s4928_s30  ;;  %v3314_v3 = vld [vmem:[#allocation3 + $0x18a] sm:$0xff] }
 0x5a7   : > { %v3372_v33 = vpop.permute.xlu0 %3371 }
 0x5a8   : > { %3455 = vst.msk [vmem:[#allocation5 + $0x60] sm:$0xff] %vm1364_vm7, %v3372_v33  ;;  %v3182_v59 = vpop.permute.xlu1 %3181  ;;  %v3507_v33 = vld [vmem:[#allocation3 + $0x1a0] sm:$0xff] }
 0x5a9   : > { %3264 = vst.msk [vmem:[#allocation5 + $0x68] sm:$0xff] %vm1171_vm6, %v3182_v59  ;;  %3968 = vrot.lane.b32.xlu0 %v3882_v7, %s4929_s6 }
 0x5aa   : > { %3778 = vrot.lane.b32.xlu1 %v3691_v4, %s4928_s30 }
 0x5ab   : > { %v3374_v18 = vpop.permute.xlu0 %3373  ;;  %v4062_v41 = vld [vmem:[#allocation5 + $0x50] sm:$0xff] }
 0x5ac   : > { %3456 = vst.msk [vmem:[#allocation5 + $0x68] sm:$0xff] %vm1364_vm7, %v3374_v18  ;;  %v3947_v56 = vpop.permute.xlu1 %3946  ;;  %4846 = vmatprep.mubr.msk.f32.mxu1 %vm2021_vm12, %v4062_v41  ;;  %v3699_v41 = vld [vmem:[#allocation3 + $0x1a1] sm:$0xff] }
 0x5ad   : > { %4031 = vst.msk [vmem:[#allocation5 + $0x58] sm:$0xff] %vm1944_vm11, %v3947_v56  ;;  %3395 = vrot.lane.b32.xlu0 %v3882_v7, %s4926_s28  ;;  %v3506_v7 = vld [vmem:[#allocation3 + $0x198] sm:$0xff] }
 0x5ae   : > { %3205 = vrot.lane.b32.xlu1 %v3691_v4, %s4925_s27 }
 0x5af   : > { %v3567_v31 = vpop.permute.xlu0 %3566 }
 0x5b0   : > { %3649 = vst.msk [vmem:[#allocation5 + $0x68] sm:$0xff] %vm1558_vm8, %v3567_v31  ;;  %v3565_v19 = vpop.permute.xlu1 %3564  ;;  %v3698_v31 = vld [vmem:[#allocation3 + $0x199] sm:$0xff] }
 0x5b1   : > { %3648 = vst.msk [vmem:[#allocation5 + $0x60] sm:$0xff] %vm1558_vm8, %v3565_v19  ;;  %3397 = vrot.lane.b32.xlu0 %v3308_v0, %s4926_s28 }
 0x5b2   : > { %3970 = vrot.lane.b32.xlu1 %v3308_v0, %s4929_s6  ;;  %v3891_v0 = vld [vmem:[#allocation3 + $0x1a2] sm:$0xff] }
 0x5b3   : > { %v3184_v57 = vpop.permute.xlu0 %3183 }
 0x5b4   : > { %3265 = vst.msk [vmem:[#allocation5 + $0x70] sm:$0xff] %vm1171_vm6, %v3184_v57  ;;  %v3757_v43 = vpop.permute.xlu1 %3756  ;;  %v4063_v24 = vld [vmem:[#allocation5 + $0x58] sm:$0xff] }
 0x5b5   : > { %3840 = vst.msk [vmem:[#allocation5 + $0x60] sm:$0xff] %vm1751_vm10, %v3757_v43  ;;  %3590 = vrot.lane.b32.xlu0 %v3501_v11, %s4927_s29  ;;  %4847 = vmatmul.mubr.msk.f32.gmra.mrb[10].mxu1 %vm2021_vm12, %v4063_v24  ;;  %v3890_v43 = vld [vmem:[#allocation3 + $0x19a] sm:$0xff] }
 0x5b6   : > { %3588 = vrot.lane.b32.xlu1 %v3500_v29, %s4927_s29 }
 0x5b7   : > { %v3949_v6 = vpop.permute.xlu0 %3948 }
 0x5b8   : > { %4032 = vst.msk [vmem:[#allocation5 + $0x60] sm:$0xff] %vm1944_vm11, %v3949_v6  ;;  %v3759_v8 = vpop.permute.xlu1 %3758 }
 0x5b9   : > { %3841 = vst.msk [vmem:[#allocation5 + $0x68] sm:$0xff] %vm1751_vm10, %v3759_v8  ;;  %3207 = vrot.lane.b32.xlu0 %v3117_v49, %s4925_s27 }
 0x5ba   : > { %3780 = vrot.lane.b32.xlu1 %v3117_v49, %s4928_s30 }
 0x5bb   : > { %v3376_v45 = vpop.permute.xlu0 %3375 }
 0x5bc   : > { %3457 = vst.msk [vmem:[#allocation5 + $0x70] sm:$0xff] %vm1364_vm7, %v3376_v45  ;;  %v3186_v44 = vpop.permute.xlu1 %3185 }
 0x5bd   : > { %3266 = vst.msk [vmem:[#allocation5 + $0x78] sm:$0xff] %vm1171_vm6, %v3186_v44  ;;  %3972 = vrot.lane.b32.xlu0 %v3884_v52, %s4929_s6 }
 0x5be   : > { %3782 = vrot.lane.b32.xlu1 %v3693_v1, %s4928_s30 }
 0x5bf   : > { %v3378_v50 = vpop.permute.xlu0 %3377  ;;  %v4064_v62 = vld [vmem:[#allocation5 + $0x60] sm:$0xff] }
 0x5c0   : > { %3458 = vst.msk [vmem:[#allocation5 + $0x78] sm:$0xff] %vm1364_vm7, %v3378_v50  ;;  %v3951_v5 = vpop.permute.xlu1 %3950  ;;  %4849 = vmatprep.mubr.msk.f32.mxu1 %vm2021_vm12, %v4064_v62 }
 0x5c1   : > { %4033 = vst.msk [vmem:[#allocation5 + $0x68] sm:$0xff] %vm1944_vm11, %v3951_v5  ;;  %3399 = vrot.lane.b32.xlu0 %v3884_v52, %s4926_s28 }
 0x5c2   : > { %3209 = vrot.lane.b32.xlu1 %v3693_v1, %s4925_s27 }
 0x5c3   : > { %v3571_v12 = vpop.permute.xlu0 %3570 }
 0x5c4   : > { %3651 = vst.msk [vmem:[#allocation5 + $0x78] sm:$0xff] %vm1558_vm8, %v3571_v12  ;;  %v3569_v15 = vpop.permute.xlu1 %3568 }
 0x5c5   : > { %3650 = vst.msk [vmem:[#allocation5 + $0x70] sm:$0xff] %vm1558_vm8, %v3569_v15  ;;  %3401 = vrot.lane.b32.xlu0 %v3310_v61, %s4926_s28 }
 0x5c6   : > { %3974 = vrot.lane.b32.xlu1 %v3310_v61, %s4929_s6 }
 0x5c7   : > { %v3188_v36 = vpop.permute.xlu0 %3187 }
 0x5c8   : > { %3267 = vst.msk [vmem:[#allocation5 + $0x80] sm:$0xff] %vm1171_vm6, %v3188_v36  ;;  %v3761_v26 = vpop.permute.xlu1 %3760  ;;  %v4065_v27 = vld [vmem:[#allocation5 + $0x68] sm:$0xff] }
 0x5c9   : > { %3842 = vst.msk [vmem:[#allocation5 + $0x70] sm:$0xff] %vm1751_vm10, %v3761_v26  ;;  %3594 = vrot.lane.b32.xlu0 %v3503_v32, %s4927_s29  ;;  %4850 = vmatmul.mubr.msk.f32.gmra.mrb[12].mxu1 %vm2021_vm12, %v4065_v27 }
 0x5ca   : > { %3592 = vrot.lane.b32.xlu1 %v3502_v13, %s4927_s29 }
 0x5cb   : > { %v3953_v25 = vpop.permute.xlu0 %3952 }
 0x5cc   : > { %4034 = vst.msk [vmem:[#allocation5 + $0x70] sm:$0xff] %vm1944_vm11, %v3953_v25  ;;  %v3763_v2 = vpop.permute.xlu1 %3762 }
 0x5cd   : > { %3843 = vst.msk [vmem:[#allocation5 + $0x78] sm:$0xff] %vm1751_vm10, %v3763_v2  ;;  %3211 = vrot.lane.b32.xlu0 %v3119_v20, %s4925_s27 }
 0x5ce   : > { %3784 = vrot.lane.b32.xlu1 %v3119_v20, %s4928_s30 }
 0x5cf   : > { %v3380_v53 = vpop.permute.xlu0 %3379 }
 0x5d0   : > { %3459 = vst.msk [vmem:[#allocation5 + $0x80] sm:$0xff] %vm1364_vm7, %v3380_v53  ;;  %v3190_v23 = vpop.permute.xlu1 %3189 }
 0x5d1   : > { %3268 = vst.msk [vmem:[#allocation5 + $0x88] sm:$0xff] %vm1171_vm6, %v3190_v23  ;;  %3976 = vrot.lane.b32.xlu0 %v3886_v38, %s4929_s6  ;;  %v7143_v23 = vld [vmem:[%s7269_s4] ss:$0 sm:$0xff] }
 0x5d2   : > { %3786 = vrot.lane.b32.xlu1 %v3695_v10, %s4928_s30 }
 0x5d3   : > { %v3382_v28 = vpop.permute.xlu0 %3381  ;;  %v4066_v40 = vld [vmem:[#allocation5 + $0x70] sm:$0xff] }
 0x5d4   : > { %3460 = vst.msk [vmem:[#allocation5 + $0x88] sm:$0xff] %vm1364_vm7, %v3382_v28  ;;  %v3955_v39 = vpop.permute.xlu1 %3954  ;;  %4852 = vmatprep.mubr.msk.f32.mxu1 %vm2021_vm12, %v4066_v40 }
 0x5d5   : > { %4035 = vst.msk [vmem:[#allocation5 + $0x78] sm:$0xff] %vm1944_vm11, %v3955_v39  ;;  %3403 = vrot.lane.b32.xlu0 %v3886_v38, %s4926_s28 }
 0x5d6   : > { %3213 = vrot.lane.b32.xlu1 %v3695_v10, %s4925_s27 }
 0x5d7   : > { %v3575_v30 = vpop.permute.xlu0 %3574 }
 0x5d8   : > { %3653 = vst.msk [vmem:[#allocation5 + $0x88] sm:$0xff] %vm1558_vm8, %v3575_v30  ;;  %v3573_v60 = vpop.permute.xlu1 %3572 }
 0x5d9   : > { %3652 = vst.msk [vmem:[#allocation5 + $0x80] sm:$0xff] %vm1558_vm8, %v3573_v60  ;;  %3405 = vrot.lane.b32.xlu0 %v3312_v63, %s4926_s28 }
 0x5da   : > { %3978 = vrot.lane.b32.xlu1 %v3312_v63, %s4929_s6  ;;  %v7392_v63 = vld [vmem:[#allocation6_spill] sm:$0xff] }
 0x5db   : > { %v3192_v58 = vpop.permute.xlu0 %3191 }
 0x5dc   : > { %3269 = vst.msk [vmem:[#allocation5 + $0x90] sm:$0xff] %vm1171_vm6, %v3192_v58  ;;  %v3765_v14 = vpop.permute.xlu1 %3764  ;;  %v4067_v35 = vld [vmem:[#allocation5 + $0x78] sm:$0xff] }
 0x5dd   : > { %3844 = vst.msk [vmem:[#allocation5 + $0x80] sm:$0xff] %vm1751_vm10, %v3765_v14  ;;  %3598 = vrot.lane.b32.xlu0 %v3505_v22, %s4927_s29  ;;  %4853 = vmatmul.mubr.msk.f32.gmra.mrb[14].mxu1 %vm2021_vm12, %v4067_v35  ;;  %v7393_v35 = vld [vmem:[#allocation7_spill] sm:$0xff] }
 0x5de   : > { %3596 = vrot.lane.b32.xlu1 %v3504_v42, %s4927_s29 }
 0x5df   : > { %v3957_v48 = vpop.permute.xlu0 %3956 }
 0x5e0   : > { %4036 = vst.msk [vmem:[#allocation5 + $0x80] sm:$0xff] %vm1944_vm11, %v3957_v48  ;;  %v3767_v16 = vpop.permute.xlu1 %3766 }
 0x5e1   : > { %3845 = vst.msk [vmem:[#allocation5 + $0x88] sm:$0xff] %vm1751_vm10, %v3767_v16  ;;  %3215 = vrot.lane.b32.xlu0 %v3121_v37, %s4925_s27 }
 0x5e2   : > { %3788 = vrot.lane.b32.xlu1 %v3121_v37, %s4928_s30 }
 0x5e3   : > { %v3384_v54 = vpop.permute.xlu0 %3383 }
 0x5e4   : > { %3461 = vst.msk [vmem:[#allocation5 + $0x90] sm:$0xff] %vm1364_vm7, %v3384_v54  ;;  %v3194_v51 = vpop.permute.xlu1 %3193 }
 0x5e5   : > { %3270 = vst.msk [vmem:[#allocation5 + $0x98] sm:$0xff] %vm1171_vm6, %v3194_v51  ;;  %3980 = vrot.lane.b32.xlu0 %v3888_v47, %s4929_s6 }
 0x5e6   : > { %3790 = vrot.lane.b32.xlu1 %v3697_v34, %s4928_s30 }
 0x5e7   : > { %v3386_v21 = vpop.permute.xlu0 %3385  ;;  %v4068_v46 = vld [vmem:[#allocation5 + $0x80] sm:$0xff] }
 0x5e8   : > { %3462 = vst.msk [vmem:[#allocation5 + $0x98] sm:$0xff] %vm1364_vm7, %v3386_v21  ;;  %v3959_v9 = vpop.permute.xlu1 %3958  ;;  %4855 = vmatprep.mubr.msk.f32.mxu1 %vm2021_vm12, %v4068_v46 }
 0x5e9   : > { %4037 = vst.msk [vmem:[#allocation5 + $0x88] sm:$0xff] %vm1944_vm11, %v3959_v9  ;;  %3407 = vrot.lane.b32.xlu0 %v3888_v47, %s4926_s28 }
 0x5ea   : > { %3217 = vrot.lane.b32.xlu1 %v3697_v34, %s4925_s27 }
 0x5eb   : > { %v3579_v17 = vpop.permute.xlu0 %3578 }
 0x5ec   : > { %3655 = vst.msk [vmem:[#allocation5 + $0x98] sm:$0xff] %vm1558_vm8, %v3579_v17  ;;  %v3577_v55 = vpop.permute.xlu1 %3576 }
 0x5ed   : > { %3654 = vst.msk [vmem:[#allocation5 + $0x90] sm:$0xff] %vm1558_vm8, %v3577_v55  ;;  %3409 = vrot.lane.b32.xlu0 %v3314_v3, %s4926_s28 }
 0x5ee   : > { %3982 = vrot.lane.b32.xlu1 %v3314_v3, %s4929_s6 }
 0x5ef   : > { %v3196_v59 = vpop.permute.xlu0 %3195 }
 0x5f0   : > { %3271 = vst.msk [vmem:[#allocation5 + $0xa0] sm:$0xff] %vm1171_vm6, %v3196_v59  ;;  %v3769_v4 = vpop.permute.xlu1 %3768  ;;  %v4069_v18 = vld [vmem:[#allocation5 + $0x88] sm:$0xff] }
 0x5f1   : > { %3846 = vst.msk [vmem:[#allocation5 + $0x90] sm:$0xff] %vm1751_vm10, %v3769_v4  ;;  %4856 = vmatmul.mubr.msk.f32.gmra.mrb[16].mxu1 %vm2021_vm12, %v4069_v18  ;;  %3602 = vrot.lane.b32.xlu0 %v3507_v33, %s4927_s29  ;;  %v7394_v18 = vld [vmem:[#allocation8_spill] sm:$0xff] }
 0x5f2   : > { %3600 = vrot.lane.b32.xlu1 %v3506_v7, %s4927_s29 }
 0x5f3   : > { %v3961_v56 = vpop.permute.xlu0 %3960 }
 0x5f4   : > { %4038 = vst.msk [vmem:[#allocation5 + $0x90] sm:$0xff] %vm1944_vm11, %v3961_v56  ;;  %v3771_v19 = vpop.permute.xlu1 %3770 }
 0x5f5   : > { %3847 = vst.msk [vmem:[#allocation5 + $0x98] sm:$0xff] %vm1751_vm10, %v3771_v19  ;;  %3794 = vrot.lane.b32.xlu0 %v3699_v41, %s4928_s30 }
 0x5f6   : > { %3792 = vrot.lane.b32.xlu1 %v3698_v31, %s4928_s30  ;;  %v7395_v31 = vld [vmem:[#allocation9_spill] sm:$0xff] }
 0x5f7   : > { %v3388_v57 = vpop.permute.xlu0 %3387 }
 0x5f8   : > { %3463 = vst.msk [vmem:[#allocation5 + $0xa0] sm:$0xff] %vm1364_vm7, %v3388_v57  ;;  %v3198_v11 = vpop.permute.xlu1 %3197 }
 0x5f9   : > { %3272 = vst.msk [vmem:[#allocation5 + $0xa8] sm:$0xff] %vm1171_vm6, %v3198_v11  ;;  %3986 = vrot.lane.b32.xlu0 %v3891_v0, %s4929_s6 }
 0x5fa   : > { %3984 = vrot.lane.b32.xlu1 %v3890_v43, %s4929_s6  ;;  %s224_s6 = scalar_lea.vmem %s7270_s5, %s4687_s20 }
 0x5fb   : > { %v3390_v24 = vpop.permute.xlu0 %3389  ;;  %v4070_v29 = vld [vmem:[#allocation5 + $0x90] sm:$0xff] }
 0x5fc   : > { %3464 = vst.msk [vmem:[#allocation5 + $0xa8] sm:$0xff] %vm1364_vm7, %v3390_v24  ;;  %v3963_v6 = vpop.permute.xlu1 %3962  ;;  %4858 = vmatprep.mubr.msk.f32.mxu1 %vm2021_vm12, %v4070_v29 }
 0x5fd   : > { %4039 = vst.msk [vmem:[#allocation5 + $0x98] sm:$0xff] %vm1944_vm11, %v3963_v6 }
 0x5ff   : > { %v3583_v8 = vpop.permute.xlu0 %3582 }
 0x600   : > { %3657 = vst.msk [vmem:[#allocation5 + $0xa8] sm:$0xff] %vm1558_vm8, %v3583_v8  ;;  %v3581_v49 = vpop.permute.xlu1 %3580 }
 0x601   : > { %3656 = vst.msk [vmem:[#allocation5 + $0xa0] sm:$0xff] %vm1558_vm8, %v3581_v49 }
 0x603   : > { %v3200_v45 = vpop.permute.xlu0 %3199 }
 0x604   : > { %3273 = vst.msk [vmem:[#allocation5 + $0xb0] sm:$0xff] %vm1171_vm6, %v3200_v45  ;;  %v3773_v44 = vpop.permute.xlu1 %3772  ;;  %v4071_v52 = vld [vmem:[#allocation5 + $0x98] sm:$0xff] }
 0x605   : > { %3848 = vst.msk [vmem:[#allocation5 + $0xa0] sm:$0xff] %vm1751_vm10, %v3773_v44  ;;  %4859 = vmatmul.mubr.msk.f32.gmra.mrb[18].mxu1 %vm2021_vm12, %v4071_v52 }
 0x607   : > { %v3965_v1 = vpop.permute.xlu0 %3964 }
 0x608   : > { %4040 = vst.msk [vmem:[#allocation5 + $0xa0] sm:$0xff] %vm1944_vm11, %v3965_v1  ;;  %v3775_v50 = vpop.permute.xlu1 %3774 }
 0x609   : > { %3849 = vst.msk [vmem:[#allocation5 + $0xa8] sm:$0xff] %vm1751_vm10, %v3775_v50 }
 0x60b   : > { %v3392_v62 = vpop.permute.xlu0 %3391 }
 0x60c   : > { %3465 = vst.msk [vmem:[#allocation5 + $0xb0] sm:$0xff] %vm1364_vm7, %v3392_v62  ;;  %v3202_v5 = vpop.permute.xlu1 %3201 }
 0x60d   : > { %3274 = vst.msk [vmem:[#allocation5 + $0xb8] sm:$0xff] %vm1171_vm6, %v3202_v5 }
 0x60f   : > { %v3394_v12 = vpop.permute.xlu0 %3393  ;;  %v4072_v15 = vld [vmem:[#allocation5 + $0xa0] sm:$0xff] }
 0x610   : > { %3466 = vst.msk [vmem:[#allocation5 + $0xb8] sm:$0xff] %vm1364_vm7, %v3394_v12  ;;  %v3967_v61 = vpop.permute.xlu1 %3966  ;;  %4861 = vmatprep.mubr.msk.f32.mxu1 %vm2021_vm12, %v4072_v15  ;;  %v7396_v15 = vld [vmem:[#allocation10_spill] sm:$0xff] }
 0x611   : > { %4041 = vst.msk [vmem:[#allocation5 + $0xa8] sm:$0xff] %vm1944_vm11, %v3967_v61 }
 0x613   : > { %v3587_v36 = vpop.permute.xlu0 %3586 }
 0x614   : > { %3659 = vst.msk [vmem:[#allocation5 + $0xb8] sm:$0xff] %vm1558_vm8, %v3587_v36  ;;  %v3585_v26 = vpop.permute.xlu1 %3584 }
 0x615   : > { %3658 = vst.msk [vmem:[#allocation5 + $0xb0] sm:$0xff] %vm1558_vm8, %v3585_v26  ;;  %v7397_v26 = vld [vmem:[#allocation11_spill] sm:$0xff] }
 0x617   : > { %v3204_v32 = vpop.permute.xlu0 %3203 }
 0x618   : > { %3275 = vst.msk [vmem:[#allocation5 + $0xc0] sm:$0xff] %vm1171_vm6, %v3204_v32  ;;  %v3777_v27 = vpop.permute.xlu1 %3776  ;;  %v4073_v13 = vld [vmem:[#allocation5 + $0xa8] sm:$0xff] }
 0x619   : > { %3850 = vst.msk [vmem:[#allocation5 + $0xb0] sm:$0xff] %vm1751_vm10, %v3777_v27  ;;  %4862 = vmatmul.mubr.msk.f32.gmra.mrb[20].mxu1 %vm2021_vm12, %v4073_v13 }
 0x61b   : > { %v3969_v25 = vpop.permute.xlu0 %3968 }
 0x61c   : > { %4042 = vst.msk [vmem:[#allocation5 + $0xb0] sm:$0xff] %vm1944_vm11, %v3969_v25  ;;  %v3779_v2 = vpop.permute.xlu1 %3778 }
 0x61d   : > { %3851 = vst.msk [vmem:[#allocation5 + $0xb8] sm:$0xff] %vm1751_vm10, %v3779_v2 }
 0x61f   : > { %v3396_v20 = vpop.permute.xlu0 %3395 }
 0x620   : > { %3467 = vst.msk [vmem:[#allocation5 + $0xc0] sm:$0xff] %vm1364_vm7, %v3396_v20  ;;  %v3206_v53 = vpop.permute.xlu1 %3205 }
 0x621   : > { %3276 = vst.msk [vmem:[#allocation5 + $0xc8] sm:$0xff] %vm1171_vm6, %v3206_v53 }
 0x623   : > { %v4833_v38 = vpop.f32.mrb[0].mxu1  ;;  %v3398_v10 = vpop.permute.xlu0 %3397  ;;  %v4074_v28 = vld [vmem:[#allocation5 + $0xb0] sm:$0xff] }
 0x624   : > { %3468 = vst.msk [vmem:[#allocation5 + $0xc8] sm:$0xff] %vm1364_vm7, %v3398_v10  ;;  %v3971_v40 = vpop.permute.xlu1 %3970  ;;  %v4261_v39 = vpop.f32.mrb[1].mxu1  ;;  %4864 = vmatprep.mubr.msk.f32.mxu1 %vm2021_vm12, %v4074_v28  ;;  %v4267_v30 = vadd.f32 %v4833_v38, %v7143_v23 }
 0x625   : > { %4043 = vst.msk [vmem:[#allocation5 + $0xb8] sm:$0xff] %vm1944_vm11, %v3971_v40  ;;  %v4262_v60 = vadd.f32 %v7143_v23, %v4261_v39 }
 0x626   : > { %v4421_v42 = vadd.f32 %v4267_v30, %v7393_v35  ;;  %v7398_v35 = vld [vmem:[#allocation12_spill] sm:$0xff] }
 0x627   : > { %v4420_v58 = vadd.f32 %v4262_v60, %v7392_v63  ;;  %v3591_v14 = vpop.permute.xlu0 %3590 }
 0x628   : > { %3661 = vst.msk [vmem:[#allocation5 + $0xc8] sm:$0xff] %vm1558_vm8, %v3591_v14  ;;  %v3589_v22 = vpop.permute.xlu1 %3588  ;;  %v4453_v51 = vmax.f32 %v4421_v42, 0.0 }
 0x629   : > { %v4452_v48 = vmax.f32 %v4420_v58, 0.0  ;;  %3660 = vst.msk [vmem:[#allocation5 + $0xc0] sm:$0xff] %vm1558_vm8, %v3589_v22 }
 0x62b   : > { %4484 = vxpose.xlu1.b32.start [1/16] (narrow) %v4452_v48, 8  ;;  %v3208_v16 = vpop.permute.xlu0 %3207 }
 0x62c   : > { %3277 = vst.msk [vmem:[#allocation5 + $0xd0] sm:$0xff] %vm1171_vm6, %v3208_v16  ;;  %v3781_v37 = vpop.permute.xlu1 %3780  ;;  %v4075_v54 = vld [vmem:[#allocation5 + $0xb8] sm:$0xff] }
 0x62d   : > { %3852 = vst.msk [vmem:[#allocation5 + $0xc0] sm:$0xff] %vm1751_vm10, %v3781_v37  ;;  %4865 = vmatmul.mubr.msk.f32.gmra.mrb[22].mxu1 %vm2021_vm12, %v4075_v54  ;;  %v7399_v16 = vld [vmem:[#allocation13_spill] sm:$0xff] }
 0x62f   : > { %4485 = vxpose.xlu1.b32.cont [2/16] (narrow) %v4453_v51, 8  ;;  %v3973_v47 = vpop.permute.xlu0 %3972 }
 0x630   : > { %4044 = vst.msk [vmem:[#allocation5 + $0xc0] sm:$0xff] %vm1944_vm11, %v3973_v47  ;;  %v3783_v34 = vpop.permute.xlu1 %3782 }
 0x631   : > { %3853 = vst.msk [vmem:[#allocation5 + $0xc8] sm:$0xff] %vm1751_vm10, %v3783_v34 }
 0x633   : > { %v3400_v21 = vpop.permute.xlu0 %3399 }
 0x634   : > { %3469 = vst.msk [vmem:[#allocation5 + $0xd0] sm:$0xff] %vm1364_vm7, %v3400_v21  ;;  %v3210_v46 = vpop.permute.xlu1 %3209 }
 0x635   : > { %3278 = vst.msk [vmem:[#allocation5 + $0xd8] sm:$0xff] %vm1171_vm6, %v3210_v46 }
 0x637   : > { %v3402_v9 = vpop.permute.xlu0 %3401  ;;  %v4076_v17 = vld [vmem:[#allocation5 + $0xc0] sm:$0xff] }
 0x638   : > { %3470 = vst.msk [vmem:[#allocation5 + $0xd8] sm:$0xff] %vm1364_vm7, %v3402_v9  ;;  %v3975_v55 = vpop.permute.xlu1 %3974  ;;  %v4836_v3 = vpop.f32.mrb[2].mxu1  ;;  %4867 = vmatprep.mubr.msk.f32.mxu1 %vm2021_vm12, %v4076_v17 }
 0x639   : > { %4045 = vst.msk [vmem:[#allocation5 + $0xc8] sm:$0xff] %vm1944_vm11, %v3975_v55  ;;  %v4271_v33 = vpop.f32.mrb[3].mxu1  ;;  %v4277_v59 = vadd.f32 %v4836_v3, %v7143_v23 }
 0x63a   : > { %v4272_v7 = vadd.f32 %v7143_v23, %v4271_v33 }
 0x63b   : > { %v3595_v4 = vpop.permute.xlu0 %3594  ;;  %v4423_v19 = vadd.f32 %v4277_v59, %v7395_v31 }
 0x63c   : > { %v4422_v41 = vadd.f32 %v4272_v7, %v7394_v18  ;;  %3663 = vst.msk [vmem:[#allocation5 + $0xd8] sm:$0xff] %vm1558_vm8, %v3595_v4  ;;  %v3593_v56 = vpop.permute.xlu1 %3592  ;;  %v7400_v4 = vld [vmem:[#allocation14_spill] sm:$0xff] }
 0x63d   : > { %3662 = vst.msk [vmem:[#allocation5 + $0xd0] sm:$0xff] %vm1558_vm8, %v3593_v56  ;;  %v4455_v24 = vmax.f32 %v4423_v19, 0.0 }
 0x63e   : > { %v4454_v0 = vmax.f32 %v4422_v41, 0.0  ;;  %v7401_v41 = vld [vmem:[#allocation15_spill] sm:$0xff] }
 0x63f   : > { %v3212_v57 = vpop.permute.xlu0 %3211 }
 0x640   : > { %3279 = vst.msk [vmem:[#allocation5 + $0xe0] sm:$0xff] %vm1171_vm6, %v3212_v57  ;;  %v3785_v43 = vpop.permute.xlu1 %3784  ;;  %4486 = vxpose.xlu1.b32.cont [3/16] (narrow) %v4454_v0, 8  ;;  %v4077_v11 = vld [vmem:[#allocation5 + $0xc8] sm:$0xff] }
 0x641   : > { %3854 = vst.msk [vmem:[#allocation5 + $0xd0] sm:$0xff] %vm1751_vm10, %v3785_v43  ;;  %4868 = vmatmul.mubr.msk.f32.gmra.mrb[24].mxu1 %vm2021_vm12, %v4077_v11 }
 0x643   : > { %v3977_v29 = vpop.permute.xlu0 %3976 }
 0x644   : > { %4046 = vst.msk [vmem:[#allocation5 + $0xd0] sm:$0xff] %vm1944_vm11, %v3977_v29  ;;  %v3787_v6 = vpop.permute.xlu1 %3786  ;;  %4487 = vxpose.xlu1.b32.cont [4/16] (narrow) %v4455_v24, 8  ;;  %v7402_v24 = vld [vmem:[#allocation16_spill] sm:$0xff] }
 0x645   : > { %3855 = vst.msk [vmem:[#allocation5 + $0xd8] sm:$0xff] %vm1751_vm10, %v3787_v6  ;;  %v7403_v6 = vld [vmem:[#allocation17_spill] sm:$0xff] }
 0x647   : > { %v3404_v8 = vpop.permute.xlu0 %3403 }
 0x648   : > { %3471 = vst.msk [vmem:[#allocation5 + $0xe0] sm:$0xff] %vm1364_vm7, %v3404_v8  ;;  %v3214_v49 = vpop.permute.xlu1 %3213 }
 0x649   : > { %3280 = vst.msk [vmem:[#allocation5 + $0xe8] sm:$0xff] %vm1171_vm6, %v3214_v49 }
 0x64b   : > { %v3406_v45 = vpop.permute.xlu0 %3405  ;;  %v4078_v44 = vld [vmem:[#allocation5 + $0xd0] sm:$0xff] }
 0x64c   : > { %3472 = vst.msk [vmem:[#allocation5 + $0xe8] sm:$0xff] %vm1364_vm7, %v3406_v45  ;;  %v3979_v52 = vpop.permute.xlu1 %3978  ;;  %v4839_v1 = vpop.f32.mrb[4].mxu1  ;;  %4870 = vmatprep.mubr.msk.f32.mxu1 %vm2021_vm12, %v4078_v44 }
 0x64d   : > { %4047 = vst.msk [vmem:[#allocation5 + $0xd8] sm:$0xff] %vm1944_vm11, %v3979_v52  ;;  %v4281_v50 = vpop.f32.mrb[5].mxu1  ;;  %v4287_v62 = vadd.f32 %v4839_v1, %v7143_v23 }
 0x64e   : > { %v4282_v5 = vadd.f32 %v7143_v23, %v4281_v50 }
 0x64f   : > { %v3599_v12 = vpop.permute.xlu0 %3598  ;;  %v4425_v32 = vadd.f32 %v4287_v62, %v7397_v26  ;;  %v7404_v62 = vld [vmem:[#allocation18_spill] sm:$0xff] }
 0x650   : > { %v4424_v61 = vadd.f32 %v4282_v5, %v7396_v15  ;;  %3665 = vst.msk [vmem:[#allocation5 + $0xe8] sm:$0xff] %vm1558_vm8, %v3599_v12  ;;  %v3597_v36 = vpop.permute.xlu1 %3596  ;;  %v7405_v12 = vld [vmem:[#allocation19_spill] sm:$0xff] }
 0x651   : > { %3664 = vst.msk [vmem:[#allocation5 + $0xe0] sm:$0xff] %vm1558_vm8, %v3597_v36  ;;  %v4457_v20 = vmax.f32 %v4425_v32, 0.0 }
 0x652   : > { %v4456_v27 = vmax.f32 %v4424_v61, 0.0 }
 0x653   : > { %v3216_v13 = vpop.permute.xlu0 %3215 }
 0x654   : > { %3281 = vst.msk [vmem:[#allocation5 + $0xf0] sm:$0xff] %vm1171_vm6, %v3216_v13  ;;  %v3789_v25 = vpop.permute.xlu1 %3788  ;;  %4488 = vxpose.xlu1.b32.cont [5/16] (narrow) %v4456_v27, 8  ;;  %v4079_v2 = vld [vmem:[#allocation5 + $0xd8] sm:$0xff] }
 0x655   : > { %3856 = vst.msk [vmem:[#allocation5 + $0xe0] sm:$0xff] %vm1751_vm10, %v3789_v25  ;;  %4871 = vmatmul.mubr.msk.f32.gmra.mrb[26].mxu1 %vm2021_vm12, %v4079_v2  ;;  %v7406_v25 = vld [vmem:[#allocation20_spill] sm:$0xff] }
 0x657   : > { %v3981_v53 = vpop.permute.xlu0 %3980 }
 0x658   : > { %4048 = vst.msk [vmem:[#allocation5 + $0xe0] sm:$0xff] %vm1944_vm11, %v3981_v53  ;;  %v3791_v38 = vpop.permute.xlu1 %3790  ;;  %4489 = vxpose.xlu1.b32.cont [6/16] (narrow) %v4457_v20, 8  ;;  %v7407_v20 = vld [vmem:[#allocation21_spill] sm:$0xff] }
 0x659   : > { %3857 = vst.msk [vmem:[#allocation5 + $0xe8] sm:$0xff] %vm1751_vm10, %v3791_v38 }
 0x65b   : > { %v3408_v10 = vpop.permute.xlu0 %3407 }
 0x65c   : > { %3473 = vst.msk [vmem:[#allocation5 + $0xf0] sm:$0xff] %vm1364_vm7, %v3408_v10  ;;  %v3218_v28 = vpop.permute.xlu1 %3217 }
 0x65d   : > { %3282 = vst.msk [vmem:[#allocation5 + $0xf8] sm:$0xff] %vm1171_vm6, %v3218_v28 }
 0x65f   : > { %v3410_v40 = vpop.permute.xlu0 %3409  ;;  %v4080_v39 = vld [vmem:[#allocation5 + $0xe0] sm:$0xff] }
 0x660   : > { %3474 = vst.msk [vmem:[#allocation5 + $0xf8] sm:$0xff] %vm1364_vm7, %v3410_v40  ;;  %v3983_v30 = vpop.permute.xlu1 %3982  ;;  %v4842_v60 = vpop.f32.mrb[6].mxu1  ;;  %4873 = vmatprep.mubr.msk.f32.mxu1 %vm2021_vm12, %v4080_v39 }
 0x661   : > { %4049 = vst.msk [vmem:[#allocation5 + $0xe8] sm:$0xff] %vm1944_vm11, %v3983_v30  ;;  %v4291_v63 = vpop.f32.mrb[7].mxu1  ;;  %v4297_v58 = vadd.f32 %v4842_v60, %v7143_v23  ;;  %v7408_v60 = vld [vmem:[#allocation22_spill] sm:$0xff] }
 0x662   : > { %v4292_v14 = vadd.f32 %v7143_v23, %v4291_v63 }
 0x663   : > { %v3603_v22 = vpop.permute.xlu0 %3602  ;;  %v4427_v37 = vadd.f32 %v4297_v58, %v7399_v16  ;;  %v7409_v58 = vld [vmem:[#allocation23_spill] sm:$0xff] }
 0x664   : > { %v4426_v42 = vadd.f32 %v4292_v14, %v7398_v35  ;;  %v3601_v48 = vpop.permute.xlu1 %3600  ;;  %3667 = vst.msk [vmem:[#allocation5 + $0xf8] sm:$0xff] %vm1558_vm8, %v3603_v22 }
 0x665   : > { %3666 = vst.msk [vmem:[#allocation5 + $0xf0] sm:$0xff] %vm1558_vm8, %v3601_v48  ;;  %v4459_v21 = vmax.f32 %v4427_v37, 0.0 }
 0x666   : > { %v4458_v54 = vmax.f32 %v4426_v42, 0.0 }
 0x667   : > { %v3795_v51 = vpop.permute.xlu0 %3794 }
 0x668   : > { %v3793_v47 = vpop.permute.xlu1 %3792  ;;  %4490 = vxpose.xlu1.b32.cont [7/16] (narrow) %v4458_v54, 8  ;;  %v4081_v34 = vld [vmem:[#allocation5 + $0xe8] sm:$0xff]  ;;  %3859 = vst.msk [vmem:[#allocation5 + $0xf8] sm:$0xff] %vm1751_vm10, %v3795_v51  ;;  %v7410_v54 = vld [vmem:[#allocation25_spill] sm:$0xff] }
 0x669   : > { %3858 = vst.msk [vmem:[#allocation5 + $0xf0] sm:$0xff] %vm1751_vm10, %v3793_v47  ;;  %4874 = vmatmul.mubr.msk.f32.gmra.mrb[28].mxu1 %vm2021_vm12, %v4081_v34  ;;  %v7411_v47 = vld [vmem:[#allocation26_spill] sm:$0xff] }
 0x66b   : > { %v3987_v46 = vpop.permute.xlu0 %3986 }
 0x66c   : > { %v3985_v9 = vpop.permute.xlu1 %3984  ;;  %4491 = vxpose.xlu1.b32.cont [8/16] (narrow) %v4459_v21, 8  ;;  %4051 = vst.msk [vmem:[#allocation5 + $0xf8] sm:$0xff] %vm1944_vm11, %v3987_v46 }
 0x66d   : > { %4050 = vst.msk [vmem:[#allocation5 + $0xf0] sm:$0xff] %vm1944_vm11, %v3985_v9 }
 0x673   : > { %v4083_v17 = vld [vmem:[#allocation5 + $0xf8] sm:$0xff] }
 0x674   : > { %v4845_v55 = vpop.f32.mrb[8].mxu1  ;;  %v4082_v3 = vld [vmem:[#allocation5 + $0xf0] sm:$0xff] }
 0x675   : > { %v4301_v33 = vpop.f32.mrb[9].mxu1  ;;  %4876 = vmatprep.mubr.msk.f32.mxu1 %vm2021_vm12, %v4082_v3  ;;  %v4307_v59 = vadd.f32 %v4845_v55, %v7143_v23 }
 0x676   : > { %v4302_v7 = vadd.f32 %v7143_v23, %v4301_v33  ;;  %4877 = vmatmul.mubr.msk.f32.gmra.mrb[30].mxu1 %vm2021_vm12, %v4083_v17  ;;  %v7412_v33 = vld [vmem:[#allocation27_spill] sm:$0xff] }
 0x677   : > { %v4429_v56 = vadd.f32 %v4307_v59, %v7401_v41 }
 0x678   : > { %v4428_v18 = vadd.f32 %v4302_v7, %v7400_v4  ;;  %v7413_v7 = vld [vmem:[#allocation28_spill] sm:$0xff] }
 0x679   : > { %v4461_v19 = vmax.f32 %v4429_v56, 0.0 }
 0x67a   : > { %v4460_v31 = vmax.f32 %v4428_v18, 0.0 }
 0x67c   : > { %4492 = vxpose.xlu1.b32.cont [9/16] (narrow) %v4460_v31, 8 }
 0x680   : > { %4493 = vxpose.xlu1.b32.cont [10/16] (narrow) %v4461_v19, 8 }
 0x688   : > { %v4848_v0 = vpop.f32.mrb[10].mxu1 }
 0x689   : > { %v4311_v57 = vpop.f32.mrb[11].mxu1  ;;  %v4317_v43 = vadd.f32 %v4848_v0, %v7143_v23 }
 0x68a   : > { %v4312_v11 = vadd.f32 %v7143_v23, %v4311_v57  ;;  %v7414_v57 = vld [vmem:[#allocation30_spill] sm:$0xff] }
 0x68b   : > { %v4431_v8 = vadd.f32 %v4317_v43, %v7403_v6 }
 0x68c   : > { %v4430_v29 = vadd.f32 %v4312_v11, %v7402_v24  ;;  %v7415_v11 = vld [vmem:[#allocation32_spill] sm:$0xff] }
 0x68d   : > { %v4463_v45 = vmax.f32 %v4431_v8, 0.0 }
 0x68e   : > { %v4462_v49 = vmax.f32 %v4430_v29, 0.0 }
 0x690   : > { %4494 = vxpose.xlu1.b32.cont [11/16] (narrow) %v4462_v49, 8 }
 0x694   : > { %4495 = vxpose.xlu1.b32.cont [12/16] (narrow) %v4463_v45, 8 }
 0x69c   : > { %v4851_v44 = vpop.f32.mrb[12].mxu1 }
 0x69d   : > { %v4321_v52 = vpop.f32.mrb[13].mxu1  ;;  %v4327_v1 = vadd.f32 %v4851_v44, %v7143_v23 }
 0x69e   : > { %v4322_v50 = vadd.f32 %v7143_v23, %v4321_v52  ;;  %v7416_v52 = vld [vmem:[#allocation34_spill] sm:$0xff] }
 0x69f   : > { %v4433_v15 = vadd.f32 %v4327_v1, %v7405_v12 }
 0x6a0   : > { %v4432_v5 = vadd.f32 %v4322_v50, %v7404_v62  ;;  %v7417_v50 = vld [vmem:[#allocation36_spill] sm:$0xff] }
 0x6a1   : > { %v4465_v36 = vmax.f32 %v4433_v15, 0.0 }
 0x6a2   : > { %v4464_v61 = vmax.f32 %v4432_v5, 0.0 }
 0x6a4   : > { %4496 = vxpose.xlu1.b32.cont [13/16] (narrow) %v4464_v61, 8 }
 0x6a8   : > { %4497 = vxpose.xlu1.b32.cont [14/16] (narrow) %v4465_v36, 8 }
 0x6b0   : > { %v4854_v26 = vpop.f32.mrb[14].mxu1 }
 0x6b1   : > { %v4331_v32 = vpop.f32.mrb[15].mxu1  ;;  %v4337_v27 = vadd.f32 %v4854_v26, %v7143_v23 }
 0x6b2   : > { %v4332_v13 = vadd.f32 %v7143_v23, %v4331_v32  ;;  %v7418_v32 = vld [vmem:[#allocation38_spill] sm:$0xff] }
 0x6b3   : > { %v4435_v53 = vadd.f32 %v4337_v27, %v7407_v20 }
 0x6b4   : > { %v4434_v2 = vadd.f32 %v4332_v13, %v7406_v25  ;;  %v7419_v13 = vld [vmem:[#allocation40_spill] sm:$0xff] }
 0x6b5   : > { %v4467_v10 = vmax.f32 %v4435_v53, 0.0 }
 0x6b6   : > { %v4466_v38 = vmax.f32 %v4434_v2, 0.0 }
 0x6b8   : > { %4498 = vxpose.xlu1.b32.cont [15/16] (narrow) %v4466_v38, 8 }
 0x6bc   : > { %4499 = vxpose.xlu1.b32.end [16/16] (narrow) %v4467_v10, 8 }
 0x6c4   : > { %v4857_v28 = vpop.f32.mrb[16].mxu1 }
 0x6c5   : > { %v4341_v40 = vpop.f32.mrb[17].mxu1  ;;  %v4347_v39 = vadd.f32 %v4857_v28, %v7143_v23 }
 0x6c6   : > { %v4342_v30 = vadd.f32 %v7143_v23, %v4341_v40  ;;  %v7420_v40 = vld [vmem:[#allocation42_spill] sm:$0xff] }
 0x6c7   : > { %v4437_v14 = vadd.f32 %v4347_v39, %v7409_v58 }
 0x6c8   : > { %v4436_v63 = vadd.f32 %v4342_v30, %v7408_v60  ;;  %v7421_v30 = vld [vmem:[#allocation44_spill] sm:$0xff] }
 0x6c9   : > { %v4469_v35 = vmax.f32 %v4437_v14, 0.0 }
 0x6ca   : > { %v4468_v22 = vmax.f32 %v4436_v63, 0.0 }
 0x6cc   : > { %4516 = vxpose.xlu0.b32.start [1/16] (narrow) %v4468_v22, 8 }
 0x6d0   : > { %4517 = vxpose.xlu0.b32.cont [2/16] (narrow) %v4469_v35, 8 }
 0x6d8   : > { %v4860_v42 = vpop.f32.mrb[18].mxu1 }
 0x6d9   : > { %v4351_v48 = vpop.f32.mrb[19].mxu1  ;;  %v4357_v16 = vadd.f32 %v4860_v42, %v7143_v23 }
 0x6da   : > { %v4352_v37 = vadd.f32 %v7143_v23, %v4351_v48  ;;  %v7422_v48 = vld [vmem:[#allocation47_spill] sm:$0xff] }
 0x6db   : > { %v4439_v34 = vadd.f32 %v4357_v16, %v7411_v47 }
 0x6dc   : > { %v4438_v51 = vadd.f32 %v4352_v37, %v7410_v54  ;;  %v7423_v37 = vld [vmem:[#allocation48_spill] sm:$0xff] }
 0x6dd   : > { %v4471_v46 = vmax.f32 %v4439_v34, 0.0 }
 0x6de   : > { %v4470_v21 = vmax.f32 %v4438_v51, 0.0 }
 0x6e0   : > { %4518 = vxpose.xlu0.b32.cont [3/16] (narrow) %v4470_v21, 8 }
 0x6e4   : > { %4519 = vxpose.xlu0.b32.cont [4/16] (narrow) %v4471_v46, 8 }
 0x6ec   : > { %v4863_v9 = vpop.f32.mrb[20].mxu1 }
 0x6ed   : > { %v4361_v17 = vpop.f32.mrb[21].mxu1  ;;  %v4367_v55 = vadd.f32 %v4863_v9, %v7143_v23 }
 0x6ee   : > { %v4362_v3 = vadd.f32 %v7143_v23, %v4361_v17 }
 0x6ef   : > { %v4441_v4 = vadd.f32 %v4367_v55, %v7413_v7 }
 0x6f0   : > { %v4440_v59 = vadd.f32 %v4362_v3, %v7412_v33 }
 0x6f1   : > { %v4473_v41 = vmax.f32 %v4441_v4, 0.0 }
 0x6f2   : > { %v4472_v18 = vmax.f32 %v4440_v59, 0.0 }
 0x6f4   : > { %4520 = vxpose.xlu0.b32.cont [5/16] (narrow) %v4472_v18, 8 }
 0x6f8   : > { %4521 = vxpose.xlu0.b32.cont [6/16] (narrow) %v4473_v41, 8 }
 0x700   : > { %v4866_v56 = vpop.f32.mrb[22].mxu1  ;;  %v4500_v34 = vpop.trf.xlu1 }
 0x701   : > { %v4371_v31 = vpop.f32.mrb[23].mxu1  ;;  %v4377_v19 = vadd.f32 %v4866_v56, %v7143_v23 }
 0x702   : > { %v4372_v0 = vadd.f32 %v7143_v23, %v4371_v31 }
 0x703   : > { %v4443_v24 = vadd.f32 %v4377_v19, %v7415_v11 }
 0x704   : > { %v4442_v43 = vadd.f32 %v4372_v0, %v7414_v57 }
 0x705   : > { %v4475_v6 = vmax.f32 %v4443_v24, 0.0 }
 0x706   : > { %v4474_v29 = vmax.f32 %v4442_v43, 0.0 }
 0x708   : > { %4522 = vxpose.xlu0.b32.cont [7/16] (narrow) %v4474_v29, 8 }
 0x70c   : > { %4523 = vxpose.xlu0.b32.cont [8/16] (narrow) %v4475_v6, 8 }
 0x714   : > { %v4869_v8 = vpop.f32.mrb[24].mxu1 }
 0x715   : > { %v4381_v49 = vpop.f32.mrb[25].mxu1  ;;  %v4387_v45 = vadd.f32 %v4869_v8, %v7143_v23 }
 0x716   : > { %v4382_v44 = vadd.f32 %v7143_v23, %v4381_v49 }
 0x717   : > { %v4445_v62 = vadd.f32 %v4387_v45, %v7417_v50 }
 0x718   : > { %v4444_v1 = vadd.f32 %v4382_v44, %v7416_v52 }
 0x719   : > { %v4477_v12 = vmax.f32 %v4445_v62, 0.0 }
 0x71a   : > { %v4476_v5 = vmax.f32 %v4444_v1, 0.0 }
 0x71c   : > { %4524 = vxpose.xlu0.b32.cont [9/16] (narrow) %v4476_v5, 8 }
 0x720   : > { %4525 = vxpose.xlu0.b32.cont [10/16] (narrow) %v4477_v12, 8 }
 0x728   : > { %v4872_v15 = vpop.f32.mrb[26].mxu1 }
 0x729   : > { %v4391_v61 = vpop.f32.mrb[27].mxu1  ;;  %v4397_v36 = vadd.f32 %v4872_v15, %v7143_v23 }
 0x72a   : > { %v4392_v26 = vadd.f32 %v7143_v23, %v4391_v61 }
 0x72b   : > { %v4447_v25 = vadd.f32 %v4397_v36, %v7419_v13 }
 0x72c   : > { %v4446_v27 = vadd.f32 %v4392_v26, %v7418_v32 }
 0x72d   : > { %v4479_v20 = vmax.f32 %v4447_v25, 0.0 }
 0x72e   : > { %v4478_v2 = vmax.f32 %v4446_v27, 0.0 }
 0x730   : > { %4526 = vxpose.xlu0.b32.cont [11/16] (narrow) %v4478_v2, 8 }
 0x734   : > { %4527 = vxpose.xlu0.b32.cont [12/16] (narrow) %v4479_v20, 8 }
 0x73c   : > { %v4875_v53 = vpop.f32.mrb[28].mxu1 }
 0x73d   : > { %v4401_v38 = vpop.f32.mrb[29].mxu1  ;;  %v4407_v10 = vadd.f32 %v4875_v53, %v7143_v23 }
 0x73e   : > { %v4402_v28 = vadd.f32 %v7143_v23, %v4401_v38 }
 0x73f   : > { %v4449_v60 = vadd.f32 %v4407_v10, %v7421_v30 }
 0x740   : > { %v4448_v39 = vadd.f32 %v4402_v28, %v7420_v40 }
 0x741   : > { %v4481_v58 = vmax.f32 %v4449_v60, 0.0 }
 0x742   : > { %v4480_v63 = vmax.f32 %v4448_v39, 0.0 }
 0x744   : > { %4528 = vxpose.xlu0.b32.cont [13/16] (narrow) %v4480_v63, 8 }
 0x748   : > { %4529 = vxpose.xlu0.b32.cont [14/16] (narrow) %v4481_v58, 8 }
 0x749   : > { %v4878_v14 = vpop.f32.mrb[30].mxu1 }
 0x74a   : > { %v4411_v22 = vpop.f32.mrb[31].mxu1  ;;  %v4417_v35 = vadd.f32 %v4878_v14, %v7143_v23 }
 0x74b   : > { %v4412_v42 = vadd.f32 %v7143_v23, %v4411_v22 }
 0x74c   : > { %v4451_v54 = vadd.f32 %v4417_v35, %v7423_v37 }
 0x74d   : > { %v4450_v16 = vadd.f32 %v4412_v42, %v7422_v48 }
 0x74e   : > { %v4483_v47 = vmax.f32 %v4451_v54, 0.0 }
 0x74f   : > { %v4482_v51 = vmax.f32 %v4450_v16, 0.0 }
 0x751   : > { %4530 = vxpose.xlu0.b32.cont [15/16] (narrow) %v4482_v51, 8 }
 0x755   : > { %4531 = vxpose.xlu0.b32.end [16/16] (narrow) %v4483_v47, 8 }
 0x799   : > { %v4532_v21 = vpop.trf.xlu0 }
 0x79a   : > { %v4550_v46 = vcombine.low %v4500_v34, %v4532_v21 }
 0x79c   : > { %4552 = vst [vmem:[%s224_s6] sm:$0xff] %v4550_v46 }
 0x79d PF: > { %s15_s18 = sadd.s32 1, %s4919_s18  }
 0x79e   : > { %p12_p4 = scmp.ge.s32.totalorder %s15_s18, 4  }
 0x7a0   :  { %14 = sbr.rel (!%p12_p4) target bundleno = 1 (0x1), region = 76 }

</bundles_post_ra>
